<compile_context>
chip_gen: v7x
topology: tpu7x:2x2x1
jax: 0.10.0
libtpu: 0.0.40
codegen_flags: <defaults>
</compile_context>

<pallas_src>
import functools
import math

import jax
import jax.numpy as jnp
from jax.experimental import pallas as pl
from jax.experimental.pallas import tpu as pltpu

NEG_INF = -1e9
LN_EPS = 1e-5


# ----------------------------------------------------------------------------
# In-kernel helpers (trace-time; operate on VMEM-resident values)
# ----------------------------------------------------------------------------
def _proj2d(x, w, b):
    """x: (M, K) f32, w: (K, N) bf16, b: (1, N) f32 -> (M, N) f32."""
    return jnp.dot(x.astype(jnp.bfloat16), w,
                   preferred_element_type=jnp.float32) + b


def _add_ln(x, res, g, b):
    h = x + res
    mean = jnp.mean(h, axis=-1, keepdims=True)
    var = jnp.mean(jnp.square(h - mean), axis=-1, keepdims=True)
    return (h - mean) * jax.lax.rsqrt(var + LN_EPS) * g + b


def _mha(q_in, kv_in, bias, wq, bq, wk, bk, wv, bv, wo, bo, *, n_heads):
    """Batched-head attention; every matmul is one head-batched bf16 einsum.

    q_in: (Sq, D) f32, kv_in: (Sk, D) f32, bias broadcastable to (H, Sq, Sk).
    wq/wk/wv: (H, D, dh) bf16, bq/bk/bv: (H, 1, dh) f32,
    wo: (H, dh, D) bf16, bo: (1, D) f32.
    Softmax scale is pre-folded into wq/bq at init.
    """
    H = n_heads
    Sq, D = q_in.shape
    Sk = kv_in.shape[0]
    qb = jnp.broadcast_to(q_in.astype(jnp.bfloat16)[None], (H, Sq, D))
    kvb = jnp.broadcast_to(kv_in.astype(jnp.bfloat16)[None], (H, Sk, D))

    q3 = jnp.einsum('hsd,hde->hse', qb, wq,
                    preferred_element_type=jnp.float32) + bq
    k3 = jnp.einsum('hsd,hde->hse', kvb, wk,
                    preferred_element_type=jnp.float32) + bk
    v3 = jnp.einsum('hsd,hde->hse', kvb, wv,
                    preferred_element_type=jnp.float32) + bv

    s = jnp.einsum('hqd,hkd->hqk', q3.astype(jnp.bfloat16),
                   k3.astype(jnp.bfloat16),
                   preferred_element_type=jnp.float32) + bias
    s = s - jnp.max(s, axis=-1, keepdims=True)
    p = jnp.exp(s)
    p = p * pl.reciprocal(jnp.sum(p, axis=-1, keepdims=True), approx=True)

    ctx = jnp.einsum('hqk,hkd->hqd', p.astype(jnp.bfloat16),
                     v3.astype(jnp.bfloat16),
                     preferred_element_type=jnp.float32)
    # Head merge + output projection without reshape/transpose:
    # out = sum_h ctx_h @ Wo_h
    out = jnp.einsum('hqd,hde->hqe', ctx.astype(jnp.bfloat16), wo,
                     preferred_element_type=jnp.float32)
    return jnp.sum(out, axis=0) + bo                     # (Sq, D) f32


# ----------------------------------------------------------------------------
# Fused stack kernels: grid = (B, L), activation carried in VMEM across L
# ----------------------------------------------------------------------------
def _encoder_stack_kernel(x_ref, pad_ref,
                          wq_ref, bq_ref, wk_ref, bk_ref, wv_ref, bv_ref,
                          wo_ref, bo_ref, ln1g_ref, ln1b_ref,
                          w1_ref, b1_ref, w2_ref, b2_ref, ln2g_ref, ln2b_ref,
                          o_ref, carry_ref, *, n_heads):
    l = pl.program_id(1)

    @pl.when(l == 0)
    def _():
        carry_ref[...] = x_ref[0]

    x = carry_ref[...]                                    # (S, D) f32
    bias = jnp.where(pad_ref[0] > 0.5, NEG_INF, 0.0)      # (1, S) additive

    attn = _mha(x, x, bias,
                wq_ref[0], bq_ref[0], wk_ref[0], bk_ref[0],
                wv_ref[0], bv_ref[0], wo_ref[0], bo_ref[0], n_heads=n_heads)
    x1 = _add_ln(attn, x, ln1g_ref[0], ln1b_ref[0])

    h = jnp.maximum(_proj2d(x1, w1_ref[0], b1_ref[0]), 0.0)
    f = _proj2d(h, w2_ref[0], b2_ref[0])
    out = _add_ln(f, x1, ln2g_ref[0], ln2b_ref[0])

    carry_ref[...] = out
    o_ref[0] = out.astype(o_ref.dtype)


def _decoder_stack_kernel(y_ref, enc_ref, tpad_ref, spad_ref,
                          swq_ref, sbq_ref, swk_ref, sbk_ref, swv_ref, sbv_ref,
                          swo_ref, sbo_ref, ln1g_ref, ln1b_ref,
                          cwq_ref, cbq_ref, cwk_ref, cbk_ref, cwv_ref, cbv_ref,
                          cwo_ref, cbo_ref, ln2g_ref, ln2b_ref,
                          w1_ref, b1_ref, w2_ref, b2_ref, ln3g_ref, ln3b_ref,
                          o_ref, carry_ref, *, n_heads):
    l = pl.program_id(1)

    @pl.when(l == 0)
    def _():
        carry_ref[...] = y_ref[0]

    y = carry_ref[...]                                    # (St, D) f32
    enc = enc_ref[0]                                      # (Ss, D) f32
    St = y.shape[0]

    # masks built in-kernel: causal via 2-D iota, pads from (1, S) rows
    row = jax.lax.broadcasted_iota(jnp.int32, (St, St), 0)
    col = jax.lax.broadcasted_iota(jnp.int32, (St, St), 1)
    self_bias = (jnp.where(col > row, NEG_INF, 0.0)
                 + jnp.where(tpad_ref[0] > 0.5, NEG_INF, 0.0))   # (St, St)
    cross_bias = jnp.where(spad_ref[0] > 0.5, NEG_INF, 0.0)      # (1, Ss)

    a = _mha(y, y, self_bias,
             swq_ref[0], sbq_ref[0], swk_ref[0], sbk_ref[0],
             swv_ref[0], sbv_ref[0], swo_ref[0], sbo_ref[0], n_heads=n_heads)
    y1 = _add_ln(a, y, ln1g_ref[0], ln1b_ref[0])

    c = _mha(y1, enc, cross_bias,
             cwq_ref[0], cbq_ref[0], cwk_ref[0], cbk_ref[0],
             cwv_ref[0], cbv_ref[0], cwo_ref[0], cbo_ref[0], n_heads=n_heads)
    y2 = _add_ln(c, y1, ln2g_ref[0], ln2b_ref[0])

    h = jnp.maximum(_proj2d(y2, w1_ref[0], b1_ref[0]), 0.0)
    f = _proj2d(h, w2_ref[0], b2_ref[0])
    out = _add_ln(f, y2, ln3g_ref[0], ln3b_ref[0])

    carry_ref[...] = out
    o_ref[0] = out.astype(o_ref.dtype)


def _out_proj_kernel(x_ref, w_ref, b_ref, o_ref):
    y = jnp.dot(x_ref[...].astype(jnp.bfloat16), w_ref[...],
                preferred_element_type=jnp.float32) + b_ref[...]
    o_ref[...] = y.astype(o_ref.dtype)


# ----------------------------------------------------------------------------
# pallas_call wrappers
# ----------------------------------------------------------------------------
def encoder_stack(x, src_pad, p, n_heads):
    B, S, D = x.shape
    L = p["wq"].shape[0]
    F = p["w1"].shape[2]
    H = n_heads
    dh = D // H

    def wspec(shape):   # per-layer (stacked along L) weight block
        return pl.BlockSpec((1,) + shape, lambda b, l: (l,) + (0,) * len(shape))

    def bspec(shape):   # per-batch-element block
        return pl.BlockSpec((1,) + shape, lambda b, l: (b,) + (0,) * len(shape))

    kernel = functools.partial(_encoder_stack_kernel, n_heads=H)
    return pl.pallas_call(
        kernel,
        out_shape=jax.ShapeDtypeStruct((B, S, D), jnp.float32),
        grid=(B, L),
        in_specs=[
            bspec((S, D)),                                 # x
            bspec((1, S)),                                 # src pad mask
            wspec((H, D, dh)), wspec((H, 1, dh)),          # wq, bq (scale folded)
            wspec((H, D, dh)), wspec((H, 1, dh)),          # wk, bk
            wspec((H, D, dh)), wspec((H, 1, dh)),          # wv, bv
            wspec((H, dh, D)), wspec((1, D)),              # wo, bo
            wspec((1, D)), wspec((1, D)),                  # ln1 g, b
            wspec((D, F)), wspec((1, F)),                  # ffn w1, b1
            wspec((F, D)), wspec((1, D)),                  # ffn w2, b2
            wspec((1, D)), wspec((1, D)),                  # ln2 g, b
        ],
        out_specs=bspec((S, D)),
        scratch_shapes=[pltpu.VMEM((S, D), jnp.float32)],
        compiler_params=pltpu.CompilerParams(
            dimension_semantics=("parallel", "arbitrary")),
    )(
        x, src_pad,
        p["wq"], p["bq"], p["wk"], p["bk"], p["wv"], p["bv"],
        p["wo"], p["bo"], p["ln1g"], p["ln1b"],
        p["w1"], p["b1"], p["w2"], p["b2"], p["ln2g"], p["ln2b"],
    )


def decoder_stack(y, enc_out, trg_pad, src_pad, p, n_heads):
    B, St, D = y.shape
    Ss = enc_out.shape[1]
    L = p["swq"].shape[0]
    F = p["w1"].shape[2]
    H = n_heads
    dh = D // H

    def wspec(shape):
        return pl.BlockSpec((1,) + shape, lambda b, l: (l,) + (0,) * len(shape))

    def bspec(shape):
        return pl.BlockSpec((1,) + shape, lambda b, l: (b,) + (0,) * len(shape))

    kernel = functools.partial(_decoder_stack_kernel, n_heads=H)
    return pl.pallas_call(
        kernel,
        out_shape=jax.ShapeDtypeStruct((B, St, D), jnp.float32),
        grid=(B, L),
        in_specs=[
            bspec((St, D)),                                # y
            bspec((Ss, D)),                                # enc_out (resident across L)
            bspec((1, St)),                                # trg pad mask
            bspec((1, Ss)),                                # src pad mask
            # masked self-attention
            wspec((H, D, dh)), wspec((H, 1, dh)),
            wspec((H, D, dh)), wspec((H, 1, dh)),
            wspec((H, D, dh)), wspec((H, 1, dh)),
            wspec((H, dh, D)), wspec((1, D)),
            wspec((1, D)), wspec((1, D)),                  # ln1
            # encoder-decoder cross-attention
            wspec((H, D, dh)), wspec((H, 1, dh)),
            wspec((H, D, dh)), wspec((H, 1, dh)),
            wspec((H, D, dh)), wspec((H, 1, dh)),
            wspec((H, dh, D)), wspec((1, D)),
            wspec((1, D)), wspec((1, D)),                  # ln2
            # feed-forward
            wspec((D, F)), wspec((1, F)),
            wspec((F, D)), wspec((1, D)),
            wspec((1, D)), wspec((1, D)),                  # ln3
        ],
        out_specs=bspec((St, D)),
        scratch_shapes=[pltpu.VMEM((St, D), jnp.float32)],
        compiler_params=pltpu.CompilerParams(
            dimension_semantics=("parallel", "arbitrary")),
    )(
        y, enc_out, trg_pad, src_pad,
        p["swq"], p["sbq"], p["swk"], p["sbk"], p["swv"], p["sbv"],
        p["swo"], p["sbo"], p["ln1g"], p["ln1b"],
        p["cwq"], p["cbq"], p["cwk"], p["cbk"], p["cwv"], p["cbv"],
        p["cwo"], p["cbo"], p["ln2g"], p["ln2b"],
        p["w1"], p["b1"], p["w2"], p["b2"], p["ln3g"], p["ln3b"],
    )


def output_projection(x2d, w_pad, b_pad, v_true):
    """x2d: (M, D) f32, w_pad: (D, Vp) bf16 (pre-padded/cast), b_pad: (1, Vp)."""
    M, D = x2d.shape
    Vp = w_pad.shape[1]
    # TODO(synk): tile over rows/vocab (grid) for realistic vocab sizes; a
    #             single lane-dense block is fine at Vp=128.
    out = pl.pallas_call(
        _out_proj_kernel,
        out_shape=jax.ShapeDtypeStruct((M, Vp), jnp.float32),
        grid=(1,),
        in_specs=[pl.BlockSpec((M, D), lambda i: (0, 0)),
                  pl.BlockSpec((D, Vp), lambda i: (0, 0)),
                  pl.BlockSpec((1, Vp), lambda i: (0, 0))],
        out_specs=pl.BlockSpec((M, Vp), lambda i: (0, 0)),
        compiler_params=pltpu.CompilerParams(
            dimension_semantics=("arbitrary",)),
    )(x2d, w_pad, b_pad)
    return out[:, :v_true]


# ----------------------------------------------------------------------------
# Model glue (plain JAX): embeddings, pad masks, wrapper
# ----------------------------------------------------------------------------
def sinusoidal_positions(max_len, d_model):
    pos = jnp.arange(max_len, dtype=jnp.float32)[:, None]
    i = jnp.arange(d_model, dtype=jnp.float32)[None, :]
    angle = pos / jnp.power(10000.0, (2.0 * jnp.floor(i / 2.0)) / d_model)
    pe = jnp.where(jnp.arange(d_model)[None, :] % 2 == 0,
                   jnp.sin(angle), jnp.cos(angle))
    return pe.astype(jnp.float32)


def transformer_forward(params, source, target, cfg):
    PAD = cfg["PAD"]
    H = cfg["n_heads"]
    D = cfg["d_model"]
    B, Ss = source.shape
    St = target.shape[1]

    src_pad = (source == PAD).astype(jnp.float32).reshape(B, 1, Ss)
    trg_pad = (target == PAD).astype(jnp.float32).reshape(B, 1, St)

    # encoder
    x = jnp.take(params["enc"]["tok_emb"], source, axis=0) * math.sqrt(D)
    x = x + params["enc"]["pos_emb"][:Ss][None]
    enc_out = encoder_stack(x, src_pad, params["enc"]["stack"], H)

    # decoder
    y = jnp.take(params["dec"]["tok_emb"], target, axis=0) * math.sqrt(D)
    y = y + params["dec"]["pos_emb"][:St][None]
    dec_out = decoder_stack(y, enc_out, trg_pad, src_pad,
                            params["dec"]["stack"], H)

    logits = output_projection(dec_out.reshape(B * St, D),
                               params["dec"]["out_w"], params["dec"]["out_b"],
                               cfg["trg_vocab_size"])
    return logits.reshape(B, St, cfg["trg_vocab_size"])


# ----------------------------------------------------------------------------
# Parameter init: per-head bf16 weight stacks, scale folding, layer stacking
# ----------------------------------------------------------------------------
def _split_heads_in(w, b, n_heads, scale=1.0):
    """w: (D, N) -> (H, D, dh) bf16; b: (N,) -> (H, 1, dh) f32."""
    D, N = w.shape
    dh = N // n_heads
    wh = (w * scale).reshape(D, n_heads, dh).transpose(1, 0, 2)
    bh = (b * scale).reshape(n_heads, dh)[:, None, :]
    return wh.astype(jnp.bfloat16), bh.astype(jnp.float32)


def _split_heads_out(w, n_heads):
    """w: (D, D) -> (H, dh, D) bf16."""
    D = w.shape[0]
    dh = D // n_heads
    return w.reshape(n_heads, dh, D).astype(jnp.bfloat16)


def _attn_params(key, D, H, scale):
    kq, kk, kv, ko = jax.random.split(key, 4)

    def dense(k):
        return jax.random.normal(k, (D, D), jnp.float32) * 0.02

    zero = jnp.zeros((D,), jnp.float32)
    wq, bq = _split_heads_in(dense(kq), zero, H, scale)   # softmax scale folded
    wk, bk = _split_heads_in(dense(kk), zero, H)
    wv, bv = _split_heads_in(dense(kv), zero, H)
    wo = _split_heads_out(dense(ko), H)
    bo = jnp.zeros((1, D), jnp.float32)
    return dict(wq=wq, bq=bq, wk=wk, bk=bk, wv=wv, bv=bv, wo=wo, bo=bo)


def _ffn_params(k1, k2, D, F):
    w1 = (jax.random.normal(k1, (D, F), jnp.float32) * 0.02).astype(jnp.bfloat16)
    w2 = (jax.random.normal(k2, (F, D), jnp.float32) * 0.02).astype(jnp.bfloat16)
    return dict(w1=w1, b1=jnp.zeros((1, F), jnp.float32),
                w2=w2, b2=jnp.zeros((1, D), jnp.float32))


def _enc_layer(key, D, F, H, scale):
    k1, k2, k3 = jax.random.split(key, 3)
    ones = jnp.ones((1, D), jnp.float32)
    zeros = jnp.zeros((1, D), jnp.float32)
    p = dict(_attn_params(k1, D, H, scale))
    p.update(_ffn_params(k2, k3, D, F))
    p.update(ln1g=ones, ln1b=zeros, ln2g=ones, ln2b=zeros)
    return p


def _dec_layer(key, D, F, H, scale):
    k1, k2, k3, k4 = jax.random.split(key, 4)
    ones = jnp.ones((1, D), jnp.float32)
    zeros = jnp.zeros((1, D), jnp.float32)
    p = {"s" + k: v for k, v in _attn_params(k1, D, H, scale).items()}
    p.update({"c" + k: v for k, v in _attn_params(k2, D, H, scale).items()})
    p.update(_ffn_params(k3, k4, D, F))
    p.update(ln1g=ones, ln1b=zeros, ln2g=ones, ln2b=zeros,
             ln3g=ones, ln3b=zeros)
    return p


def _stack_layers(layers):
    return {k: jnp.stack([lp[k] for lp in layers], axis=0) for k in layers[0]}


def init_params(key, cfg):
    D, F, H = cfg["d_model"], cfg["d_ff"], cfg["n_heads"]
    scale = 1.0 / math.sqrt(D // H)
    k_enc, k_dec, k_out, k_et, k_dt = jax.random.split(key, 5)

    enc_layers = [_enc_layer(k, D, F, H, scale)
                  for k in jax.random.split(k_enc, cfg["enc_layer_num"])]
    dec_layers = [_dec_layer(k, D, F, H, scale)
                  for k in jax.random.split(k_dec, cfg["dec_layer_num"])]

    V = cfg["trg_vocab_size"]
    Vp = ((V + 127) // 128) * 128
    out_w = jax.random.normal(k_out, (D, V), jnp.float32) * 0.02
    out_w_pad = jnp.pad(out_w, ((0, 0), (0, Vp - V))).astype(jnp.bfloat16)
    out_b_pad = jnp.zeros((1, Vp), jnp.float32)

    return {
        "enc": {
            "tok_emb": jax.random.normal(k_et, (cfg["src_vocab_size"], D),
                                         jnp.float32) * 0.02,
            "pos_emb": sinusoidal_positions(cfg["src_max_len"], D),
            "stack": _stack_layers(enc_layers),
        },
        "dec": {
            "tok_emb": jax.random.normal(k_dt, (cfg["trg_vocab_size"], D),
                                         jnp.float32) * 0.02,
            "pos_emb": sinusoidal_positions(cfg["trg_max_len"], D),
            "stack": _stack_layers(dec_layers),
            "out_w": out_w_pad,
            "out_b": out_b_pad,
        },
    }


# ----------------------------------------------------------------------------
# Main
# ----------------------------------------------------------------------------
if __name__ == "__main__":
    cfg = dict(
        src_vocab_size=40, trg_vocab_size=48,
        src_max_len=16, trg_max_len=16,
        n_heads=4, d_model=32, d_ff=64,
        enc_layer_num=2, dec_layer_num=2,
        PAD=0, BOS=1, EOS=2, UNK=3,
    )

    key = jax.random.PRNGKey(0)
    k_p, k_src, k_trg = jax.random.split(key, 3)
    params = init_params(k_p, cfg)

    B, Ssrc, Strg = 2, 8, 8
    source = jax.random.randint(k_src, (B, Ssrc), 4, cfg["src_vocab_size"],
                                dtype=jnp.int32)
    target = jax.random.randint(k_trg, (B, Strg), 4, cfg["trg_vocab_size"],
                                dtype=jnp.int32)
    # introduce some PAD tokens so the masks are exercised
    source = source.at[0, -2:].set(cfg["PAD"])
    target = target.at[1, -3:].set(cfg["PAD"])

    forward = jax.jit(functools.partial(transformer_forward, cfg=cfg))
    logits = jax.block_until_ready(forward(params, source, target))

    assert logits.shape == (B, Strg, cfg["trg_vocab_size"])
    assert bool(jnp.all(jnp.isfinite(logits)))
    print("KERNEL_OK")
</pallas_src>

<mosaic_0001>
module attributes {stable_mosaic.version = 11 : i64} {
  func.func @_encoder_stack_kernel(%arg0: i32, %arg1: i32, %arg2: memref<1x8x32xf32, #tpu.memory_space<vmem>>, %arg3: memref<1x1x8xf32, #tpu.memory_space<vmem>>, %arg4: memref<1x4x32x8xbf16, #tpu.memory_space<vmem>>, %arg5: memref<1x4x1x8xf32, #tpu.memory_space<vmem>>, %arg6: memref<1x4x32x8xbf16, #tpu.memory_space<vmem>>, %arg7: memref<1x4x1x8xf32, #tpu.memory_space<vmem>>, %arg8: memref<1x4x32x8xbf16, #tpu.memory_space<vmem>>, %arg9: memref<1x4x1x8xf32, #tpu.memory_space<vmem>>, %arg10: memref<1x4x8x32xbf16, #tpu.memory_space<vmem>>, %arg11: memref<1x1x32xf32, #tpu.memory_space<vmem>>, %arg12: memref<1x1x32xf32, #tpu.memory_space<vmem>>, %arg13: memref<1x1x32xf32, #tpu.memory_space<vmem>>, %arg14: memref<1x32x64xbf16, #tpu.memory_space<vmem>>, %arg15: memref<1x1x64xf32, #tpu.memory_space<vmem>>, %arg16: memref<1x64x32xbf16, #tpu.memory_space<vmem>>, %arg17: memref<1x1x32xf32, #tpu.memory_space<vmem>>, %arg18: memref<1x1x32xf32, #tpu.memory_space<vmem>>, %arg19: memref<1x1x32xf32, #tpu.memory_space<vmem>>, %arg20: memref<1x8x32xf32, #tpu.memory_space<vmem>>, %arg21: memref<8x32xf32, #tpu.memory_space<vmem>>) attributes {dimension_semantics = [#tpu.dimension_semantics<parallel>, #tpu.dimension_semantics<arbitrary>], iteration_bounds = array<i64: 2, 2>, scalar_prefetch = 0 : i64, scratch_operands = 1 : i64, tpu.core_type = #tpu.core_type<tc>, window_params = [{transform_indices = @transform_0, window_bounds = array<i64: 1, 8, 32>}, {transform_indices = @transform_1, window_bounds = array<i64: 1, 1, 8>}, {transform_indices = @transform_2, window_bounds = array<i64: 1, 4, 32, 8>}, {transform_indices = @transform_3, window_bounds = array<i64: 1, 4, 1, 8>}, {transform_indices = @transform_4, window_bounds = array<i64: 1, 4, 32, 8>}, {transform_indices = @transform_5, window_bounds = array<i64: 1, 4, 1, 8>}, {transform_indices = @transform_6, window_bounds = array<i64: 1, 4, 32, 8>}, {transform_indices = @transform_7, window_bounds = array<i64: 1, 4, 1, 8>}, {transform_indices = @transform_8, window_bounds = array<i64: 1, 4, 8, 32>}, {transform_indices = @transform_9, window_bounds = array<i64: 1, 1, 32>}, {transform_indices = @transform_10, window_bounds = array<i64: 1, 1, 32>}, {transform_indices = @transform_11, window_bounds = array<i64: 1, 1, 32>}, {transform_indices = @transform_12, window_bounds = array<i64: 1, 32, 64>}, {transform_indices = @transform_13, window_bounds = array<i64: 1, 1, 64>}, {transform_indices = @transform_14, window_bounds = array<i64: 1, 64, 32>}, {transform_indices = @transform_15, window_bounds = array<i64: 1, 1, 32>}, {transform_indices = @transform_16, window_bounds = array<i64: 1, 1, 32>}, {transform_indices = @transform_17, window_bounds = array<i64: 1, 1, 32>}, {transform_indices = @transform_18, window_bounds = array<i64: 1, 8, 32>}]} {
    %c0_i32 = arith.constant 0 : i32
    %0 = arith.cmpi eq, %arg1, %c0_i32 : i32
    %1 = arith.extui %0 : i1 to i32
    %c0_i32_0 = arith.constant 0 : i32
    %2 = arith.cmpi ne, %1, %c0_i32_0 : i32
    scf.if %2 {
      %c0_89 = arith.constant 0 : index
      %c0_90 = arith.constant 0 : index
      %c0_91 = arith.constant 0 : index
      %144 = vector.load %arg2[%c0_89, %c0_90, %c0_91] : memref<1x8x32xf32, #tpu.memory_space<vmem>>, vector<1x8x32xf32>
      %145 = vector.shape_cast %144 : vector<1x8x32xf32> to vector<8x32xf32>
      %c0_92 = arith.constant 0 : index
      %c0_93 = arith.constant 0 : index
      %146 = vector.load %arg21[%c0_92, %c0_93] : memref<8x32xf32, #tpu.memory_space<vmem>>, vector<8x32xf32>
      tpu.vector_store %arg21[%c0_92, %c0_93], %145 {strides = array<i32>} : memref<8x32xf32, #tpu.memory_space<vmem>>, vector<8x32xf32>,
    } else {
    }
    %c0 = arith.constant 0 : index
    %c0_1 = arith.constant 0 : index
    %3 = vector.load %arg21[%c0, %c0_1] : memref<8x32xf32, #tpu.memory_space<vmem>>, vector<8x32xf32>
    %c0_2 = arith.constant 0 : index
    %c0_3 = arith.constant 0 : index
    %c0_4 = arith.constant 0 : index
    %4 = vector.load %arg3[%c0_2, %c0_3, %c0_4] : memref<1x1x8xf32, #tpu.memory_space<vmem>>, vector<1x1x8xf32>
    %5 = vector.shape_cast %4 : vector<1x1x8xf32> to vector<1x8xf32>
    %cst = arith.constant 5.000000e-01 : f32
    %6 = vector.broadcast %cst : f32 to vector<1x8xf32>
    %7 = arith.cmpf ogt, %5, %6 : vector<1x8xf32>
    %cst_5 = arith.constant -1.000000e+09 : f32
    %cst_6 = arith.constant 0.000000e+00 : f32
    %8 = vector.broadcast %cst_5 : f32 to vector<1x8xf32>
    %9 = vector.broadcast %cst_6 : f32 to vector<1x8xf32>
    %10 = arith.select %7, %8, %9 : vector<1x8xi1>, vector<1x8xf32>
    %c0_7 = arith.constant 0 : index
    %c0_8 = arith.constant 0 : index
    %c0_9 = arith.constant 0 : index
    %c0_10 = arith.constant 0 : index
    %11 = vector.load %arg4[%c0_7, %c0_8, %c0_9, %c0_10] : memref<1x4x32x8xbf16, #tpu.memory_space<vmem>>, vector<1x4x32x8xbf16>
    %12 = vector.shape_cast %11 : vector<1x4x32x8xbf16> to vector<4x32x8xbf16>
    %c0_11 = arith.constant 0 : index
    %c0_12 = arith.constant 0 : index
    %c0_13 = arith.constant 0 : index
    %c0_14 = arith.constant 0 : index
    %13 = vector.load %arg5[%c0_11, %c0_12, %c0_13, %c0_14] : memref<1x4x1x8xf32, #tpu.memory_space<vmem>>, vector<1x4x1x8xf32>
    %14 = vector.shape_cast %13 : vector<1x4x1x8xf32> to vector<4x1x8xf32>
    %c0_15 = arith.constant 0 : index
    %c0_16 = arith.constant 0 : index
    %c0_17 = arith.constant 0 : index
    %c0_18 = arith.constant 0 : index
    %15 = vector.load %arg6[%c0_15, %c0_16, %c0_17, %c0_18] : memref<1x4x32x8xbf16, #tpu.memory_space<vmem>>, vector<1x4x32x8xbf16>
    %16 = vector.shape_cast %15 : vector<1x4x32x8xbf16> to vector<4x32x8xbf16>
    %c0_19 = arith.constant 0 : index
    %c0_20 = arith.constant 0 : index
    %c0_21 = arith.constant 0 : index
    %c0_22 = arith.constant 0 : index
    %17 = vector.load %arg7[%c0_19, %c0_20, %c0_21, %c0_22] : memref<1x4x1x8xf32, #tpu.memory_space<vmem>>, vector<1x4x1x8xf32>
    %18 = vector.shape_cast %17 : vector<1x4x1x8xf32> to vector<4x1x8xf32>
    %c0_23 = arith.constant 0 : index
    %c0_24 = arith.constant 0 : index
    %c0_25 = arith.constant 0 : index
    %c0_26 = arith.constant 0 : index
    %19 = vector.load %arg8[%c0_23, %c0_24, %c0_25, %c0_26] : memref<1x4x32x8xbf16, #tpu.memory_space<vmem>>, vector<1x4x32x8xbf16>
    %20 = vector.shape_cast %19 : vector<1x4x32x8xbf16> to vector<4x32x8xbf16>
    %c0_27 = arith.constant 0 : index
    %c0_28 = arith.constant 0 : index
    %c0_29 = arith.constant 0 : index
    %c0_30 = arith.constant 0 : index
    %21 = vector.load %arg9[%c0_27, %c0_28, %c0_29, %c0_30] : memref<1x4x1x8xf32, #tpu.memory_space<vmem>>, vector<1x4x1x8xf32>
    %22 = vector.shape_cast %21 : vector<1x4x1x8xf32> to vector<4x1x8xf32>
    %c0_31 = arith.constant 0 : index
    %c0_32 = arith.constant 0 : index
    %c0_33 = arith.constant 0 : index
    %c0_34 = arith.constant 0 : index
    %23 = vector.load %arg10[%c0_31, %c0_32, %c0_33, %c0_34] : memref<1x4x8x32xbf16, #tpu.memory_space<vmem>>, vector<1x4x8x32xbf16>
    %24 = vector.shape_cast %23 : vector<1x4x8x32xbf16> to vector<4x8x32xbf16>
    %c0_35 = arith.constant 0 : index
    %c0_36 = arith.constant 0 : index
    %c0_37 = arith.constant 0 : index
    %25 = vector.load %arg11[%c0_35, %c0_36, %c0_37] : memref<1x1x32xf32, #tpu.memory_space<vmem>>, vector<1x1x32xf32>
    %26 = vector.shape_cast %25 : vector<1x1x32xf32> to vector<1x32xf32>
    %27 = arith.truncf %3 : vector<8x32xf32> to vector<8x32xbf16>
    %28 = vector.shape_cast %27 : vector<8x32xbf16> to vector<1x8x32xbf16>
    %29 = vector.shape_cast %28 : vector<1x8x32xbf16> to vector<1x8x32xbf16>
    %30 = vector.broadcast %29 : vector<1x8x32xbf16> to vector<4x8x32xbf16>
    %31 = arith.truncf %3 : vector<8x32xf32> to vector<8x32xbf16>
    %32 = vector.shape_cast %31 : vector<8x32xbf16> to vector<1x8x32xbf16>
    %33 = vector.shape_cast %32 : vector<1x8x32xbf16> to vector<1x8x32xbf16>
    %34 = vector.broadcast %33 : vector<1x8x32xbf16> to vector<4x8x32xbf16>
    "tpu.trace_start"() <{level = 10 : i32, message = "hsd,hde->hse"}> : () -> ()
    %cst_38 = arith.constant dense<0.000000e+00> : vector<4x8x8xf32>
    %35 = tpu.matmul %30, %12, %cst_38 {dimension_numbers = #tpu.dot_dimension_numbers<[2], [1], [1], [2], [0, 0, 0, 1, 1, 2], [0], [0]>} : vector<4x8x32xbf16>, vector<4x32x8xbf16>, vector<4x8x8xf32> -> vector<4x8x8xf32>
    "tpu.trace_stop"() : () -> ()
    %36 = vector.broadcast %14 : vector<4x1x8xf32> to vector<4x8x8xf32>
    %37 = arith.addf %35, %36 : vector<4x8x8xf32>
    "tpu.trace_start"() <{level = 10 : i32, message = "hsd,hde->hse"}> : () -> ()
    %cst_39 = arith.constant dense<0.000000e+00> : vector<4x8x8xf32>
    %38 = tpu.matmul %34, %16, %cst_39 {dimension_numbers = #tpu.dot_dimension_numbers<[2], [1], [1], [2], [0, 0, 0, 1, 1, 2], [0], [0]>} : vector<4x8x32xbf16>, vector<4x32x8xbf16>, vector<4x8x8xf32> -> vector<4x8x8xf32>
    "tpu.trace_stop"() : () -> ()
    %39 = vector.broadcast %18 : vector<4x1x8xf32> to vector<4x8x8xf32>
    %40 = arith.addf %38, %39 : vector<4x8x8xf32>
    "tpu.trace_start"() <{level = 10 : i32, message = "hsd,hde->hse"}> : () -> ()
    %cst_40 = arith.constant dense<0.000000e+00> : vector<4x8x8xf32>
    %41 = tpu.matmul %34, %20, %cst_40 {dimension_numbers = #tpu.dot_dimension_numbers<[2], [1], [1], [2], [0, 0, 0, 1, 1, 2], [0], [0]>} : vector<4x8x32xbf16>, vector<4x32x8xbf16>, vector<4x8x8xf32> -> vector<4x8x8xf32>
    "tpu.trace_stop"() : () -> ()
    %42 = vector.broadcast %22 : vector<4x1x8xf32> to vector<4x8x8xf32>
    %43 = arith.addf %41, %42 : vector<4x8x8xf32>
    %44 = arith.truncf %37 : vector<4x8x8xf32> to vector<4x8x8xbf16>
    %45 = arith.truncf %40 : vector<4x8x8xf32> to vector<4x8x8xbf16>
    "tpu.trace_start"() <{level = 10 : i32, message = "hqd,hkd->hqk"}> : () -> ()
    %cst_41 = arith.constant dense<0.000000e+00> : vector<4x8x8xf32>
    %46 = tpu.matmul %44, %45, %cst_41 {dimension_numbers = #tpu.dot_dimension_numbers<[2], [2], [1], [1], [0, 0, 0, 1, 1, 1], [0], [0]>} : vector<4x8x8xbf16>, vector<4x8x8xbf16>, vector<4x8x8xf32> -> vector<4x8x8xf32>
    "tpu.trace_stop"() : () -> ()
    %47 = vector.shape_cast %10 : vector<1x8xf32> to vector<1x1x8xf32>
    %48 = vector.broadcast %47 : vector<1x1x8xf32> to vector<4x8x8xf32>
    %49 = arith.addf %46, %48 : vector<4x8x8xf32>
    %cst_42 = arith.constant dense<0xFF800000> : vector<4x8xf32>
    %50 = vector.multi_reduction <maximumf>, %49, %cst_42 [2] : vector<4x8x8xf32> to vector<4x8xf32>
    %51 = vector.shape_cast %50 : vector<4x8xf32> to vector<4x8x1xf32>
    %52 = vector.broadcast %51 : vector<4x8x1xf32> to vector<4x8x8xf32>
    %53 = arith.subf %49, %52 : vector<4x8x8xf32>
    %54 = math.exp %53 : vector<4x8x8xf32>
    %cst_43 = arith.constant dense<0.000000e+00> : vector<4x8xf32>
    %55 = vector.multi_reduction <add>, %54, %cst_43 [2] : vector<4x8x8xf32> to vector<4x8xf32>
    %56 = vector.shape_cast %55 : vector<4x8xf32> to vector<4x8x1xf32>
    %57 = tpu.reciprocal %56 {approx = true} : vector<4x8x1xf32> -> vector<4x8x1xf32>
    %58 = vector.broadcast %57 : vector<4x8x1xf32> to vector<4x8x8xf32>
    %59 = arith.mulf %54, %58 : vector<4x8x8xf32>
    %60 = arith.truncf %59 : vector<4x8x8xf32> to vector<4x8x8xbf16>
    %61 = arith.truncf %43 : vector<4x8x8xf32> to vector<4x8x8xbf16>
    "tpu.trace_start"() <{level = 10 : i32, message = "hqk,hkd->hqd"}> : () -> ()
    %cst_44 = arith.constant dense<0.000000e+00> : vector<4x8x8xf32>
    %62 = tpu.matmul %60, %61, %cst_44 {dimension_numbers = #tpu.dot_dimension_numbers<[2], [1], [1], [2], [0, 0, 0, 1, 1, 2], [0], [0]>} : vector<4x8x8xbf16>, vector<4x8x8xbf16>, vector<4x8x8xf32> -> vector<4x8x8xf32>
    "tpu.trace_stop"() : () -> ()
    %63 = arith.truncf %62 : vector<4x8x8xf32> to vector<4x8x8xbf16>
    "tpu.trace_start"() <{level = 10 : i32, message = "hqd,hde->hqe"}> : () -> ()
    %cst_45 = arith.constant dense<0.000000e+00> : vector<4x8x32xf32>
    %64 = tpu.matmul %63, %24, %cst_45 {dimension_numbers = #tpu.dot_dimension_numbers<[2], [1], [1], [2], [0, 0, 0, 1, 1, 2], [0], [0]>} : vector<4x8x8xbf16>, vector<4x8x32xbf16>, vector<4x8x32xf32> -> vector<4x8x32xf32>
    "tpu.trace_stop"() : () -> ()
    %cst_46 = arith.constant dense<0.000000e+00> : vector<8x32xf32>
    %65 = vector.multi_reduction <add>, %64, %cst_46 [0] : vector<4x8x32xf32> to vector<8x32xf32>
    %66 = vector.broadcast %26 : vector<1x32xf32> to vector<8x32xf32>
    %67 = arith.addf %65, %66 : vector<8x32xf32>
    %c0_47 = arith.constant 0 : index
    %c0_48 = arith.constant 0 : index
    %c0_49 = arith.constant 0 : index
    %68 = vector.load %arg12[%c0_47, %c0_48, %c0_49] : memref<1x1x32xf32, #tpu.memory_space<vmem>>, vector<1x1x32xf32>
    %69 = vector.shape_cast %68 : vector<1x1x32xf32> to vector<1x32xf32>
    %c0_50 = arith.constant 0 : index
    %c0_51 = arith.constant 0 : index
    %c0_52 = arith.constant 0 : index
    %70 = vector.load %arg13[%c0_50, %c0_51, %c0_52] : memref<1x1x32xf32, #tpu.memory_space<vmem>>, vector<1x1x32xf32>
    %71 = vector.shape_cast %70 : vector<1x1x32xf32> to vector<1x32xf32>
    %72 = arith.addf %67, %3 : vector<8x32xf32>
    %cst_53 = arith.constant dense<0.000000e+00> : vector<8xf32>
    %73 = vector.multi_reduction <add>, %72, %cst_53 [1] : vector<8x32xf32> to vector<8xf32>
    %74 = vector.shape_cast %73 : vector<8xf32> to vector<8x1xf32>
    %cst_54 = arith.constant 3.200000e+01 : f32
    %75 = vector.broadcast %cst_54 : f32 to vector<8x1xf32>
    %76 = arith.divf %74, %75 : vector<8x1xf32>
    %77 = vector.broadcast %76 : vector<8x1xf32> to vector<8x32xf32>
    %78 = arith.subf %72, %77 : vector<8x32xf32>
    %79 = arith.mulf %78, %78 : vector<8x32xf32>
    %cst_55 = arith.constant dense<0.000000e+00> : vector<8xf32>
    %80 = vector.multi_reduction <add>, %79, %cst_55 [1] : vector<8x32xf32> to vector<8xf32>
    %81 = vector.shape_cast %80 : vector<8xf32> to vector<8x1xf32>
    %cst_56 = arith.constant 3.200000e+01 : f32
    %82 = vector.broadcast %cst_56 : f32 to vector<8x1xf32>
    %83 = arith.divf %81, %82 : vector<8x1xf32>
    %84 = vector.broadcast %76 : vector<8x1xf32> to vector<8x32xf32>
    %85 = arith.subf %72, %84 : vector<8x32xf32>
    %cst_57 = arith.constant 9.99999974E-6 : f32
    %86 = vector.broadcast %cst_57 : f32 to vector<8x1xf32>
    %87 = arith.addf %83, %86 : vector<8x1xf32>
    %88 = math.rsqrt %87 : vector<8x1xf32>
    %89 = vector.broadcast %88 : vector<8x1xf32> to vector<8x32xf32>
    %90 = arith.mulf %85, %89 : vector<8x32xf32>
    %91 = vector.broadcast %69 : vector<1x32xf32> to vector<8x32xf32>
    %92 = arith.mulf %90, %91 : vector<8x32xf32>
    %93 = vector.broadcast %71 : vector<1x32xf32> to vector<8x32xf32>
    %94 = arith.addf %92, %93 : vector<8x32xf32>
    %c0_58 = arith.constant 0 : index
    %c0_59 = arith.constant 0 : index
    %c0_60 = arith.constant 0 : index
    %95 = vector.load %arg14[%c0_58, %c0_59, %c0_60] : memref<1x32x64xbf16, #tpu.memory_space<vmem>>, vector<1x32x64xbf16>
    %96 = vector.shape_cast %95 : vector<1x32x64xbf16> to vector<32x64xbf16>
    %c0_61 = arith.constant 0 : index
    %c0_62 = arith.constant 0 : index
    %c0_63 = arith.constant 0 : index
    %97 = vector.load %arg15[%c0_61, %c0_62, %c0_63] : memref<1x1x64xf32, #tpu.memory_space<vmem>>, vector<1x1x64xf32>
    %98 = vector.shape_cast %97 : vector<1x1x64xf32> to vector<1x64xf32>
    %99 = arith.truncf %94 : vector<8x32xf32> to vector<8x32xbf16>
    %cst_64 = arith.constant dense<0.000000e+00> : vector<8x64xf32>
    %100 = tpu.matmul %99, %96, %cst_64 {dimension_numbers = #tpu.dot_dimension_numbers<[1], [0], [0], [1], [0, 0, 1, 1], [], []>} : vector<8x32xbf16>, vector<32x64xbf16>, vector<8x64xf32> -> vector<8x64xf32>
    %101 = vector.broadcast %98 : vector<1x64xf32> to vector<8x64xf32>
    %102 = arith.addf %100, %101 : vector<8x64xf32>
    %cst_65 = arith.constant 0.000000e+00 : f32
    %103 = vector.broadcast %cst_65 : f32 to vector<8x64xf32>
    %104 = arith.maximumf %102, %103 : vector<8x64xf32>
    %c0_66 = arith.constant 0 : index
    %c0_67 = arith.constant 0 : index
    %c0_68 = arith.constant 0 : index
    %105 = vector.load %arg16[%c0_66, %c0_67, %c0_68] : memref<1x64x32xbf16, #tpu.memory_space<vmem>>, vector<1x64x32xbf16>
    %106 = vector.shape_cast %105 : vector<1x64x32xbf16> to vector<64x32xbf16>
    %c0_69 = arith.constant 0 : index
    %c0_70 = arith.constant 0 : index
    %c0_71 = arith.constant 0 : index
    %107 = vector.load %arg17[%c0_69, %c0_70, %c0_71] : memref<1x1x32xf32, #tpu.memory_space<vmem>>, vector<1x1x32xf32>
    %108 = vector.shape_cast %107 : vector<1x1x32xf32> to vector<1x32xf32>
    %109 = arith.truncf %104 : vector<8x64xf32> to vector<8x64xbf16>
    %cst_72 = arith.constant dense<0.000000e+00> : vector<8x32xf32>
    %110 = tpu.matmul %109, %106, %cst_72 {dimension_numbers = #tpu.dot_dimension_numbers<[1], [0], [0], [1], [0, 0, 1, 1], [], []>} : vector<8x64xbf16>, vector<64x32xbf16>, vector<8x32xf32> -> vector<8x32xf32>
    %111 = vector.broadcast %108 : vector<1x32xf32> to vector<8x32xf32>
    %112 = arith.addf %110, %111 : vector<8x32xf32>
    %c0_73 = arith.constant 0 : index
    %c0_74 = arith.constant 0 : index
    %c0_75 = arith.constant 0 : index
    %113 = vector.load %arg18[%c0_73, %c0_74, %c0_75] : memref<1x1x32xf32, #tpu.memory_space<vmem>>, vector<1x1x32xf32>
    %114 = vector.shape_cast %113 : vector<1x1x32xf32> to vector<1x32xf32>
    %c0_76 = arith.constant 0 : index
    %c0_77 = arith.constant 0 : index
    %c0_78 = arith.constant 0 : index
    %115 = vector.load %arg19[%c0_76, %c0_77, %c0_78] : memref<1x1x32xf32, #tpu.memory_space<vmem>>, vector<1x1x32xf32>
    %116 = vector.shape_cast %115 : vector<1x1x32xf32> to vector<1x32xf32>
    %117 = arith.addf %112, %94 : vector<8x32xf32>
    %cst_79 = arith.constant dense<0.000000e+00> : vector<8xf32>
    %118 = vector.multi_reduction <add>, %117, %cst_79 [1] : vector<8x32xf32> to vector<8xf32>
    %119 = vector.shape_cast %118 : vector<8xf32> to vector<8x1xf32>
    %cst_80 = arith.constant 3.200000e+01 : f32
    %120 = vector.broadcast %cst_80 : f32 to vector<8x1xf32>
    %121 = arith.divf %119, %120 : vector<8x1xf32>
    %122 = vector.broadcast %121 : vector<8x1xf32> to vector<8x32xf32>
    %123 = arith.subf %117, %122 : vector<8x32xf32>
    %124 = arith.mulf %123, %123 : vector<8x32xf32>
    %cst_81 = arith.constant dense<0.000000e+00> : vector<8xf32>
    %125 = vector.multi_reduction <add>, %124, %cst_81 [1] : vector<8x32xf32> to vector<8xf32>
    %126 = vector.shape_cast %125 : vector<8xf32> to vector<8x1xf32>
    %cst_82 = arith.constant 3.200000e+01 : f32
    %127 = vector.broadcast %cst_82 : f32 to vector<8x1xf32>
    %128 = arith.divf %126, %127 : vector<8x1xf32>
    %129 = vector.broadcast %121 : vector<8x1xf32> to vector<8x32xf32>
    %130 = arith.subf %117, %129 : vector<8x32xf32>
    %cst_83 = arith.constant 9.99999974E-6 : f32
    %131 = vector.broadcast %cst_83 : f32 to vector<8x1xf32>
    %132 = arith.addf %128, %131 : vector<8x1xf32>
    %133 = math.rsqrt %132 : vector<8x1xf32>
    %134 = vector.broadcast %133 : vector<8x1xf32> to vector<8x32xf32>
    %135 = arith.mulf %130, %134 : vector<8x32xf32>
    %136 = vector.broadcast %114 : vector<1x32xf32> to vector<8x32xf32>
    %137 = arith.mulf %135, %136 : vector<8x32xf32>
    %138 = vector.broadcast %116 : vector<1x32xf32> to vector<8x32xf32>
    %139 = arith.addf %137, %138 : vector<8x32xf32>
    %c0_84 = arith.constant 0 : index
    %c0_85 = arith.constant 0 : index
    %140 = vector.load %arg21[%c0_84, %c0_85] : memref<8x32xf32, #tpu.memory_space<vmem>>, vector<8x32xf32>
    tpu.vector_store %arg21[%c0_84, %c0_85], %139 {strides = array<i32>} : memref<8x32xf32, #tpu.memory_space<vmem>>, vector<8x32xf32>,
    %c0_86 = arith.constant 0 : index
    %c0_87 = arith.constant 0 : index
    %c0_88 = arith.constant 0 : index
    %141 = vector.load %arg20[%c0_86, %c0_87, %c0_88] : memref<1x8x32xf32, #tpu.memory_space<vmem>>, vector<1x8x32xf32>
    %142 = vector.shape_cast %141 : vector<1x8x32xf32> to vector<8x32xf32>
    %143 = vector.shape_cast %139 : vector<8x32xf32> to vector<1x8x32xf32>
    tpu.vector_store %arg20[%c0_86, %c0_87, %c0_88], %143 {strides = array<i32>} : memref<1x8x32xf32, #tpu.memory_space<vmem>>, vector<1x8x32xf32>,
    return
  }
  func.func @transform_0(%arg0: i32, %arg1: i32) -> (i32, i32, i32) {
    %c0_i32 = arith.constant 0 : i32
    %c0_i32_0 = arith.constant 0 : i32
    %c0_i32_1 = arith.constant 0 : i32
    return %arg0, %c0_i32, %c0_i32_0 : i32, i32, i32
  }
  func.func @transform_1(%arg0: i32, %arg1: i32) -> (i32, i32, i32) {
    %c0_i32 = arith.constant 0 : i32
    %c0_i32_0 = arith.constant 0 : i32
    %c0_i32_1 = arith.constant 0 : i32
    return %arg0, %c0_i32, %c0_i32_0 : i32, i32, i32
  }
  func.func @transform_2(%arg0: i32, %arg1: i32) -> (i32, i32, i32, i32) {
    %c0_i32 = arith.constant 0 : i32
    %c0_i32_0 = arith.constant 0 : i32
    %c0_i32_1 = arith.constant 0 : i32
    %c0_i32_2 = arith.constant 0 : i32
    return %arg1, %c0_i32, %c0_i32_0, %c0_i32_1 : i32, i32, i32, i32
  }
  func.func @transform_3(%arg0: i32, %arg1: i32) -> (i32, i32, i32, i32) {
    %c0_i32 = arith.constant 0 : i32
    %c0_i32_0 = arith.constant 0 : i32
    %c0_i32_1 = arith.constant 0 : i32
    %c0_i32_2 = arith.constant 0 : i32
    return %arg1, %c0_i32, %c0_i32_0, %c0_i32_1 : i32, i32, i32, i32
  }
  func.func @transform_4(%arg0: i32, %arg1: i32) -> (i32, i32, i32, i32) {
    %c0_i32 = arith.constant 0 : i32
    %c0_i32_0 = arith.constant 0 : i32
    %c0_i32_1 = arith.constant 0 : i32
    %c0_i32_2 = arith.constant 0 : i32
    return %arg1, %c0_i32, %c0_i32_0, %c0_i32_1 : i32, i32, i32, i32
  }
  func.func @transform_5(%arg0: i32, %arg1: i32) -> (i32, i32, i32, i32) {
    %c0_i32 = arith.constant 0 : i32
    %c0_i32_0 = arith.constant 0 : i32
    %c0_i32_1 = arith.constant 0 : i32
    %c0_i32_2 = arith.constant 0 : i32
    return %arg1, %c0_i32, %c0_i32_0, %c0_i32_1 : i32, i32, i32, i32
  }
  func.func @transform_6(%arg0: i32, %arg1: i32) -> (i32, i32, i32, i32) {
    %c0_i32 = arith.constant 0 : i32
    %c0_i32_0 = arith.constant 0 : i32
    %c0_i32_1 = arith.constant 0 : i32
    %c0_i32_2 = arith.constant 0 : i32
    return %arg1, %c0_i32, %c0_i32_0, %c0_i32_1 : i32, i32, i32, i32
  }
  func.func @transform_7(%arg0: i32, %arg1: i32) -> (i32, i32, i32, i32) {
    %c0_i32 = arith.constant 0 : i32
    %c0_i32_0 = arith.constant 0 : i32
    %c0_i32_1 = arith.constant 0 : i32
    %c0_i32_2 = arith.constant 0 : i32
    return %arg1, %c0_i32, %c0_i32_0, %c0_i32_1 : i32, i32, i32, i32
  }
  func.func @transform_8(%arg0: i32, %arg1: i32) -> (i32, i32, i32, i32) {
    %c0_i32 = arith.constant 0 : i32
    %c0_i32_0 = arith.constant 0 : i32
    %c0_i32_1 = arith.constant 0 : i32
    %c0_i32_2 = arith.constant 0 : i32
    return %arg1, %c0_i32, %c0_i32_0, %c0_i32_1 : i32, i32, i32, i32
  }
  func.func @transform_9(%arg0: i32, %arg1: i32) -> (i32, i32, i32) {
    %c0_i32 = arith.constant 0 : i32
    %c0_i32_0 = arith.constant 0 : i32
    %c0_i32_1 = arith.constant 0 : i32
    return %arg1, %c0_i32, %c0_i32_0 : i32, i32, i32
  }
  func.func @transform_10(%arg0: i32, %arg1: i32) -> (i32, i32, i32) {
    %c0_i32 = arith.constant 0 : i32
    %c0_i32_0 = arith.constant 0 : i32
    %c0_i32_1 = arith.constant 0 : i32
    return %arg1, %c0_i32, %c0_i32_0 : i32, i32, i32
  }
  func.func @transform_11(%arg0: i32, %arg1: i32) -> (i32, i32, i32) {
    %c0_i32 = arith.constant 0 : i32
    %c0_i32_0 = arith.constant 0 : i32
    %c0_i32_1 = arith.constant 0 : i32
    return %arg1, %c0_i32, %c0_i32_0 : i32, i32, i32
  }
  func.func @transform_12(%arg0: i32, %arg1: i32) -> (i32, i32, i32) {
    %c0_i32 = arith.constant 0 : i32
    %c0_i32_0 = arith.constant 0 : i32
    %c0_i32_1 = arith.constant 0 : i32
    return %arg1, %c0_i32, %c0_i32_0 : i32, i32, i32
  }
  func.func @transform_13(%arg0: i32, %arg1: i32) -> (i32, i32, i32) {
    %c0_i32 = arith.constant 0 : i32
    %c0_i32_0 = arith.constant 0 : i32
    %c0_i32_1 = arith.constant 0 : i32
    return %arg1, %c0_i32, %c0_i32_0 : i32, i32, i32
  }
  func.func @transform_14(%arg0: i32, %arg1: i32) -> (i32, i32, i32) {
    %c0_i32 = arith.constant 0 : i32
    %c0_i32_0 = arith.constant 0 : i32
    %c0_i32_1 = arith.constant 0 : i32
    return %arg1, %c0_i32, %c0_i32_0 : i32, i32, i32
  }
  func.func @transform_15(%arg0: i32, %arg1: i32) -> (i32, i32, i32) {
    %c0_i32 = arith.constant 0 : i32
    %c0_i32_0 = arith.constant 0 : i32
    %c0_i32_1 = arith.constant 0 : i32
    return %arg1, %c0_i32, %c0_i32_0 : i32, i32, i32
  }
  func.func @transform_16(%arg0: i32, %arg1: i32) -> (i32, i32, i32) {
    %c0_i32 = arith.constant 0 : i32
    %c0_i32_0 = arith.constant 0 : i32
    %c0_i32_1 = arith.constant 0 : i32
    return %arg1, %c0_i32, %c0_i32_0 : i32, i32, i32
  }
  func.func @transform_17(%arg0: i32, %arg1: i32) -> (i32, i32, i32) {
    %c0_i32 = arith.constant 0 : i32
    %c0_i32_0 = arith.constant 0 : i32
    %c0_i32_1 = arith.constant 0 : i32
    return %arg1, %c0_i32, %c0_i32_0 : i32, i32, i32
  }
  func.func @transform_18(%arg0: i32, %arg1: i32) -> (i32, i32, i32) {
    %c0_i32 = arith.constant 0 : i32
    %c0_i32_0 = arith.constant 0 : i32
    %c0_i32_1 = arith.constant 0 : i32
    return %arg0, %c0_i32, %c0_i32_0 : i32, i32, i32
  }
}

module attributes {stable_mosaic.version = 11 : i64} {
  func.func @_out_proj_kernel(%arg0: i32, %arg1: memref<16x32xf32, #tpu.memory_space<vmem>>, %arg2: memref<32x128xbf16, #tpu.memory_space<vmem>>, %arg3: memref<1x128xf32, #tpu.memory_space<vmem>>, %arg4: memref<16x128xf32, #tpu.memory_space<vmem>>) attributes {dimension_semantics = [#tpu.dimension_semantics<arbitrary>], iteration_bounds = array<i64: 1>, scalar_prefetch = 0 : i64, scratch_operands = 0 : i64, tpu.core_type = #tpu.core_type<tc>, window_params = [{pipeline_mode = #tpu.pipeline_mode<synchronous>, transform_indices = @transform_0, window_bounds = array<i64: 16, 32>}, {pipeline_mode = #tpu.pipeline_mode<synchronous>, transform_indices = @transform_1, window_bounds = array<i64: 32, 128>}, {pipeline_mode = #tpu.pipeline_mode<synchronous>, transform_indices = @transform_2, window_bounds = array<i64: 1, 128>}, {pipeline_mode = #tpu.pipeline_mode<synchronous>, transform_indices = @transform_3, window_bounds = array<i64: 16, 128>}]} {
    %c0 = arith.constant 0 : index
    %c0_0 = arith.constant 0 : index
    %0 = vector.load %arg1[%c0, %c0_0] : memref<16x32xf32, #tpu.memory_space<vmem>>, vector<16x32xf32>
    %1 = arith.truncf %0 : vector<16x32xf32> to vector<16x32xbf16>
    %c0_1 = arith.constant 0 : index
    %c0_2 = arith.constant 0 : index
    %2 = vector.load %arg2[%c0_1, %c0_2] : memref<32x128xbf16, #tpu.memory_space<vmem>>, vector<32x128xbf16>
    %cst = arith.constant dense<0.000000e+00> : vector<16x128xf32>
    %3 = tpu.matmul %1, %2, %cst {dimension_numbers = #tpu.dot_dimension_numbers<[1], [0], [0], [1], [0, 0, 1, 1], [], []>} : vector<16x32xbf16>, vector<32x128xbf16>, vector<16x128xf32> -> vector<16x128xf32>
    %c0_3 = arith.constant 0 : index
    %c0_4 = arith.constant 0 : index
    %4 = vector.load %arg3[%c0_3, %c0_4] : memref<1x128xf32, #tpu.memory_space<vmem>>, vector<1x128xf32>
    %5 = vector.broadcast %4 : vector<1x128xf32> to vector<16x128xf32>
    %6 = arith.addf %3, %5 : vector<16x128xf32>
    %c0_5 = arith.constant 0 : index
    %c0_6 = arith.constant 0 : index
    %7 = vector.load %arg4[%c0_5, %c0_6] : memref<16x128xf32, #tpu.memory_space<vmem>>, vector<16x128xf32>
    tpu.vector_store %arg4[%c0_5, %c0_6], %6 {strides = array<i32>} : memref<16x128xf32, #tpu.memory_space<vmem>>, vector<16x128xf32>,
    return
  }
  func.func @transform_0(%arg0: i32) -> (i32, i32) {
    %c0_i32 = arith.constant 0 : i32
    %c0_i32_0 = arith.constant 0 : i32
    %c0_i32_1 = arith.constant 0 : i32
    return %c0_i32, %c0_i32_0 : i32, i32
  }
  func.func @transform_1(%arg0: i32) -> (i32, i32) {
    %c0_i32 = arith.constant 0 : i32
    %c0_i32_0 = arith.constant 0 : i32
    %c0_i32_1 = arith.constant 0 : i32
    return %c0_i32, %c0_i32_0 : i32, i32
  }
  func.func @transform_2(%arg0: i32) -> (i32, i32) {
    %c0_i32 = arith.constant 0 : i32
    %c0_i32_0 = arith.constant 0 : i32
    %c0_i32_1 = arith.constant 0 : i32
    return %c0_i32, %c0_i32_0 : i32, i32
  }
  func.func @transform_3(%arg0: i32) -> (i32, i32) {
    %c0_i32 = arith.constant 0 : i32
    %c0_i32_0 = arith.constant 0 : i32
    %c0_i32_1 = arith.constant 0 : i32
    return %c0_i32, %c0_i32_0 : i32, i32
  }
}

module attributes {stable_mosaic.version = 11 : i64} {
  func.func @_decoder_stack_kernel(%arg0: i32, %arg1: i32, %arg2: memref<1x8x32xf32, #tpu.memory_space<vmem>>, %arg3: memref<1x8x32xf32, #tpu.memory_space<vmem>>, %arg4: memref<1x1x8xf32, #tpu.memory_space<vmem>>, %arg5: memref<1x1x8xf32, #tpu.memory_space<vmem>>, %arg6: memref<1x4x32x8xbf16, #tpu.memory_space<vmem>>, %arg7: memref<1x4x1x8xf32, #tpu.memory_space<vmem>>, %arg8: memref<1x4x32x8xbf16, #tpu.memory_space<vmem>>, %arg9: memref<1x4x1x8xf32, #tpu.memory_space<vmem>>, %arg10: memref<1x4x32x8xbf16, #tpu.memory_space<vmem>>, %arg11: memref<1x4x1x8xf32, #tpu.memory_space<vmem>>, %arg12: memref<1x4x8x32xbf16, #tpu.memory_space<vmem>>, %arg13: memref<1x1x32xf32, #tpu.memory_space<vmem>>, %arg14: memref<1x1x32xf32, #tpu.memory_space<vmem>>, %arg15: memref<1x1x32xf32, #tpu.memory_space<vmem>>, %arg16: memref<1x4x32x8xbf16, #tpu.memory_space<vmem>>, %arg17: memref<1x4x1x8xf32, #tpu.memory_space<vmem>>, %arg18: memref<1x4x32x8xbf16, #tpu.memory_space<vmem>>, %arg19: memref<1x4x1x8xf32, #tpu.memory_space<vmem>>, %arg20: memref<1x4x32x8xbf16, #tpu.memory_space<vmem>>, %arg21: memref<1x4x1x8xf32, #tpu.memory_space<vmem>>, %arg22: memref<1x4x8x32xbf16, #tpu.memory_space<vmem>>, %arg23: memref<1x1x32xf32, #tpu.memory_space<vmem>>, %arg24: memref<1x1x32xf32, #tpu.memory_space<vmem>>, %arg25: memref<1x1x32xf32, #tpu.memory_space<vmem>>, %arg26: memref<1x32x64xbf16, #tpu.memory_space<vmem>>, %arg27: memref<1x1x64xf32, #tpu.memory_space<vmem>>, %arg28: memref<1x64x32xbf16, #tpu.memory_space<vmem>>, %arg29: memref<1x1x32xf32, #tpu.memory_space<vmem>>, %arg30: memref<1x1x32xf32, #tpu.memory_space<vmem>>, %arg31: memref<1x1x32xf32, #tpu.memory_space<vmem>>, %arg32: memref<1x8x32xf32, #tpu.memory_space<vmem>>, %arg33: memref<8x32xf32, #tpu.memory_space<vmem>>) attributes {dimension_semantics = [#tpu.dimension_semantics<parallel>, #tpu.dimension_semantics<arbitrary>], iteration_bounds = array<i64: 2, 2>, scalar_prefetch = 0 : i64, scratch_operands = 1 : i64, tpu.core_type = #tpu.core_type<tc>, window_params = [{transform_indices = @transform_0, window_bounds = array<i64: 1, 8, 32>}, {transform_indices = @transform_1, window_bounds = array<i64: 1, 8, 32>}, {transform_indices = @transform_2, window_bounds = array<i64: 1, 1, 8>}, {transform_indices = @transform_3, window_bounds = array<i64: 1, 1, 8>}, {transform_indices = @transform_4, window_bounds = array<i64: 1, 4, 32, 8>}, {transform_indices = @transform_5, window_bounds = array<i64: 1, 4, 1, 8>}, {transform_indices = @transform_6, window_bounds = array<i64: 1, 4, 32, 8>}, {transform_indices = @transform_7, window_bounds = array<i64: 1, 4, 1, 8>}, {transform_indices = @transform_8, window_bounds = array<i64: 1, 4, 32, 8>}, {transform_indices = @transform_9, window_bounds = array<i64: 1, 4, 1, 8>}, {transform_indices = @transform_10, window_bounds = array<i64: 1, 4, 8, 32>}, {transform_indices = @transform_11, window_bounds = array<i64: 1, 1, 32>}, {transform_indices = @transform_12, window_bounds = array<i64: 1, 1, 32>}, {transform_indices = @transform_13, window_bounds = array<i64: 1, 1, 32>}, {transform_indices = @transform_14, window_bounds = array<i64: 1, 4, 32, 8>}, {transform_indices = @transform_15, window_bounds = array<i64: 1, 4, 1, 8>}, {transform_indices = @transform_16, window_bounds = array<i64: 1, 4, 32, 8>}, {transform_indices = @transform_17, window_bounds = array<i64: 1, 4, 1, 8>}, {transform_indices = @transform_18, window_bounds = array<i64: 1, 4, 32, 8>}, {transform_indices = @transform_19, window_bounds = array<i64: 1, 4, 1, 8>}, {transform_indices = @transform_20, window_bounds = array<i64: 1, 4, 8, 32>}, {transform_indices = @transform_21, window_bounds = array<i64: 1, 1, 32>}, {transform_indices = @transform_22, window_bounds = array<i64: 1, 1, 32>}, {transform_indices = @transform_23, window_bounds = array<i64: 1, 1, 32>}, {transform_indices = @transform_24, window_bounds = array<i64: 1, 32, 64>}, {transform_indices = @transform_25, window_bounds = array<i64: 1, 1, 64>}, {transform_indices = @transform_26, window_bounds = array<i64: 1, 64, 32>}, {transform_indices = @transform_27, window_bounds = array<i64: 1, 1, 32>}, {transform_indices = @transform_28, window_bounds = array<i64: 1, 1, 32>}, {transform_indices = @transform_29, window_bounds = array<i64: 1, 1, 32>}, {transform_indices = @transform_30, window_bounds = array<i64: 1, 8, 32>}]} {
    %c0_i32 = arith.constant 0 : i32
    %0 = arith.cmpi eq, %arg1, %c0_i32 : i32
    %1 = arith.extui %0 : i1 to i32
    %c0_i32_0 = arith.constant 0 : i32
    %2 = arith.cmpi ne, %1, %c0_i32_0 : i32
    scf.if %2 {
      %c0_151 = arith.constant 0 : index
      %c0_152 = arith.constant 0 : index
      %c0_153 = arith.constant 0 : index
      %245 = vector.load %arg2[%c0_151, %c0_152, %c0_153] : memref<1x8x32xf32, #tpu.memory_space<vmem>>, vector<1x8x32xf32>
      %246 = vector.shape_cast %245 : vector<1x8x32xf32> to vector<8x32xf32>
      %c0_154 = arith.constant 0 : index
      %c0_155 = arith.constant 0 : index
      %247 = vector.load %arg33[%c0_154, %c0_155] : memref<8x32xf32, #tpu.memory_space<vmem>>, vector<8x32xf32>
      tpu.vector_store %arg33[%c0_154, %c0_155], %246 {strides = array<i32>} : memref<8x32xf32, #tpu.memory_space<vmem>>, vector<8x32xf32>,
    } else {
    }
    %c0 = arith.constant 0 : index
    %c0_1 = arith.constant 0 : index
    %3 = vector.load %arg33[%c0, %c0_1] : memref<8x32xf32, #tpu.memory_space<vmem>>, vector<8x32xf32>
    %c0_2 = arith.constant 0 : index
    %c0_3 = arith.constant 0 : index
    %c0_4 = arith.constant 0 : index
    %4 = vector.load %arg3[%c0_2, %c0_3, %c0_4] : memref<1x8x32xf32, #tpu.memory_space<vmem>>, vector<1x8x32xf32>
    %5 = vector.shape_cast %4 : vector<1x8x32xf32> to vector<8x32xf32>
    %6 = tpu.iota {dimensions = array<i32: 0>} : vector<8x8xi32>
    %7 = tpu.iota {dimensions = array<i32: 1>} : vector<8x8xi32>
    %8 = arith.cmpi sgt, %7, %6 : vector<8x8xi32>
    %cst = arith.constant -1.000000e+09 : f32
    %cst_5 = arith.constant 0.000000e+00 : f32
    %9 = vector.broadcast %cst : f32 to vector<8x8xf32>
    %10 = vector.broadcast %cst_5 : f32 to vector<8x8xf32>
    %11 = arith.select %8, %9, %10 : vector<8x8xi1>, vector<8x8xf32>
    %c0_6 = arith.constant 0 : index
    %c0_7 = arith.constant 0 : index
    %c0_8 = arith.constant 0 : index
    %12 = vector.load %arg4[%c0_6, %c0_7, %c0_8] : memref<1x1x8xf32, #tpu.memory_space<vmem>>, vector<1x1x8xf32>
    %13 = vector.shape_cast %12 : vector<1x1x8xf32> to vector<1x8xf32>
    %cst_9 = arith.constant 5.000000e-01 : f32
    %14 = vector.broadcast %cst_9 : f32 to vector<1x8xf32>
    %15 = arith.cmpf ogt, %13, %14 : vector<1x8xf32>
    %cst_10 = arith.constant -1.000000e+09 : f32
    %cst_11 = arith.constant 0.000000e+00 : f32
    %16 = vector.broadcast %cst_10 : f32 to vector<1x8xf32>
    %17 = vector.broadcast %cst_11 : f32 to vector<1x8xf32>
    %18 = arith.select %15, %16, %17 : vector<1x8xi1>, vector<1x8xf32>
    %19 = vector.broadcast %18 : vector<1x8xf32> to vector<8x8xf32>
    %20 = arith.addf %11, %19 : vector<8x8xf32>
    %c0_12 = arith.constant 0 : index
    %c0_13 = arith.constant 0 : index
    %c0_14 = arith.constant 0 : index
    %21 = vector.load %arg5[%c0_12, %c0_13, %c0_14] : memref<1x1x8xf32, #tpu.memory_space<vmem>>, vector<1x1x8xf32>
    %22 = vector.shape_cast %21 : vector<1x1x8xf32> to vector<1x8xf32>
    %cst_15 = arith.constant 5.000000e-01 : f32
    %23 = vector.broadcast %cst_15 : f32 to vector<1x8xf32>
    %24 = arith.cmpf ogt, %22, %23 : vector<1x8xf32>
    %cst_16 = arith.constant -1.000000e+09 : f32
    %cst_17 = arith.constant 0.000000e+00 : f32
    %25 = vector.broadcast %cst_16 : f32 to vector<1x8xf32>
    %26 = vector.broadcast %cst_17 : f32 to vector<1x8xf32>
    %27 = arith.select %24, %25, %26 : vector<1x8xi1>, vector<1x8xf32>
    %c0_18 = arith.constant 0 : index
    %c0_19 = arith.constant 0 : index
    %c0_20 = arith.constant 0 : index
    %c0_21 = arith.constant 0 : index
    %28 = vector.load %arg6[%c0_18, %c0_19, %c0_20, %c0_21] : memref<1x4x32x8xbf16, #tpu.memory_space<vmem>>, vector<1x4x32x8xbf16>
    %29 = vector.shape_cast %28 : vector<1x4x32x8xbf16> to vector<4x32x8xbf16>
    %c0_22 = arith.constant 0 : index
    %c0_23 = arith.constant 0 : index
    %c0_24 = arith.constant 0 : index
    %c0_25 = arith.constant 0 : index
    %30 = vector.load %arg7[%c0_22, %c0_23, %c0_24, %c0_25] : memref<1x4x1x8xf32, #tpu.memory_space<vmem>>, vector<1x4x1x8xf32>
    %31 = vector.shape_cast %30 : vector<1x4x1x8xf32> to vector<4x1x8xf32>
    %c0_26 = arith.constant 0 : index
    %c0_27 = arith.constant 0 : index
    %c0_28 = arith.constant 0 : index
    %c0_29 = arith.constant 0 : index
    %32 = vector.load %arg8[%c0_26, %c0_27, %c0_28, %c0_29] : memref<1x4x32x8xbf16, #tpu.memory_space<vmem>>, vector<1x4x32x8xbf16>
    %33 = vector.shape_cast %32 : vector<1x4x32x8xbf16> to vector<4x32x8xbf16>
    %c0_30 = arith.constant 0 : index
    %c0_31 = arith.constant 0 : index
    %c0_32 = arith.constant 0 : index
    %c0_33 = arith.constant 0 : index
    %34 = vector.load %arg9[%c0_30, %c0_31, %c0_32, %c0_33] : memref<1x4x1x8xf32, #tpu.memory_space<vmem>>, vector<1x4x1x8xf32>
    %35 = vector.shape_cast %34 : vector<1x4x1x8xf32> to vector<4x1x8xf32>
    %c0_34 = arith.constant 0 : index
    %c0_35 = arith.constant 0 : index
    %c0_36 = arith.constant 0 : index
    %c0_37 = arith.constant 0 : index
    %36 = vector.load %arg10[%c0_34, %c0_35, %c0_36, %c0_37] : memref<1x4x32x8xbf16, #tpu.memory_space<vmem>>, vector<1x4x32x8xbf16>
    %37 = vector.shape_cast %36 : vector<1x4x32x8xbf16> to vector<4x32x8xbf16>
    %c0_38 = arith.constant 0 : index
    %c0_39 = arith.constant 0 : index
    %c0_40 = arith.constant 0 : index
    %c0_41 = arith.constant 0 : index
    %38 = vector.load %arg11[%c0_38, %c0_39, %c0_40, %c0_41] : memref<1x4x1x8xf32, #tpu.memory_space<vmem>>, vector<1x4x1x8xf32>
    %39 = vector.shape_cast %38 : vector<1x4x1x8xf32> to vector<4x1x8xf32>
    %c0_42 = arith.constant 0 : index
    %c0_43 = arith.constant 0 : index
    %c0_44 = arith.constant 0 : index
    %c0_45 = arith.constant 0 : index
    %40 = vector.load %arg12[%c0_42, %c0_43, %c0_44, %c0_45] : memref<1x4x8x32xbf16, #tpu.memory_space<vmem>>, vector<1x4x8x32xbf16>
    %41 = vector.shape_cast %40 : vector<1x4x8x32xbf16> to vector<4x8x32xbf16>
    %c0_46 = arith.constant 0 : index
    %c0_47 = arith.constant 0 : index
    %c0_48 = arith.constant 0 : index
    %42 = vector.load %arg13[%c0_46, %c0_47, %c0_48] : memref<1x1x32xf32, #tpu.memory_space<vmem>>, vector<1x1x32xf32>
    %43 = vector.shape_cast %42 : vector<1x1x32xf32> to vector<1x32xf32>
    %44 = arith.truncf %3 : vector<8x32xf32> to vector<8x32xbf16>
    %45 = vector.shape_cast %44 : vector<8x32xbf16> to vector<1x8x32xbf16>
    %46 = vector.shape_cast %45 : vector<1x8x32xbf16> to vector<1x8x32xbf16>
    %47 = vector.broadcast %46 : vector<1x8x32xbf16> to vector<4x8x32xbf16>
    %48 = arith.truncf %3 : vector<8x32xf32> to vector<8x32xbf16>
    %49 = vector.shape_cast %48 : vector<8x32xbf16> to vector<1x8x32xbf16>
    %50 = vector.shape_cast %49 : vector<1x8x32xbf16> to vector<1x8x32xbf16>
    %51 = vector.broadcast %50 : vector<1x8x32xbf16> to vector<4x8x32xbf16>
    "tpu.trace_start"() <{level = 10 : i32, message = "hsd,hde->hse"}> : () -> ()
    %cst_49 = arith.constant dense<0.000000e+00> : vector<4x8x8xf32>
    %52 = tpu.matmul %47, %29, %cst_49 {dimension_numbers = #tpu.dot_dimension_numbers<[2], [1], [1], [2], [0, 0, 0, 1, 1, 2], [0], [0]>} : vector<4x8x32xbf16>, vector<4x32x8xbf16>, vector<4x8x8xf32> -> vector<4x8x8xf32>
    "tpu.trace_stop"() : () -> ()
    %53 = vector.broadcast %31 : vector<4x1x8xf32> to vector<4x8x8xf32>
    %54 = arith.addf %52, %53 : vector<4x8x8xf32>
    "tpu.trace_start"() <{level = 10 : i32, message = "hsd,hde->hse"}> : () -> ()
    %cst_50 = arith.constant dense<0.000000e+00> : vector<4x8x8xf32>
    %55 = tpu.matmul %51, %33, %cst_50 {dimension_numbers = #tpu.dot_dimension_numbers<[2], [1], [1], [2], [0, 0, 0, 1, 1, 2], [0], [0]>} : vector<4x8x32xbf16>, vector<4x32x8xbf16>, vector<4x8x8xf32> -> vector<4x8x8xf32>
    "tpu.trace_stop"() : () -> ()
    %56 = vector.broadcast %35 : vector<4x1x8xf32> to vector<4x8x8xf32>
    %57 = arith.addf %55, %56 : vector<4x8x8xf32>
    "tpu.trace_start"() <{level = 10 : i32, message = "hsd,hde->hse"}> : () -> ()
    %cst_51 = arith.constant dense<0.000000e+00> : vector<4x8x8xf32>
    %58 = tpu.matmul %51, %37, %cst_51 {dimension_numbers = #tpu.dot_dimension_numbers<[2], [1], [1], [2], [0, 0, 0, 1, 1, 2], [0], [0]>} : vector<4x8x32xbf16>, vector<4x32x8xbf16>, vector<4x8x8xf32> -> vector<4x8x8xf32>
    "tpu.trace_stop"() : () -> ()
    %59 = vector.broadcast %39 : vector<4x1x8xf32> to vector<4x8x8xf32>
    %60 = arith.addf %58, %59 : vector<4x8x8xf32>
    %61 = arith.truncf %54 : vector<4x8x8xf32> to vector<4x8x8xbf16>
    %62 = arith.truncf %57 : vector<4x8x8xf32> to vector<4x8x8xbf16>
    "tpu.trace_start"() <{level = 10 : i32, message = "hqd,hkd->hqk"}> : () -> ()
    %cst_52 = arith.constant dense<0.000000e+00> : vector<4x8x8xf32>
    %63 = tpu.matmul %61, %62, %cst_52 {dimension_numbers = #tpu.dot_dimension_numbers<[2], [2], [1], [1], [0, 0, 0, 1, 1, 1], [0], [0]>} : vector<4x8x8xbf16>, vector<4x8x8xbf16>, vector<4x8x8xf32> -> vector<4x8x8xf32>
    "tpu.trace_stop"() : () -> ()
    %64 = vector.shape_cast %20 : vector<8x8xf32> to vector<1x8x8xf32>
    %65 = vector.broadcast %64 : vector<1x8x8xf32> to vector<4x8x8xf32>
    %66 = arith.addf %63, %65 : vector<4x8x8xf32>
    %cst_53 = arith.constant dense<0xFF800000> : vector<4x8xf32>
    %67 = vector.multi_reduction <maximumf>, %66, %cst_53 [2] : vector<4x8x8xf32> to vector<4x8xf32>
    %68 = vector.shape_cast %67 : vector<4x8xf32> to vector<4x8x1xf32>
    %69 = vector.broadcast %68 : vector<4x8x1xf32> to vector<4x8x8xf32>
    %70 = arith.subf %66, %69 : vector<4x8x8xf32>
    %71 = math.exp %70 : vector<4x8x8xf32>
    %cst_54 = arith.constant dense<0.000000e+00> : vector<4x8xf32>
    %72 = vector.multi_reduction <add>, %71, %cst_54 [2] : vector<4x8x8xf32> to vector<4x8xf32>
    %73 = vector.shape_cast %72 : vector<4x8xf32> to vector<4x8x1xf32>
    %74 = tpu.reciprocal %73 {approx = true} : vector<4x8x1xf32> -> vector<4x8x1xf32>
    %75 = vector.broadcast %74 : vector<4x8x1xf32> to vector<4x8x8xf32>
    %76 = arith.mulf %71, %75 : vector<4x8x8xf32>
    %77 = arith.truncf %76 : vector<4x8x8xf32> to vector<4x8x8xbf16>
    %78 = arith.truncf %60 : vector<4x8x8xf32> to vector<4x8x8xbf16>
    "tpu.trace_start"() <{level = 10 : i32, message = "hqk,hkd->hqd"}> : () -> ()
    %cst_55 = arith.constant dense<0.000000e+00> : vector<4x8x8xf32>
    %79 = tpu.matmul %77, %78, %cst_55 {dimension_numbers = #tpu.dot_dimension_numbers<[2], [1], [1], [2], [0, 0, 0, 1, 1, 2], [0], [0]>} : vector<4x8x8xbf16>, vector<4x8x8xbf16>, vector<4x8x8xf32> -> vector<4x8x8xf32>
    "tpu.trace_stop"() : () -> ()
    %80 = arith.truncf %79 : vector<4x8x8xf32> to vector<4x8x8xbf16>
    "tpu.trace_start"() <{level = 10 : i32, message = "hqd,hde->hqe"}> : () -> ()
    %cst_56 = arith.constant dense<0.000000e+00> : vector<4x8x32xf32>
    %81 = tpu.matmul %80, %41, %cst_56 {dimension_numbers = #tpu.dot_dimension_numbers<[2], [1], [1], [2], [0, 0, 0, 1, 1, 2], [0], [0]>} : vector<4x8x8xbf16>, vector<4x8x32xbf16>, vector<4x8x32xf32> -> vector<4x8x32xf32>
    "tpu.trace_stop"() : () -> ()
    %cst_57 = arith.constant dense<0.000000e+00> : vector<8x32xf32>
    %82 = vector.multi_reduction <add>, %81, %cst_57 [0] : vector<4x8x32xf32> to vector<8x32xf32>
    %83 = vector.broadcast %43 : vector<1x32xf32> to vector<8x32xf32>
    %84 = arith.addf %82, %83 : vector<8x32xf32>
    %c0_58 = arith.constant 0 : index
    %c0_59 = arith.constant 0 : index
    %c0_60 = arith.constant 0 : index
    %85 = vector.load %arg14[%c0_58, %c0_59, %c0_60] : memref<1x1x32xf32, #tpu.memory_space<vmem>>, vector<1x1x32xf32>
    %86 = vector.shape_cast %85 : vector<1x1x32xf32> to vector<1x32xf32>
    %c0_61 = arith.constant 0 : index
    %c0_62 = arith.constant 0 : index
    %c0_63 = arith.constant 0 : index
    %87 = vector.load %arg15[%c0_61, %c0_62, %c0_63] : memref<1x1x32xf32, #tpu.memory_space<vmem>>, vector<1x1x32xf32>
    %88 = vector.shape_cast %87 : vector<1x1x32xf32> to vector<1x32xf32>
    %89 = arith.addf %84, %3 : vector<8x32xf32>
    %cst_64 = arith.constant dense<0.000000e+00> : vector<8xf32>
    %90 = vector.multi_reduction <add>, %89, %cst_64 [1] : vector<8x32xf32> to vector<8xf32>
    %91 = vector.shape_cast %90 : vector<8xf32> to vector<8x1xf32>
    %cst_65 = arith.constant 3.200000e+01 : f32
    %92 = vector.broadcast %cst_65 : f32 to vector<8x1xf32>
    %93 = arith.divf %91, %92 : vector<8x1xf32>
    %94 = vector.broadcast %93 : vector<8x1xf32> to vector<8x32xf32>
    %95 = arith.subf %89, %94 : vector<8x32xf32>
    %96 = arith.mulf %95, %95 : vector<8x32xf32>
    %cst_66 = arith.constant dense<0.000000e+00> : vector<8xf32>
    %97 = vector.multi_reduction <add>, %96, %cst_66 [1] : vector<8x32xf32> to vector<8xf32>
    %98 = vector.shape_cast %97 : vector<8xf32> to vector<8x1xf32>
    %cst_67 = arith.constant 3.200000e+01 : f32
    %99 = vector.broadcast %cst_67 : f32 to vector<8x1xf32>
    %100 = arith.divf %98, %99 : vector<8x1xf32>
    %101 = vector.broadcast %93 : vector<8x1xf32> to vector<8x32xf32>
    %102 = arith.subf %89, %101 : vector<8x32xf32>
    %cst_68 = arith.constant 9.99999974E-6 : f32
    %103 = vector.broadcast %cst_68 : f32 to vector<8x1xf32>
    %104 = arith.addf %100, %103 : vector<8x1xf32>
    %105 = math.rsqrt %104 : vector<8x1xf32>
    %106 = vector.broadcast %105 : vector<8x1xf32> to vector<8x32xf32>
    %107 = arith.mulf %102, %106 : vector<8x32xf32>
    %108 = vector.broadcast %86 : vector<1x32xf32> to vector<8x32xf32>
    %109 = arith.mulf %107, %108 : vector<8x32xf32>
    %110 = vector.broadcast %88 : vector<1x32xf32> to vector<8x32xf32>
    %111 = arith.addf %109, %110 : vector<8x32xf32>
    %c0_69 = arith.constant 0 : index
    %c0_70 = arith.constant 0 : index
    %c0_71 = arith.constant 0 : index
    %c0_72 = arith.constant 0 : index
    %112 = vector.load %arg16[%c0_69, %c0_70, %c0_71, %c0_72] : memref<1x4x32x8xbf16, #tpu.memory_space<vmem>>, vector<1x4x32x8xbf16>
    %113 = vector.shape_cast %112 : vector<1x4x32x8xbf16> to vector<4x32x8xbf16>
    %c0_73 = arith.constant 0 : index
    %c0_74 = arith.constant 0 : index
    %c0_75 = arith.constant 0 : index
    %c0_76 = arith.constant 0 : index
    %114 = vector.load %arg17[%c0_73, %c0_74, %c0_75, %c0_76] : memref<1x4x1x8xf32, #tpu.memory_space<vmem>>, vector<1x4x1x8xf32>
    %115 = vector.shape_cast %114 : vector<1x4x1x8xf32> to vector<4x1x8xf32>
    %c0_77 = arith.constant 0 : index
    %c0_78 = arith.constant 0 : index
    %c0_79 = arith.constant 0 : index
    %c0_80 = arith.constant 0 : index
    %116 = vector.load %arg18[%c0_77, %c0_78, %c0_79, %c0_80] : memref<1x4x32x8xbf16, #tpu.memory_space<vmem>>, vector<1x4x32x8xbf16>
    %117 = vector.shape_cast %116 : vector<1x4x32x8xbf16> to vector<4x32x8xbf16>
    %c0_81 = arith.constant 0 : index
    %c0_82 = arith.constant 0 : index
    %c0_83 = arith.constant 0 : index
    %c0_84 = arith.constant 0 : index
    %118 = vector.load %arg19[%c0_81, %c0_82, %c0_83, %c0_84] : memref<1x4x1x8xf32, #tpu.memory_space<vmem>>, vector<1x4x1x8xf32>
    %119 = vector.shape_cast %118 : vector<1x4x1x8xf32> to vector<4x1x8xf32>
    %c0_85 = arith.constant 0 : index
    %c0_86 = arith.constant 0 : index
    %c0_87 = arith.constant 0 : index
    %c0_88 = arith.constant 0 : index
    %120 = vector.load %arg20[%c0_85, %c0_86, %c0_87, %c0_88] : memref<1x4x32x8xbf16, #tpu.memory_space<vmem>>, vector<1x4x32x8xbf16>
    %121 = vector.shape_cast %120 : vector<1x4x32x8xbf16> to vector<4x32x8xbf16>
    %c0_89 = arith.constant 0 : index
    %c0_90 = arith.constant 0 : index
    %c0_91 = arith.constant 0 : index
    %c0_92 = arith.constant 0 : index
    %122 = vector.load %arg21[%c0_89, %c0_90, %c0_91, %c0_92] : memref<1x4x1x8xf32, #tpu.memory_space<vmem>>, vector<1x4x1x8xf32>
    %123 = vector.shape_cast %122 : vector<1x4x1x8xf32> to vector<4x1x8xf32>
    %c0_93 = arith.constant 0 : index
    %c0_94 = arith.constant 0 : index
    %c0_95 = arith.constant 0 : index
    %c0_96 = arith.constant 0 : index
    %124 = vector.load %arg22[%c0_93, %c0_94, %c0_95, %c0_96] : memref<1x4x8x32xbf16, #tpu.memory_space<vmem>>, vector<1x4x8x32xbf16>
    %125 = vector.shape_cast %124 : vector<1x4x8x32xbf16> to vector<4x8x32xbf16>
    %c0_97 = arith.constant 0 : index
    %c0_98 = arith.constant 0 : index
    %c0_99 = arith.constant 0 : index
    %126 = vector.load %arg23[%c0_97, %c0_98, %c0_99] : memref<1x1x32xf32, #tpu.memory_space<vmem>>, vector<1x1x32xf32>
    %127 = vector.shape_cast %126 : vector<1x1x32xf32> to vector<1x32xf32>
    %128 = arith.truncf %111 : vector<8x32xf32> to vector<8x32xbf16>
    %129 = vector.shape_cast %128 : vector<8x32xbf16> to vector<1x8x32xbf16>
    %130 = vector.shape_cast %129 : vector<1x8x32xbf16> to vector<1x8x32xbf16>
    %131 = vector.broadcast %130 : vector<1x8x32xbf16> to vector<4x8x32xbf16>
    %132 = arith.truncf %5 : vector<8x32xf32> to vector<8x32xbf16>
    %133 = vector.shape_cast %132 : vector<8x32xbf16> to vector<1x8x32xbf16>
    %134 = vector.shape_cast %133 : vector<1x8x32xbf16> to vector<1x8x32xbf16>
    %135 = vector.broadcast %134 : vector<1x8x32xbf16> to vector<4x8x32xbf16>
    "tpu.trace_start"() <{level = 10 : i32, message = "hsd,hde->hse"}> : () -> ()
    %cst_100 = arith.constant dense<0.000000e+00> : vector<4x8x8xf32>
    %136 = tpu.matmul %131, %113, %cst_100 {dimension_numbers = #tpu.dot_dimension_numbers<[2], [1], [1], [2], [0, 0, 0, 1, 1, 2], [0], [0]>} : vector<4x8x32xbf16>, vector<4x32x8xbf16>, vector<4x8x8xf32> -> vector<4x8x8xf32>
    "tpu.trace_stop"() : () -> ()
    %137 = vector.broadcast %115 : vector<4x1x8xf32> to vector<4x8x8xf32>
    %138 = arith.addf %136, %137 : vector<4x8x8xf32>
    "tpu.trace_start"() <{level = 10 : i32, message = "hsd,hde->hse"}> : () -> ()
    %cst_101 = arith.constant dense<0.000000e+00> : vector<4x8x8xf32>
    %139 = tpu.matmul %135, %117, %cst_101 {dimension_numbers = #tpu.dot_dimension_numbers<[2], [1], [1], [2], [0, 0, 0, 1, 1, 2], [0], [0]>} : vector<4x8x32xbf16>, vector<4x32x8xbf16>, vector<4x8x8xf32> -> vector<4x8x8xf32>
    "tpu.trace_stop"() : () -> ()
    %140 = vector.broadcast %119 : vector<4x1x8xf32> to vector<4x8x8xf32>
    %141 = arith.addf %139, %140 : vector<4x8x8xf32>
    "tpu.trace_start"() <{level = 10 : i32, message = "hsd,hde->hse"}> : () -> ()
    %cst_102 = arith.constant dense<0.000000e+00> : vector<4x8x8xf32>
    %142 = tpu.matmul %135, %121, %cst_102 {dimension_numbers = #tpu.dot_dimension_numbers<[2], [1], [1], [2], [0, 0, 0, 1, 1, 2], [0], [0]>} : vector<4x8x32xbf16>, vector<4x32x8xbf16>, vector<4x8x8xf32> -> vector<4x8x8xf32>
    "tpu.trace_stop"() : () -> ()
    %143 = vector.broadcast %123 : vector<4x1x8xf32> to vector<4x8x8xf32>
    %144 = arith.addf %142, %143 : vector<4x8x8xf32>
    %145 = arith.truncf %138 : vector<4x8x8xf32> to vector<4x8x8xbf16>
    %146 = arith.truncf %141 : vector<4x8x8xf32> to vector<4x8x8xbf16>
    "tpu.trace_start"() <{level = 10 : i32, message = "hqd,hkd->hqk"}> : () -> ()
    %cst_103 = arith.constant dense<0.000000e+00> : vector<4x8x8xf32>
    %147 = tpu.matmul %145, %146, %cst_103 {dimension_numbers = #tpu.dot_dimension_numbers<[2], [2], [1], [1], [0, 0, 0, 1, 1, 1], [0], [0]>} : vector<4x8x8xbf16>, vector<4x8x8xbf16>, vector<4x8x8xf32> -> vector<4x8x8xf32>
    "tpu.trace_stop"() : () -> ()
    %148 = vector.shape_cast %27 : vector<1x8xf32> to vector<1x1x8xf32>
    %149 = vector.broadcast %148 : vector<1x1x8xf32> to vector<4x8x8xf32>
    %150 = arith.addf %147, %149 : vector<4x8x8xf32>
    %cst_104 = arith.constant dense<0xFF800000> : vector<4x8xf32>
    %151 = vector.multi_reduction <maximumf>, %150, %cst_104 [2] : vector<4x8x8xf32> to vector<4x8xf32>
    %152 = vector.shape_cast %151 : vector<4x8xf32> to vector<4x8x1xf32>
    %153 = vector.broadcast %152 : vector<4x8x1xf32> to vector<4x8x8xf32>
    %154 = arith.subf %150, %153 : vector<4x8x8xf32>
    %155 = math.exp %154 : vector<4x8x8xf32>
    %cst_105 = arith.constant dense<0.000000e+00> : vector<4x8xf32>
    %156 = vector.multi_reduction <add>, %155, %cst_105 [2] : vector<4x8x8xf32> to vector<4x8xf32>
    %157 = vector.shape_cast %156 : vector<4x8xf32> to vector<4x8x1xf32>
    %158 = tpu.reciprocal %157 {approx = true} : vector<4x8x1xf32> -> vector<4x8x1xf32>
    %159 = vector.broadcast %158 : vector<4x8x1xf32> to vector<4x8x8xf32>
    %160 = arith.mulf %155, %159 : vector<4x8x8xf32>
    %161 = arith.truncf %160 : vector<4x8x8xf32> to vector<4x8x8xbf16>
    %162 = arith.truncf %144 : vector<4x8x8xf32> to vector<4x8x8xbf16>
    "tpu.trace_start"() <{level = 10 : i32, message = "hqk,hkd->hqd"}> : () -> ()
    %cst_106 = arith.constant dense<0.000000e+00> : vector<4x8x8xf32>
    %163 = tpu.matmul %161, %162, %cst_106 {dimension_numbers = #tpu.dot_dimension_numbers<[2], [1], [1], [2], [0, 0, 0, 1, 1, 2], [0], [0]>} : vector<4x8x8xbf16>, vector<4x8x8xbf16>, vector<4x8x8xf32> -> vector<4x8x8xf32>
    "tpu.trace_stop"() : () -> ()
    %164 = arith.truncf %163 : vector<4x8x8xf32> to vector<4x8x8xbf16>
    "tpu.trace_start"() <{level = 10 : i32, message = "hqd,hde->hqe"}> : () -> ()
    %cst_107 = arith.constant dense<0.000000e+00> : vector<4x8x32xf32>
    %165 = tpu.matmul %164, %125, %cst_107 {dimension_numbers = #tpu.dot_dimension_numbers<[2], [1], [1], [2], [0, 0, 0, 1, 1, 2], [0], [0]>} : vector<4x8x8xbf16>, vector<4x8x32xbf16>, vector<4x8x32xf32> -> vector<4x8x32xf32>
    "tpu.trace_stop"() : () -> ()
    %cst_108 = arith.constant dense<0.000000e+00> : vector<8x32xf32>
    %166 = vector.multi_reduction <add>, %165, %cst_108 [0] : vector<4x8x32xf32> to vector<8x32xf32>
    %167 = vector.broadcast %127 : vector<1x32xf32> to vector<8x32xf32>
    %168 = arith.addf %166, %167 : vector<8x32xf32>
    %c0_109 = arith.constant 0 : index
    %c0_110 = arith.constant 0 : index
    %c0_111 = arith.constant 0 : index
    %169 = vector.load %arg24[%c0_109, %c0_110, %c0_111] : memref<1x1x32xf32, #tpu.memory_space<vmem>>, vector<1x1x32xf32>
    %170 = vector.shape_cast %169 : vector<1x1x32xf32> to vector<1x32xf32>
    %c0_112 = arith.constant 0 : index
    %c0_113 = arith.constant 0 : index
    %c0_114 = arith.constant 0 : index
    %171 = vector.load %arg25[%c0_112, %c0_113, %c0_114] : memref<1x1x32xf32, #tpu.memory_space<vmem>>, vector<1x1x32xf32>
    %172 = vector.shape_cast %171 : vector<1x1x32xf32> to vector<1x32xf32>
    %173 = arith.addf %168, %111 : vector<8x32xf32>
    %cst_115 = arith.constant dense<0.000000e+00> : vector<8xf32>
    %174 = vector.multi_reduction <add>, %173, %cst_115 [1] : vector<8x32xf32> to vector<8xf32>
    %175 = vector.shape_cast %174 : vector<8xf32> to vector<8x1xf32>
    %cst_116 = arith.constant 3.200000e+01 : f32
    %176 = vector.broadcast %cst_116 : f32 to vector<8x1xf32>
    %177 = arith.divf %175, %176 : vector<8x1xf32>
    %178 = vector.broadcast %177 : vector<8x1xf32> to vector<8x32xf32>
    %179 = arith.subf %173, %178 : vector<8x32xf32>
    %180 = arith.mulf %179, %179 : vector<8x32xf32>
    %cst_117 = arith.constant dense<0.000000e+00> : vector<8xf32>
    %181 = vector.multi_reduction <add>, %180, %cst_117 [1] : vector<8x32xf32> to vector<8xf32>
    %182 = vector.shape_cast %181 : vector<8xf32> to vector<8x1xf32>
    %cst_118 = arith.constant 3.200000e+01 : f32
    %183 = vector.broadcast %cst_118 : f32 to vector<8x1xf32>
    %184 = arith.divf %182, %183 : vector<8x1xf32>
    %185 = vector.broadcast %177 : vector<8x1xf32> to vector<8x32xf32>
    %186 = arith.subf %173, %185 : vector<8x32xf32>
    %cst_119 = arith.constant 9.99999974E-6 : f32
    %187 = vector.broadcast %cst_119 : f32 to vector<8x1xf32>
    %188 = arith.addf %184, %187 : vector<8x1xf32>
    %189 = math.rsqrt %188 : vector<8x1xf32>
    %190 = vector.broadcast %189 : vector<8x1xf32> to vector<8x32xf32>
    %191 = arith.mulf %186, %190 : vector<8x32xf32>
    %192 = vector.broadcast %170 : vector<1x32xf32> to vector<8x32xf32>
    %193 = arith.mulf %191, %192 : vector<8x32xf32>
    %194 = vector.broadcast %172 : vector<1x32xf32> to vector<8x32xf32>
    %195 = arith.addf %193, %194 : vector<8x32xf32>
    %c0_120 = arith.constant 0 : index
    %c0_121 = arith.constant 0 : index
    %c0_122 = arith.constant 0 : index
    %196 = vector.load %arg26[%c0_120, %c0_121, %c0_122] : memref<1x32x64xbf16, #tpu.memory_space<vmem>>, vector<1x32x64xbf16>
    %197 = vector.shape_cast %196 : vector<1x32x64xbf16> to vector<32x64xbf16>
    %c0_123 = arith.constant 0 : index
    %c0_124 = arith.constant 0 : index
    %c0_125 = arith.constant 0 : index
    %198 = vector.load %arg27[%c0_123, %c0_124, %c0_125] : memref<1x1x64xf32, #tpu.memory_space<vmem>>, vector<1x1x64xf32>
    %199 = vector.shape_cast %198 : vector<1x1x64xf32> to vector<1x64xf32>
    %200 = arith.truncf %195 : vector<8x32xf32> to vector<8x32xbf16>
    %cst_126 = arith.constant dense<0.000000e+00> : vector<8x64xf32>
    %201 = tpu.matmul %200, %197, %cst_126 {dimension_numbers = #tpu.dot_dimension_numbers<[1], [0], [0], [1], [0, 0, 1, 1], [], []>} : vector<8x32xbf16>, vector<32x64xbf16>, vector<8x64xf32> -> vector<8x64xf32>
    %202 = vector.broadcast %199 : vector<1x64xf32> to vector<8x64xf32>
    %203 = arith.addf %201, %202 : vector<8x64xf32>
    %cst_127 = arith.constant 0.000000e+00 : f32
    %204 = vector.broadcast %cst_127 : f32 to vector<8x64xf32>
    %205 = arith.maximumf %203, %204 : vector<8x64xf32>
    %c0_128 = arith.constant 0 : index
    %c0_129 = arith.constant 0 : index
    %c0_130 = arith.constant 0 : index
    %206 = vector.load %arg28[%c0_128, %c0_129, %c0_130] : memref<1x64x32xbf16, #tpu.memory_space<vmem>>, vector<1x64x32xbf16>
    %207 = vector.shape_cast %206 : vector<1x64x32xbf16> to vector<64x32xbf16>
    %c0_131 = arith.constant 0 : index
    %c0_132 = arith.constant 0 : index
    %c0_133 = arith.constant 0 : index
    %208 = vector.load %arg29[%c0_131, %c0_132, %c0_133] : memref<1x1x32xf32, #tpu.memory_space<vmem>>, vector<1x1x32xf32>
    %209 = vector.shape_cast %208 : vector<1x1x32xf32> to vector<1x32xf32>
    %210 = arith.truncf %205 : vector<8x64xf32> to vector<8x64xbf16>
    %cst_134 = arith.constant dense<0.000000e+00> : vector<8x32xf32>
    %211 = tpu.matmul %210, %207, %cst_134 {dimension_numbers = #tpu.dot_dimension_numbers<[1], [0], [0], [1], [0, 0, 1, 1], [], []>} : vector<8x64xbf16>, vector<64x32xbf16>, vector<8x32xf32> -> vector<8x32xf32>
    %212 = vector.broadcast %209 : vector<1x32xf32> to vector<8x32xf32>
    %213 = arith.addf %211, %212 : vector<8x32xf32>
    %c0_135 = arith.constant 0 : index
    %c0_136 = arith.constant 0 : index
    %c0_137 = arith.constant 0 : index
    %214 = vector.load %arg30[%c0_135, %c0_136, %c0_137] : memref<1x1x32xf32, #tpu.memory_space<vmem>>, vector<1x1x32xf32>
    %215 = vector.shape_cast %214 : vector<1x1x32xf32> to vector<1x32xf32>
    %c0_138 = arith.constant 0 : index
    %c0_139 = arith.constant 0 : index
    %c0_140 = arith.constant 0 : index
    %216 = vector.load %arg31[%c0_138, %c0_139, %c0_140] : memref<1x1x32xf32, #tpu.memory_space<vmem>>, vector<1x1x32xf32>
    %217 = vector.shape_cast %216 : vector<1x1x32xf32> to vector<1x32xf32>
    %218 = arith.addf %213, %195 : vector<8x32xf32>
    %cst_141 = arith.constant dense<0.000000e+00> : vector<8xf32>
    %219 = vector.multi_reduction <add>, %218, %cst_141 [1] : vector<8x32xf32> to vector<8xf32>
    %220 = vector.shape_cast %219 : vector<8xf32> to vector<8x1xf32>
    %cst_142 = arith.constant 3.200000e+01 : f32
    %221 = vector.broadcast %cst_142 : f32 to vector<8x1xf32>
    %222 = arith.divf %220, %221 : vector<8x1xf32>
    %223 = vector.broadcast %222 : vector<8x1xf32> to vector<8x32xf32>
    %224 = arith.subf %218, %223 : vector<8x32xf32>
    %225 = arith.mulf %224, %224 : vector<8x32xf32>
    %cst_143 = arith.constant dense<0.000000e+00> : vector<8xf32>
    %226 = vector.multi_reduction <add>, %225, %cst_143 [1] : vector<8x32xf32> to vector<8xf32>
    %227 = vector.shape_cast %226 : vector<8xf32> to vector<8x1xf32>
    %cst_144 = arith.constant 3.200000e+01 : f32
    %228 = vector.broadcast %cst_144 : f32 to vector<8x1xf32>
    %229 = arith.divf %227, %228 : vector<8x1xf32>
    %230 = vector.broadcast %222 : vector<8x1xf32> to vector<8x32xf32>
    %231 = arith.subf %218, %230 : vector<8x32xf32>
    %cst_145 = arith.constant 9.99999974E-6 : f32
    %232 = vector.broadcast %cst_145 : f32 to vector<8x1xf32>
    %233 = arith.addf %229, %232 : vector<8x1xf32>
    %234 = math.rsqrt %233 : vector<8x1xf32>
    %235 = vector.broadcast %234 : vector<8x1xf32> to vector<8x32xf32>
    %236 = arith.mulf %231, %235 : vector<8x32xf32>
    %237 = vector.broadcast %215 : vector<1x32xf32> to vector<8x32xf32>
    %238 = arith.mulf %236, %237 : vector<8x32xf32>
    %239 = vector.broadcast %217 : vector<1x32xf32> to vector<8x32xf32>
    %240 = arith.addf %238, %239 : vector<8x32xf32>
    %c0_146 = arith.constant 0 : index
    %c0_147 = arith.constant 0 : index
    %241 = vector.load %arg33[%c0_146, %c0_147] : memref<8x32xf32, #tpu.memory_space<vmem>>, vector<8x32xf32>
    tpu.vector_store %arg33[%c0_146, %c0_147], %240 {strides = array<i32>} : memref<8x32xf32, #tpu.memory_space<vmem>>, vector<8x32xf32>,
    %c0_148 = arith.constant 0 : index
    %c0_149 = arith.constant 0 : index
    %c0_150 = arith.constant 0 : index
    %242 = vector.load %arg32[%c0_148, %c0_149, %c0_150] : memref<1x8x32xf32, #tpu.memory_space<vmem>>, vector<1x8x32xf32>
    %243 = vector.shape_cast %242 : vector<1x8x32xf32> to vector<8x32xf32>
    %244 = vector.shape_cast %240 : vector<8x32xf32> to vector<1x8x32xf32>
    tpu.vector_store %arg32[%c0_148, %c0_149, %c0_150], %244 {strides = array<i32>} : memref<1x8x32xf32, #tpu.memory_space<vmem>>, vector<1x8x32xf32>,
    return
  }
  func.func @transform_0(%arg0: i32, %arg1: i32) -> (i32, i32, i32) {
    %c0_i32 = arith.constant 0 : i32
    %c0_i32_0 = arith.constant 0 : i32
    %c0_i32_1 = arith.constant 0 : i32
    return %arg0, %c0_i32, %c0_i32_0 : i32, i32, i32
  }
  func.func @transform_1(%arg0: i32, %arg1: i32) -> (i32, i32, i32) {
    %c0_i32 = arith.constant 0 : i32
    %c0_i32_0 = arith.constant 0 : i32
    %c0_i32_1 = arith.constant 0 : i32
    return %arg0, %c0_i32, %c0_i32_0 : i32, i32, i32
  }
  func.func @transform_2(%arg0: i32, %arg1: i32) -> (i32, i32, i32) {
    %c0_i32 = arith.constant 0 : i32
    %c0_i32_0 = arith.constant 0 : i32
    %c0_i32_1 = arith.constant 0 : i32
    return %arg0, %c0_i32, %c0_i32_0 : i32, i32, i32
  }
  func.func @transform_3(%arg0: i32, %arg1: i32) -> (i32, i32, i32) {
    %c0_i32 = arith.constant 0 : i32
    %c0_i32_0 = arith.constant 0 : i32
    %c0_i32_1 = arith.constant 0 : i32
    return %arg0, %c0_i32, %c0_i32_0 : i32, i32, i32
  }
  func.func @transform_4(%arg0: i32, %arg1: i32) -> (i32, i32, i32, i32) {
    %c0_i32 = arith.constant 0 : i32
    %c0_i32_0 = arith.constant 0 : i32
    %c0_i32_1 = arith.constant 0 : i32
    %c0_i32_2 = arith.constant 0 : i32
    return %arg1, %c0_i32, %c0_i32_0, %c0_i32_1 : i32, i32, i32, i32
  }
  func.func @transform_5(%arg0: i32, %arg1: i32) -> (i32, i32, i32, i32) {
    %c0_i32 = arith.constant 0 : i32
    %c0_i32_0 = arith.constant 0 : i32
    %c0_i32_1 = arith.constant 0 : i32
    %c0_i32_2 = arith.constant 0 : i32
    return %arg1, %c0_i32, %c0_i32_0, %c0_i32_1 : i32, i32, i32, i32
  }
  func.func @transform_6(%arg0: i32, %arg1: i32) -> (i32, i32, i32, i32) {
    %c0_i32 = arith.constant 0 : i32
    %c0_i32_0 = arith.constant 0 : i32
    %c0_i32_1 = arith.constant 0 : i32
    %c0_i32_2 = arith.constant 0 : i32
    return %arg1, %c0_i32, %c0_i32_0, %c0_i32_1 : i32, i32, i32, i32
  }
  func.func @transform_7(%arg0: i32, %arg1: i32) -> (i32, i32, i32, i32) {
    %c0_i32 = arith.constant 0 : i32
    %c0_i32_0 = arith.constant 0 : i32
    %c0_i32_1 = arith.constant 0 : i32
    %c0_i32_2 = arith.constant 0 : i32
    return %arg1, %c0_i32, %c0_i32_0, %c0_i32_1 : i32, i32, i32, i32
  }
  func.func @transform_8(%arg0: i32, %arg1: i32) -> (i32, i32, i32, i32) {
    %c0_i32 = arith.constant 0 : i32
    %c0_i32_0 = arith.constant 0 : i32
    %c0_i32_1 = arith.constant 0 : i32
    %c0_i32_2 = arith.constant 0 : i32
    return %arg1, %c0_i32, %c0_i32_0, %c0_i32_1 : i32, i32, i32, i32
  }
  func.func @transform_9(%arg0: i32, %arg1: i32) -> (i32, i32, i32, i32) {
    %c0_i32 = arith.constant 0 : i32
    %c0_i32_0 = arith.constant 0 : i32
    %c0_i32_1 = arith.constant 0 : i32
    %c0_i32_2 = arith.constant 0 : i32
    return %arg1, %c0_i32, %c0_i32_0, %c0_i32_1 : i32, i32, i32, i32
  }
  func.func @transform_10(%arg0: i32, %arg1: i32) -> (i32, i32, i32, i32) {
    %c0_i32 = arith.constant 0 : i32
    %c0_i32_0 = arith.constant 0 : i32
    %c0_i32_1 = arith.constant 0 : i32
    %c0_i32_2 = arith.constant 0 : i32
    return %arg1, %c0_i32, %c0_i32_0, %c0_i32_1 : i32, i32, i32, i32
  }
  func.func @transform_11(%arg0: i32, %arg1: i32) -> (i32, i32, i32) {
    %c0_i32 = arith.constant 0 : i32
    %c0_i32_0 = arith.constant 0 : i32
    %c0_i32_1 = arith.constant 0 : i32
    return %arg1, %c0_i32, %c0_i32_0 : i32, i32, i32
  }
  func.func @transform_12(%arg0: i32, %arg1: i32) -> (i32, i32, i32) {
    %c0_i32 = arith.constant 0 : i32
    %c0_i32_0 = arith.constant 0 : i32
    %c0_i32_1 = arith.constant 0 : i32
    return %arg1, %c0_i32, %c0_i32_0 : i32, i32, i32
  }
  func.func @transform_13(%arg0: i32, %arg1: i32) -> (i32, i32, i32) {
    %c0_i32 = arith.constant 0 : i32
    %c0_i32_0 = arith.constant 0 : i32
    %c0_i32_1 = arith.constant 0 : i32
    return %arg1, %c0_i32, %c0_i32_0 : i32, i32, i32
  }
  func.func @transform_14(%arg0: i32, %arg1: i32) -> (i32, i32, i32, i32) {
    %c0_i32 = arith.constant 0 : i32
    %c0_i32_0 = arith.constant 0 : i32
    %c0_i32_1 = arith.constant 0 : i32
    %c0_i32_2 = arith.constant 0 : i32
    return %arg1, %c0_i32, %c0_i32_0, %c0_i32_1 : i32, i32, i32, i32
  }
  func.func @transform_15(%arg0: i32, %arg1: i32) -> (i32, i32, i32, i32) {
    %c0_i32 = arith.constant 0 : i32
    %c0_i32_0 = arith.constant 0 : i32
    %c0_i32_1 = arith.constant 0 : i32
    %c0_i32_2 = arith.constant 0 : i32
    return %arg1, %c0_i32, %c0_i32_0, %c0_i32_1 : i32, i32, i32, i32
  }
  func.func @transform_16(%arg0: i32, %arg1: i32) -> (i32, i32, i32, i32) {
    %c0_i32 = arith.constant 0 : i32
    %c0_i32_0 = arith.constant 0 : i32
    %c0_i32_1 = arith.constant 0 : i32
    %c0_i32_2 = arith.constant 0 : i32
    return %arg1, %c0_i32, %c0_i32_0, %c0_i32_1 : i32, i32, i32, i32
  }
  func.func @transform_17(%arg0: i32, %arg1: i32) -> (i32, i32, i32, i32) {
    %c0_i32 = arith.constant 0 : i32
    %c0_i32_0 = arith.constant 0 : i32
    %c0_i32_1 = arith.constant 0 : i32
    %c0_i32_2 = arith.constant 0 : i32
    return %arg1, %c0_i32, %c0_i32_0, %c0_i32_1 : i32, i32, i32, i32
  }
  func.func @transform_18(%arg0: i32, %arg1: i32) -> (i32, i32, i32, i32) {
    %c0_i32 = arith.constant 0 : i32
    %c0_i32_0 = arith.constant 0 : i32
    %c0_i32_1 = arith.constant 0 : i32
    %c0_i32_2 = arith.constant 0 : i32
    return %arg1, %c0_i32, %c0_i32_0, %c0_i32_1 : i32, i32, i32, i32
  }
  func.func @transform_19(%arg0: i32, %arg1: i32) -> (i32, i32, i32, i32) {
    %c0_i32 = arith.constant 0 : i32
    %c0_i32_0 = arith.constant 0 : i32
    %c0_i32_1 = arith.constant 0 : i32
    %c0_i32_2 = arith.constant 0 : i32
    return %arg1, %c0_i32, %c0_i32_0, %c0_i32_1 : i32, i32, i32, i32
  }
  func.func @transform_20(%arg0: i32, %arg1: i32) -> (i32, i32, i32, i32) {
    %c0_i32 = arith.constant 0 : i32
    %c0_i32_0 = arith.constant 0 : i32
    %c0_i32_1 = arith.constant 0 : i32
    %c0_i32_2 = arith.constant 0 : i32
    return %arg1, %c0_i32, %c0_i32_0, %c0_i32_1 : i32, i32, i32, i32
  }
  func.func @transform_21(%arg0: i32, %arg1: i32) -> (i32, i32, i32) {
    %c0_i32 = arith.constant 0 : i32
    %c0_i32_0 = arith.constant 0 : i32
    %c0_i32_1 = arith.constant 0 : i32
    return %arg1, %c0_i32, %c0_i32_0 : i32, i32, i32
  }
  func.func @transform_22(%arg0: i32, %arg1: i32) -> (i32, i32, i32) {
    %c0_i32 = arith.constant 0 : i32
    %c0_i32_0 = arith.constant 0 : i32
    %c0_i32_1 = arith.constant 0 : i32
    return %arg1, %c0_i32, %c0_i32_0 : i32, i32, i32
  }
  func.func @transform_23(%arg0: i32, %arg1: i32) -> (i32, i32, i32) {
    %c0_i32 = arith.constant 0 : i32
    %c0_i32_0 = arith.constant 0 : i32
    %c0_i32_1 = arith.constant 0 : i32
    return %arg1, %c0_i32, %c0_i32_0 : i32, i32, i32
  }
  func.func @transform_24(%arg0: i32, %arg1: i32) -> (i32, i32, i32) {
    %c0_i32 = arith.constant 0 : i32
    %c0_i32_0 = arith.constant 0 : i32
    %c0_i32_1 = arith.constant 0 : i32
    return %arg1, %c0_i32, %c0_i32_0 : i32, i32, i32
  }
  func.func @transform_25(%arg0: i32, %arg1: i32) -> (i32, i32, i32) {
    %c0_i32 = arith.constant 0 : i32
    %c0_i32_0 = arith.constant 0 : i32
    %c0_i32_1 = arith.constant 0 : i32
    return %arg1, %c0_i32, %c0_i32_0 : i32, i32, i32
  }
  func.func @transform_26(%arg0: i32, %arg1: i32) -> (i32, i32, i32) {
    %c0_i32 = arith.constant 0 : i32
    %c0_i32_0 = arith.constant 0 : i32
    %c0_i32_1 = arith.constant 0 : i32
    return %arg1, %c0_i32, %c0_i32_0 : i32, i32, i32
  }
  func.func @transform_27(%arg0: i32, %arg1: i32) -> (i32, i32, i32) {
    %c0_i32 = arith.constant 0 : i32
    %c0_i32_0 = arith.constant 0 : i32
    %c0_i32_1 = arith.constant 0 : i32
    return %arg1, %c0_i32, %c0_i32_0 : i32, i32, i32
  }
  func.func @transform_28(%arg0: i32, %arg1: i32) -> (i32, i32, i32) {
    %c0_i32 = arith.constant 0 : i32
    %c0_i32_0 = arith.constant 0 : i32
    %c0_i32_1 = arith.constant 0 : i32
    return %arg1, %c0_i32, %c0_i32_0 : i32, i32, i32
  }
  func.func @transform_29(%arg0: i32, %arg1: i32) -> (i32, i32, i32) {
    %c0_i32 = arith.constant 0 : i32
    %c0_i32_0 = arith.constant 0 : i32
    %c0_i32_1 = arith.constant 0 : i32
    return %arg1, %c0_i32, %c0_i32_0 : i32, i32, i32
  }
  func.func @transform_30(%arg0: i32, %arg1: i32) -> (i32, i32, i32) {
    %c0_i32 = arith.constant 0 : i32
    %c0_i32_0 = arith.constant 0 : i32
    %c0_i32_1 = arith.constant 0 : i32
    return %arg0, %c0_i32, %c0_i32_0 : i32, i32, i32
  }
}

</mosaic_0001>

<bundles_post_ra>
// kernel: transformer_forward.5
= control target key start
LH: loop header
LB: loop body
LE: loop exit
PB: predicated region body
PF: predicated region fallthrough
CT: control target
= control target key end

     0   :  { %v111_v0 = vmov 0.0   ;;  %vm112_vm0 = vmmov 0   ;;  %vm41_vm1 = vcmask 261120   ;;  %s154_s1 = inlined_call_operand.vmem [shape: bf16[32,128], index: 1, kind: input, shape index: {}]   ;;  %s155_s0 = inlined_call_operand.vmem [shape: f32[16,32], index: 0, kind: input, shape index: {}]   ;;  %s156_s2 = inlined_call_operand.vmem [shape: f32[1,128], index: 2, kind: input, shape index: {}]   ;;  %s157_s3 = inlined_call_operand.vmem [shape: f32[16,128], index: 3, kind: output, shape index: {}]  }
   0x1   :  { %99 = vmatprep.subr.bf16.mxu0 %v111_v0  ;;  %v109_v1 = vld [vmem:[%s154_s1] sm:$0xff]   ;;  %103 = vmatprep.mubr.msk.bf16.mxu0 %vm112_vm0, %v111_v0  ;;  %v110_v2 = vld [vmem:[%s154_s1 + $0x8] sm:$0xff]  }
   0x2   :  { %100 = vmatpush3.bf16.msra.mxu0 %v109_v1  ;;  %v15_v3 = vld [vmem:[%s155_s0] sm:$0xff]  ;;  %v16_v4 = vld [vmem:[%s155_s0 + $0x8] sm:$0xff] }
   0x3   :  { %101 = vmatprep.subr.bf16.mxu0 %v111_v0  ;;  %v17_v5 = vpack.c.bf16 %v16_v4, %v15_v3  ;;  %v92_v6 = vld [vmem:[%s156_s2] ss:$0 sm:$0xff] }
   0x6   :  { %102 = vmatpush3.bf16.msra.mxu0 %v110_v2 }
   0x9   :  { %104 = vmatmul.mubr.msk.bf16.vlgmr.msra.gmra.mrb[0].mxu0 %vm41_vm1, %v17_v5 }
  0xdc   :  { %v79_v7 = vpop.f32.mrb[0].mxu0 }
  0xdd   :  { %v80_v8 = vadd.f32 %v92_v6, %v79_v7  ;;  %v105_v9 = vpop.f32.mrb[1].mxu0 }
  0xde   :  { %v82_v10 = vpop.f32.mrb[2].mxu0 }
  0xdf   :  { %86 = vst [vmem:[%s157_s3] sm:$0xff] %v80_v8  ;;  %v83_v11 = vadd.f32 %v92_v6, %v82_v10  ;;  %v106_v12 = vpop.f32.mrb[3].mxu0 }
  0xe1   :  { %87 = vst [vmem:[%s157_s3 + $0x8] sm:$0xff] %v83_v11 }

// kernel: transformer_forward.3
= control target key start
LH: loop header
LB: loop body
LE: loop exit
PB: predicated region body
PF: predicated region fallthrough
CT: control target
= control target key end

     0   :  { %s3332_s27 = smov 0   ;;  %s3334_s28 = smov 0   ;;  %s3738_s0 = inlined_call_operand.vmem [shape: f32[2,8,32], index: 0, kind: input, shape index: {}]   ;;  %s3739_s1 = inlined_call_operand.vmem [shape: f32[2,1,8], index: 1, kind: input, shape index: {}]   ;;  %s3740_s2 = inlined_call_operand.vmem [shape: bf16[2,4,32,8], index: 2, kind: input, shape index: {}]   ;;  %s3741_s3 = inlined_call_operand.vmem [shape: f32[2,4,1,8], index: 3, kind: input, shape index: {}]   ;;  %s3742_s4 = inlined_call_operand.vmem [shape: bf16[2,4,32,8], index: 4, kind: input, shape index: {}]   ;;  %s3743_s5 = inlined_call_operand.vmem [shape: f32[2,4,1,8], index: 5, kind: input, shape index: {}]   ;;  %s3744_s6 = inlined_call_operand.vmem [shape: bf16[2,4,32,8], index: 6, kind: input, shape index: {}]   ;;  %s3745_s7 = inlined_call_operand.vmem [shape: f32[2,4,1,8], index: 7, kind: input, shape index: {}]   ;;  %s3746_s8 = inlined_call_operand.vmem [shape: bf16[2,4,8,32], index: 8, kind: input, shape index: {}]   ;;  %s3747_s9 = inlined_call_operand.vmem [shape: f32[2,1,32], index: 9, kind: input, shape index: {}]   ;;  %s3748_s10 = inlined_call_operand.vmem [shape: f32[2,1,32], index: 10, kind: input, shape index: {}]   ;;  %s3749_s11 = inlined_call_operand.vmem [shape: f32[2,1,32], index: 11, kind: input, shape index: {}]   ;;  %s3750_s12 = inlined_call_operand.vmem [shape: bf16[2,32,64], index: 12, kind: input, shape index: {}]   ;;  %s3751_s13 = inlined_call_operand.vmem [shape: f32[2,1,64], index: 13, kind: input, shape index: {}]   ;;  %s3752_s14 = inlined_call_operand.vmem [shape: bf16[2,64,32], index: 14, kind: input, shape index: {}]   ;;  %s3753_s15 = inlined_call_operand.vmem [shape: f32[2,1,32], index: 15, kind: input, shape index: {}]   ;;  %s3754_s16 = inlined_call_operand.vmem [shape: f32[2,1,32], index: 16, kind: input, shape index: {}]   ;;  %s3755_s17 = inlined_call_operand.vmem [shape: f32[2,1,32], index: 17, kind: input, shape index: {}]   ;;  %s3756_s18 = inlined_call_operand.vmem [shape: f32[2,8,32], index: 18, kind: output, shape index: {}]  }
   0x1   :  { %3764 = sst [smem:[#allocation12_spill]] %s3738_s0  ;;  %s3336_s29 = smov 0  }
   0x2   :  { %3765 = sst [smem:[#allocation13_spill]] %s3739_s1  ;;  %s3338_s30 = smov 0  }
   0x3   :  { %3766 = sst [smem:[#allocation14_spill]] %s3740_s2  ;;  %s3340_s0 = smov 0  }
   0x4   :  { %3767 = sst [smem:[#allocation15_spill]] %s3741_s3 }
   0x5   :  { %3768 = sst [smem:[#allocation16_spill]] %s3742_s4 }
   0x6   :  { %3769 = sst [smem:[#allocation17_spill]] %s3743_s5 }
   0x7   :  { %3770 = sst [smem:[#allocation18_spill]] %s3744_s6 }
   0x8   :  { %3771 = sst [smem:[#allocation19_spill]] %s3745_s7 }
   0x9   :  { %3772 = sst [smem:[#allocation20_spill]] %s3746_s8 }
   0xa   :  { %3773 = sst [smem:[#allocation21_spill]] %s3748_s10 }
   0xb   :  { %3774 = sst [smem:[#allocation22_spill]] %s3749_s11 }
   0xc   :  { %3775 = sst [smem:[#allocation23_spill]] %s3750_s12 }
   0xd   :  { %3776 = sst [smem:[#allocation24_spill]] %s3751_s13 }
   0xe   :  { %3777 = sst [smem:[#allocation25_spill]] %s3752_s14 }
   0xf   :  { %3778 = sst [smem:[#allocation26_spill]] %s3754_s16 }
  0x10   :  { %3779 = sst [smem:[#allocation27_spill]] %s3755_s17 }
  0x11   :  { %3780 = sst [smem:[#allocation28_spill]] %s3756_s18 }
  0x12 LB: > { %3781 = sst [smem:[#allocation3_spill]] %s3217_s27  ;;  %s37_s19 = sadd.s32 1, %s3225_s29  ;;  %s3233_s0 = sphi %s3340_s0, %s28_s0   ;;  %s3229_s30 = sphi %s3338_s30, %s3826_s30   ;;  %s3225_s29 = sphi %s3336_s29, %s3825_s29   ;;  %s3221_s28 = sphi %s3334_s28, %s3824_s28   ;;  %s3217_s27 = sphi %s3332_s27, %s3823_s27  }
  0x13   : > { %3782 = sst [smem:[#allocation4_spill]] %s3225_s29  ;;  %s40_s1 = sadd.s32 1, %s3229_s30 }
  0x14   : > { %3783 = sst [smem:[#allocation5_spill]] %s3229_s30  ;;  %p38_p0 = scmp.ge.s32.totalorder %s37_s19, 2 }
  0x15   : > { %3784 = sst [smem:[#allocation6_spill]] %s3233_s0  ;;  %p2745_p1 = scmp.ge.s32.totalorder %s3233_s0, 1 }
  0x16   : > { %p674_p2 = scmp.lt.s32.totalorder %s3233_s0, 5  ;;  %s3828_s19 = smov (%p38_p0, %s37_s19), 0 }
  0x17   : > { %3785 = sst [smem:[#allocation7_spill]] %s3828_s19  ;;  %s3830_s1 = smov (!%p38_p0, %s40_s1), %s3229_s30 }
  0x18   : > { %p675_p3 = pnand %p2745_p1, %p674_p2  ;;  %p42_p4 = scmp.ge.s32.totalorder %s3830_s1, 2 }
  0x1a   : > { %s3832_s1 = smov (%p42_p4, %s3830_s1), 0  ;;  %678 = sbr.rel (%p675_p3) target bundleno = 2349 (0x92d), region = 92 }
  0x1b   : > { %3786 = sst [smem:[#allocation8_spill]] %s3832_s1 }
  0x21   : > { %p792_p5 = scmp.lt.s32.totalorder %s3221_s28, 1  ;;  %p799_p6 = scmp.lt.s32.totalorder %s3217_s27, 1 }
  0x22   : > { %s3789_s1 = sld [smem:[#allocation12_spill]]  ;;  %s3791_s3 = sld [smem:[#allocation15_spill]] }
  0x23   : > { %s3834_s28 = smov (!%p792_p5, %s3221_s28), 1  ;;  %s3793_s4 = sld [smem:[#allocation16_spill]] }
  0x24   : > { %3787 = sst [smem:[#allocation9_spill]] %s3834_s28  ;;  %s2746_s21 = sshll.u32 %s3834_s28, 3 }
  0x25   : > { %s3368_s20 = scalar_select %p799_p6, %s3217_s27, 1 }
  0x26   : > { %s3790_s27 = sld [smem:[#allocation14_spill]]  ;;  %s3794_s5 = sld [smem:[#allocation17_spill]] }
  0x27   : > { %s2841_s30 = sshll.u32 %s3368_s20, 6  ;;  %s2749_s17 = sshll.u32 %s3368_s20, 2 }
  0x28   : > { %s795_s19 = scalar_lea.vmem %s3789_s1, %s2746_s21  ;;  %s3388_s22 = scalar_lea.vmem %s3791_s3, %s2749_s17 }
  0x29   : > { %3792 = sst [smem:[#allocation10_spill]] %s3388_s22  ;;  %s3393_s1 = scalar_lea.vmem %s3793_s4, %s2841_s30 }
  0x2a   : > { %s3796_s6 = sld [smem:[#allocation18_spill]]  ;;  %s3797_s7 = sld [smem:[#allocation19_spill]] }
  0x2b   : > { %s2844_s28 = sshll.u32 %s3368_s20, 4  ;;  %s3798_s8 = sld [smem:[#allocation20_spill]] }
  0x2c   : > { %s3382_s18 = scalar_lea.vmem %s3790_s27, %s2841_s30  ;;  %s3398_s29 = scalar_lea.vmem %s3794_s5, %s2749_s17 }
  0x2d   : > { %3795 = sst [smem:[#allocation11_spill]] %s3398_s29  ;;  %s3801_s12 = sld [smem:[#allocation23_spill]] }
  0x2e   : > { %s855_s26 = scalar_lea.vmem %s3753_s15, %s3368_s20  ;;  %s3804_s14 = sld [smem:[#allocation26_spill]] }
  0x2f   : > { %s3807_s22 = sld [smem:[#allocation3_spill]] }
  0x30   : > { %s3403_s24 = scalar_lea.vmem %s3796_s6, %s2841_s30  ;;  %s3408_s3 = scalar_lea.vmem %s3797_s7, %s2749_s17 }
  0x31   : > { %s3414_s4 = scalar_lea.vmem %s3798_s8, %s2844_s28  ;;  %s2846_s8 = sshll.u32 %s3368_s20, 5 }
  0x32   : > { %s3803_s30 = sld [smem:[#allocation25_spill]]  ;;  %s3806_s7 = sld [smem:[#allocation28_spill]] }
  0x33   : > { %s3431_s6 = scalar_lea.vmem %s3801_s12, %s2844_s28  ;;  %s3805_s12 = sld [smem:[#allocation27_spill]] }
  0x34   : > { %s858_s17 = scalar_lea.vmem %s3804_s14, %s3368_s20 }
  0x35   : > { %p2763_p7 = scmp.ne.s32.totalorder %s3807_s22, 0 }
  0x36   : > { %v871_v0 = vld [vmem:[%s795_s19] sm:$0xff] (!%p2763_p7)  ;;  %vm872_vm0 = vcmask (!%p2763_p7), 261120  }
  0x37   : > { %870 = sbr.rel (%p2763_p7) target bundleno = 62 (0x3e), region = 96  ;;  %873 = vst.msk [vmem:[#allocation2] sm:$0xff] (!%p2763_p7), %vm872_vm0, %v871_v0 }
  0x38   : > { %s3445_s10 = scalar_lea.vmem %s3803_s30, %s2846_s8  ;;  %s3458_s13 = scalar_lea.vmem %s3806_s7, %s2746_s21 }
  0x39   : > { %s861_s11 = scalar_lea.vmem %s3805_s12, %s3368_s20 }
  0x3e PF: > { %v3145_v1 = vld [vmem:[%s3382_s18] sm:$0xff]   ;;  %v3235_v2 = vmov 0.0   ;;  %v3146_v3 = vld [vmem:[%s3382_s18 + $0x10] sm:$0xff]   ;;  %v3147_v4 = vld [vmem:[%s3382_s18 + $0x8] sm:$0xff]   ;;  %vm3236_vm1 = vmmov 0   ;;  %vm980_vm2 = vcmask 261120  }
  0x3f   : > { %2915 = vmatprep.subr.bf16.mxu0 %v3235_v2  ;;  %2923 = vmatprep.subr.bf16.mxu1 %v3235_v2  ;;  %v3148_v5 = vld [vmem:[%s3382_s18 + $0x18] sm:$0xff]   ;;  %v3473_v6 = vld [vmem:[#allocation2] sm:$0xff]  ;;  %v3150_v9 = vld [vmem:[%s3382_s18 + $0x30] sm:$0xff]   ;;  %s3808_s7 = sld [smem:[#allocation11_spill]]  ;;  %s3809_s8 = sld [smem:[#allocation10_spill]]  ;;  %vm1658_vm3 = vcmask 64512  }
  0x40   : > { %2916 = vmatpush3.bf16.msra.mxu0 %v3145_v1  ;;  %2919 = vmatprep.mubr.msk.bf16.mxu0 %vm3236_vm1, %v3235_v2  ;;  %v3477_v7 = vpack.c.bf16 %v3473_v6, %v3473_v6  ;;  %v3149_v8 = vld [vmem:[%s3382_s18 + $0x20] sm:$0xff]   ;;  %v3151_v10 = vld [vmem:[%s3382_s18 + $0x28] sm:$0xff]   ;;  %v3152_v11 = vld [vmem:[%s3382_s18 + $0x38] sm:$0xff]   ;;  %vm1898_vm4 = vcmask 1043456   ;;  %s3810_s12 = sld [smem:[#allocation9_spill]]  ;;  %s3811_s21 = sld [smem:[#allocation13_spill]] }
  0x41   : > { %2924 = vmatpush3.bf16.msra.mxu1 %v3146_v3  ;;  %2917 = vmatprep.subr.bf16.mxu0 %v3235_v2  ;;  %v3153_v12 = vld [vmem:[%s3393_s1] sm:$0xff]   ;;  %v3154_v13 = vld [vmem:[%s3393_s1 + $0x10] sm:$0xff]   ;;  %v3155_v14 = vld [vmem:[%s3393_s1 + $0x8] sm:$0xff]   ;;  %s3814_s14 = sld [smem:[#allocation21_spill]]  ;;  %s3816_s27 = sld [smem:[#allocation22_spill]]  ;;  %vm2421_vm6 = vcmask 523264  }
  0x42   : > { %2925 = vmatprep.subr.bf16.mxu1 %v3235_v2  ;;  %2927 = vmatprep.mubr.msk.bf16.mxu1 %vm3236_vm1, %v3235_v2  ;;  %v3156_v15 = vld [vmem:[%s3393_s1 + $0x18] sm:$0xff]   ;;  %v3157_v16 = vld [vmem:[%s3393_s1 + $0x20] sm:$0xff]   ;;  %v3158_v17 = vld [vmem:[%s3393_s1 + $0x30] sm:$0xff]   ;;  %s3818_s2 = sld [smem:[#allocation24_spill]] }
  0x43   : > { %v3159_v18 = vld [vmem:[%s3393_s1 + $0x28] sm:$0xff]   ;;  %v3160_v19 = vld [vmem:[%s3393_s1 + $0x38] sm:$0xff]   ;;  %v3161_v20 = vld [vmem:[%s3403_s24] sm:$0xff]   ;;  %s3813_s1 = scalar_lea.vmem %s3747_s9, %s3368_s20 }
  0x44   : > { %2918 = vmatpush3.bf16.msra.mxu0 %v3147_v4  ;;  %v3162_v21 = vld [vmem:[%s3403_s24 + $0x10] sm:$0xff]   ;;  %v3163_v22 = vld [vmem:[%s3403_s24 + $0x8] sm:$0xff]   ;;  %v3164_v23 = vld [vmem:[%s3403_s24 + $0x18] sm:$0xff]  }
  0x45   : > { %2926 = vmatpush3.bf16.msra.mxu1 %v3148_v5  ;;  %2931 = vmatprep.subr.bf16.mxu0 %v3235_v2  ;;  %v3165_v24 = vld [vmem:[%s3403_s24 + $0x20] sm:$0xff]   ;;  %v3166_v25 = vld [vmem:[%s3403_s24 + $0x30] sm:$0xff]   ;;  %v3167_v26 = vld [vmem:[%s3403_s24 + $0x28] sm:$0xff]  }
  0x46   : > { %2939 = vmatprep.subr.bf16.mxu1 %v3235_v2  ;;  %v3168_v27 = vld [vmem:[%s3403_s24 + $0x38] sm:$0xff]   ;;  %v2780_v44 = vld [vmem:[%s3808_s7] ss:$0 sm:$0xff]  ;;  %v2781_v45 = vld [vmem:[%s3808_s7 + $0x1] ss:$0 sm:$0xff]  ;;  %s3812_s24 = scalar_lea.vmem %s3811_s21, %s3810_s12 }
  0x47   : > { %2920 = vmatmul.mubr.msk.bf16.vlgmr.msra.gmra.mrb[0].mxu0 %vm980_vm2, %v3477_v7  ;;  %v2764_v56 = vld [vmem:[%s3809_s8] ss:$0 sm:$0xff]  ;;  %v2765_v59 = vld [vmem:[%s3809_s8 + $0x1] ss:$0 sm:$0xff]  ;;  %v2782_v62 = vld [vmem:[%s3808_s7 + $0x2] ss:$0 sm:$0xff]  ;;  %s3815_s25 = scalar_lea.vmem %s3814_s14, %s3368_s20  ;;  %s3817_s0 = scalar_lea.vmem %s3816_s27, %s3368_s20 }
  0x48   : > { %2928 = vmatmul.mubr.msk.bf16.vlgmr.msra.gmra.mrb[0].mxu1 %vm980_vm2, %v3477_v7  ;;  %2932 = vmatpush3.bf16.msra.mxu0 %v3149_v8  ;;  %v2783_v0 = vld [vmem:[%s3808_s7 + $0x3] ss:$0 sm:$0xff]  ;;  %s3819_s23 = scalar_lea.vmem %s3818_s2, %s3368_s20 }
  0x49   : > { %2940 = vmatpush3.bf16.msra.mxu1 %v3150_v9  ;;  %2933 = vmatprep.subr.bf16.mxu0 %v3235_v2 }
  0x4a   : > { %2941 = vmatprep.subr.bf16.mxu1 %v3235_v2  ;;  %2935 = vmatprep.mubr.msk.bf16.mxu0 %vm3236_vm1, %v3235_v2 }
  0x4b   : > { %2943 = vmatprep.mubr.msk.bf16.mxu1 %vm3236_vm1, %v3235_v2 }
  0x4c   : > { %2934 = vmatpush3.bf16.msra.mxu0 %v3151_v10 }
  0x4d   : > { %2942 = vmatpush3.bf16.msra.mxu1 %v3152_v11  ;;  %2947 = vmatprep.subr.bf16.mxu0 %v3235_v2 }
  0x4e   : > { %2955 = vmatprep.subr.bf16.mxu1 %v3235_v2 }
  0x4f   : > { %2936 = vmatmul.mubr.msk.bf16.vlgmr.msra.gmra.mrb[4].mxu0 %vm980_vm2, %v3477_v7 }
  0x50   : > { %2944 = vmatmul.mubr.msk.bf16.vlgmr.msra.gmra.mrb[4].mxu1 %vm980_vm2, %v3477_v7  ;;  %2948 = vmatpush3.bf16.msra.mxu0 %v3153_v12 }
  0x51   : > { %2956 = vmatpush3.bf16.msra.mxu1 %v3154_v13  ;;  %2949 = vmatprep.subr.bf16.mxu0 %v3235_v2 }
  0x52   : > { %2957 = vmatprep.subr.bf16.mxu1 %v3235_v2  ;;  %2951 = vmatprep.mubr.msk.bf16.mxu0 %vm3236_vm1, %v3235_v2 }
  0x53   : > { %2959 = vmatprep.mubr.msk.bf16.mxu1 %vm3236_vm1, %v3235_v2 }
  0x54   : > { %2950 = vmatpush3.bf16.msra.mxu0 %v3155_v14 }
  0x55   : > { %2958 = vmatpush3.bf16.msra.mxu1 %v3156_v15  ;;  %2963 = vmatprep.subr.bf16.mxu0 %v3235_v2 }
  0x56   : > { %2971 = vmatprep.subr.bf16.mxu1 %v3235_v2 }
  0x57   : > { %2952 = vmatmul.mubr.msk.bf16.vlgmr.msra.gmra.mrb[8].mxu0 %vm980_vm2, %v3477_v7 }
  0x58   : > { %2960 = vmatmul.mubr.msk.bf16.vlgmr.msra.gmra.mrb[8].mxu1 %vm980_vm2, %v3477_v7  ;;  %2964 = vmatpush3.bf16.msra.mxu0 %v3157_v16  ;;  %v2766_v16 = vld [vmem:[%s3809_s8 + $0x2] ss:$0 sm:$0xff] }
  0x59   : > { %2972 = vmatpush3.bf16.msra.mxu1 %v3158_v17  ;;  %2965 = vmatprep.subr.bf16.mxu0 %v3235_v2 }
  0x5a   : > { %2973 = vmatprep.subr.bf16.mxu1 %v3235_v2  ;;  %2967 = vmatprep.mubr.msk.bf16.mxu0 %vm3236_vm1, %v3235_v2 }
  0x5b   : > { %2975 = vmatprep.mubr.msk.bf16.mxu1 %vm3236_vm1, %v3235_v2 }
  0x5c   : > { %2966 = vmatpush3.bf16.msra.mxu0 %v3159_v18 }
  0x5d   : > { %2974 = vmatpush3.bf16.msra.mxu1 %v3160_v19  ;;  %2979 = vmatprep.subr.bf16.mxu0 %v3235_v2  ;;  %v2767_v19 = vld [vmem:[%s3809_s8 + $0x3] ss:$0 sm:$0xff] }
  0x5e   : > { %2987 = vmatprep.subr.bf16.mxu1 %v3235_v2 }
  0x5f   : > { %2968 = vmatmul.mubr.msk.bf16.vlgmr.msra.gmra.mrb[12].mxu0 %vm980_vm2, %v3477_v7 }
  0x60   : > { %2976 = vmatmul.mubr.msk.bf16.vlgmr.msra.gmra.mrb[12].mxu1 %vm980_vm2, %v3477_v7  ;;  %2980 = vmatpush3.bf16.msra.mxu0 %v3161_v20 }
  0x61   : > { %2981 = vmatprep.subr.bf16.mxu0 %v3235_v2  ;;  %2983 = vmatprep.mubr.msk.bf16.mxu0 %vm3236_vm1, %v3235_v2 }
  0x62   : > { %2991 = vmatprep.mubr.msk.bf16.mxu1 %vm3236_vm1, %v3235_v2  ;;  %2988 = vmatpush3.bf16.msra.mxu1 %v3162_v21 }
  0x63   : > { %2989 = vmatprep.subr.bf16.mxu1 %v3235_v2 }
  0x64   : > { %2982 = vmatpush3.bf16.msra.mxu0 %v3163_v22 }
  0x65   : > { %2995 = vmatprep.subr.bf16.mxu0 %v3235_v2 }
  0x66   : > { %2990 = vmatpush3.bf16.msra.mxu1 %v3164_v23 }
  0x67   : > { %2984 = vmatmul.mubr.msk.bf16.vlgmr.msra.gmra.mrb[16].mxu0 %vm980_vm2, %v3477_v7  ;;  %3003 = vmatprep.subr.bf16.mxu1 %v3235_v2 }
  0x68   : > { %2999 = vmatprep.mubr.msk.bf16.mxu0 %vm3236_vm1, %v3235_v2  ;;  %2996 = vmatpush3.bf16.msra.mxu0 %v3165_v24 }
  0x69   : > { %2992 = vmatmul.mubr.msk.bf16.vlgmr.msra.gmra.mrb[16].mxu1 %vm980_vm2, %v3477_v7  ;;  %2997 = vmatprep.subr.bf16.mxu0 %v3235_v2 }
  0x6a   : > { %3004 = vmatpush3.bf16.msra.mxu1 %v3166_v25  ;;  %3007 = vmatprep.mubr.msk.bf16.mxu1 %vm3236_vm1, %v3235_v2 }
  0x6b   : > { %3005 = vmatprep.subr.bf16.mxu1 %v3235_v2 }
  0x6c   : > { %2998 = vmatpush3.bf16.msra.mxu0 %v3167_v26  ;;  %v2796_v26 = vld [vmem:[%s3408_s3] ss:$0 sm:$0xff] }
  0x6d   : > { %3011 = vmatprep.subr.bf16.mxu0 %v3235_v2 }
  0x6e   : > { %3006 = vmatpush3.bf16.msra.mxu1 %v3168_v27 }
  0x6f   : > { %3017 = vmatprep.subr.bf16.mxu1 %v3235_v2  ;;  %3000 = vmatmul.mubr.msk.bf16.vlgmr.msra.gmra.mrb[20].mxu0 %vm980_vm2, %v3477_v7 }
  0x70   : > { %3013 = vmatprep.mubr.msk.bf16.mxu0 %vm3236_vm1, %v3235_v2 }
  0x71   : > { %3008 = vmatmul.mubr.msk.bf16.vlgmr.msra.gmra.mrb[20].mxu1 %vm980_vm2, %v3477_v7 }
  0x72   : > { %3019 = vmatprep.mubr.msk.bf16.mxu1 %vm3236_vm1, %v3235_v2 }
 0x11a   : > { %v1018_v28 = vpop.f32.mrb[0].mxu0 }
 0x11b   : > { %v2921_v29 = vpop.f32.mrb[1].mxu0  ;;  %v1070_v30 = vpop.f32.mrb[0].mxu1  ;;  %v1019_v63 = vadd.f32 %v2764_v56, %v1018_v28  ;;  %v2797_v28 = vld [vmem:[%s3408_s3 + $0x1] ss:$0 sm:$0xff] }
 0x11c   : > { %v1021_v31 = vpop.f32.mrb[2].mxu0  ;;  %v2929_v32 = vpop.f32.mrb[1].mxu1  ;;  %v1071_v1 = vadd.f32 %v2765_v59, %v1070_v30 }
 0x11d   : > { %v2922_v33 = vpop.f32.mrb[3].mxu0  ;;  %v1073_v34 = vpop.f32.mrb[2].mxu1  ;;  %v1644_v11 = vpack.c.bf16 %v1019_v63, %v1019_v63 }
 0x11e   : > { %v2930_v35 = vpop.f32.mrb[3].mxu1  ;;  %v1645_v15 = vpack.c.bf16 %v1071_v1, %v1071_v1 }
 0x122   : > { %v1122_v36 = vpop.f32.mrb[4].mxu0 }
 0x123   : > { %v2937_v37 = vpop.f32.mrb[5].mxu0  ;;  %v1174_v38 = vpop.f32.mrb[4].mxu1  ;;  %v1123_v22 = vadd.f32 %v2766_v16, %v1122_v36 }
 0x124   : > { %v1125_v39 = vpop.f32.mrb[6].mxu0  ;;  %v2945_v40 = vpop.f32.mrb[5].mxu1  ;;  %v1175_v23 = vadd.f32 %v2767_v19, %v1174_v38 }
 0x125   : > { %v2938_v41 = vpop.f32.mrb[7].mxu0  ;;  %v1177_v42 = vpop.f32.mrb[6].mxu1  ;;  %v1646_v24 = vpack.c.bf16 %v1123_v22, %v1123_v22 }
 0x126   : > { %v2946_v43 = vpop.f32.mrb[7].mxu1  ;;  %v1647_v25 = vpack.c.bf16 %v1175_v23, %v1175_v23 }
 0x12a   : > { %v1250_v46 = vpop.f32.mrb[8].mxu0 }
 0x12b   : > { %v1251_v47 = vadd.f32 %v2780_v44, %v1250_v46  ;;  %v1302_v48 = vpop.f32.mrb[8].mxu1  ;;  %v2953_v49 = vpop.f32.mrb[9].mxu0 }
 0x12c   : > { %v1303_v50 = vadd.f32 %v2781_v45, %v1302_v48  ;;  %v1253_v51 = vpop.f32.mrb[10].mxu0  ;;  %v2961_v52 = vpop.f32.mrb[9].mxu1 }
 0x12d   : > { %v1648_v53 = vpack.c.bf16 %v1251_v47, %v1251_v47  ;;  %v2954_v54 = vpop.f32.mrb[11].mxu0  ;;  %v1305_v55 = vpop.f32.mrb[10].mxu1  ;;  %v875_v51 = vld [vmem:[%s3812_s24] sm:$0x1] }
 0x12e   : > { %v1649_v57 = vpack.c.bf16 %v1303_v50, %v1303_v50  ;;  %v2962_v58 = vpop.f32.mrb[11].mxu1  ;;  %v1653_v50 = vlaneseq  ;;  %vm876_vm5 = vcmp.gt.f32.partialorder %v875_v51, 0.5 }
 0x12f   : > { %v1663_v60 = vsel %vm1658_vm3, %v1648_v53, 0  ;;  %v877_v54 = vsel %vm876_vm5, -1e+09, %v3235_v2 }
 0x130   : > { %v1709_v61 = vsel %vm1658_vm3, %v1649_v57, 0  ;;  %3012 = vmatpush3.bf16.xpose.msra.mxu0 %v1663_v60  ;;  %v1654_v52 = vshrl.u32 %v1653_v50, 7 }
 0x131   : > { %3018 = vmatpush3.bf16.xpose.msra.mxu1 %v1709_v61  ;;  %3023 = vmatprep.subr.bf16.mxu0 %v3235_v2 }
 0x132   : > { %v1354_v3 = vpop.f32.mrb[12].mxu0  ;;  %3029 = vmatprep.subr.bf16.mxu1 %v3235_v2  ;;  %v1655_v53 = vsub.s32 0, %v1654_v52 }
 0x133   : > { %v1355_v4 = vadd.f32 %v2782_v62, %v1354_v3  ;;  %v1406_v5 = vpop.f32.mrb[12].mxu1  ;;  %v2969_v7 = vpop.f32.mrb[13].mxu0 }
 0x134   : > { %v1407_v8 = vadd.f32 %v2783_v0, %v1406_v5  ;;  %v1357_v9 = vpop.f32.mrb[14].mxu0  ;;  %v2977_v10 = vpop.f32.mrb[13].mxu1  ;;  %v1656_v55 = vrot.slane %v877_v54, %v1655_v53 }
 0x135   : > { %v1650_v12 = vpack.c.bf16 %v1355_v4, %v1355_v4  ;;  %v2970_v13 = vpop.f32.mrb[15].mxu0  ;;  %v1409_v14 = vpop.f32.mrb[14].mxu1 }
 0x136   : > { %v1651_v17 = vpack.c.bf16 %v1407_v8, %v1407_v8  ;;  %v2978_v18 = vpop.f32.mrb[15].mxu1 }
 0x137   : > { %v1755_v20 = vsel %vm1658_vm3, %v1650_v12, 0  ;;  %3014 = vmatmul.mubr.msk.bf16.vlgmr.msra.gmra.mrb[24].mxu0 %vm1658_vm3, %v1644_v11 }
 0x138   : > { %v1801_v21 = vsel %vm1658_vm3, %v1651_v17, 0  ;;  %3020 = vmatmul.mubr.msk.bf16.vlgmr.msra.gmra.mrb[24].mxu1 %vm1658_vm3, %v1645_v15  ;;  %3024 = vmatpush3.bf16.xpose.msra.mxu0 %v1755_v20 }
 0x139   : > { %3030 = vmatpush3.bf16.xpose.msra.mxu1 %v1801_v21  ;;  %3025 = vmatprep.mubr.msk.bf16.mxu0 %vm3236_vm1, %v3235_v2 }
 0x13a   : > { %3031 = vmatprep.mubr.msk.bf16.mxu1 %vm3236_vm1, %v3235_v2  ;;  %3035 = vmatprep.subr.bf16.mxu0 %v3235_v2  ;;  %v1482_v27 = vpop.f32.mrb[16].mxu0 }
 0x13b   : > { %3041 = vmatprep.subr.bf16.mxu1 %v3235_v2  ;;  %v1483_v29 = vadd.f32 %v2796_v26, %v1482_v27  ;;  %v2985_v30 = vpop.f32.mrb[17].mxu0 }
 0x13c   : > { %v1485_v31 = vpop.f32.mrb[18].mxu0  ;;  %v1534_v32 = vpop.f32.mrb[16].mxu1 }
 0x13d   : > { %v1891_v33 = vpack.c.bf16 %v1483_v29, %v1483_v29  ;;  %v2986_v34 = vpop.f32.mrb[19].mxu0  ;;  %v1535_v35 = vadd.f32 %v2797_v28, %v1534_v32  ;;  %v2993_v36 = vpop.f32.mrb[17].mxu1 }
 0x13e   : > { %v1537_v37 = vpop.f32.mrb[18].mxu1 }
 0x13f   : > { %3026 = vmatmul.mubr.msk.bf16.vlgmr.msra.gmra.mrb[28].mxu0 %vm1658_vm3, %v1646_v24  ;;  %v1900_v38 = vsel %vm1898_vm4, %v1891_v33, 0  ;;  %v1892_v39 = vpack.c.bf16 %v1535_v35, %v1535_v35  ;;  %v2994_v40 = vpop.f32.mrb[19].mxu1 }
 0x140   : > { %3032 = vmatmul.mubr.msk.bf16.vlgmr.msra.gmra.mrb[28].mxu1 %vm1658_vm3, %v1647_v25  ;;  %3037 = vmatprep.mubr.msk.bf16.mxu0 %vm3236_vm1, %v3235_v2  ;;  %v2798_v40 = vld [vmem:[%s3408_s3 + $0x2] ss:$0 sm:$0xff] }
 0x141   : > { %3043 = vmatprep.mubr.msk.bf16.mxu1 %vm3236_vm1, %v3235_v2  ;;  %3036 = vmatpush3.bf16.msra.mxu0 %v1900_v38  ;;  %v1946_v41 = vsel %vm1898_vm4, %v1892_v39, 0 }
 0x142   : > { %3047 = vmatprep.subr.bf16.mxu0 %v3235_v2  ;;  %3042 = vmatpush3.bf16.msra.mxu1 %v1946_v41  ;;  %v3603_v42 = vpop.f32.mrb[20].mxu0 }
 0x143   : > { %3053 = vmatprep.subr.bf16.mxu1 %v3235_v2  ;;  %v3001_v44 = vpop.f32.mrb[21].mxu0  ;;  %v1587_v41 = vadd.f32 %v2798_v40, %v3603_v42 }
 0x144   : > { %v3605_v43 = vpop.f32.mrb[20].mxu1  ;;  %v1589_v46 = vpop.f32.mrb[22].mxu0 }
 0x145   : > { %v3009_v45 = vpop.f32.mrb[21].mxu1  ;;  %v3002_v48 = vpop.f32.mrb[23].mxu0 }
 0x146   : > { %v1641_v47 = vpop.f32.mrb[22].mxu1  ;;  %v2799_v45 = vld [vmem:[%s3408_s3 + $0x3] ss:$0 sm:$0xff] }
 0x147   : > { %v3010_v49 = vpop.f32.mrb[23].mxu1  ;;  %v1893_v47 = vpack.c.bf16 %v1587_v41, %v1587_v41  ;;  %v1639_v48 = vadd.f32 %v2799_v45, %v3605_v43  ;;  %v938_v43 = vld [vmem:[%s3414_s4] sm:$0xf] }
 0x149   : > { %v1992_v53 = vsel %vm1898_vm4, %v1893_v47, 0  ;;  %v1894_v54 = vpack.c.bf16 %v1639_v48, %v1639_v48  ;;  %v2824_v48 = vld [vmem:[%s3813_s1] ss:$0 sm:$0xff] }
 0x20a   : > { %v1699_v56 = vpop.f32.mrb[24].mxu0 }
 0x20b   : > { %v1700_v57 = vadd.f32 %v1699_v56, %v1656_v55  ;;  %v1745_v58 = vpop.f32.mrb[24].mxu1  ;;  %v3015_v59 = vpop.f32.mrb[25].mxu0 }
 0x20c   : > { %v3021_v60 = vpop.f32.mrb[25].mxu1  ;;  %v1702_v61 = vpop.f32.mrb[26].mxu0  ;;  %v1746_v62 = vadd.f32 %v1745_v58, %v1656_v55 }
 0x20d   : > { %v1748_v63 = vpop.f32.mrb[26].mxu1  ;;  %v3016_v0 = vpop.f32.mrb[27].mxu0  ;;  %v1843_v1 = vsel %vm1658_vm3, %v1700_v57, -inf  ;;  %v2088_v60 = vsel %vm1898_vm4, %v938_v43, 0 }
 0x20e   : > { %v3022_v3 = vpop.f32.mrb[27].mxu1  ;;  %1844 = vmax.xlane.f32.xlu0 %v1843_v1  ;;  %v1846_v4 = vsel %vm1658_vm3, %v1746_v62, -inf  ;;  %v939_v0 = vld [vmem:[%s3414_s4 + $0x4] sm:$0xf] }
 0x20f   : > { %v2134_v1 = vsel %vm1898_vm4, %v939_v0, 0  ;;  %v940_v3 = vld [vmem:[%s3414_s4 + $0x8] sm:$0xf] }
 0x212   : > { %1847 = vmax.xlane.f32.xlu0 %v1846_v4  ;;  %v1791_v5 = vpop.f32.mrb[28].mxu0 }
 0x213   : > { %v1837_v7 = vpop.f32.mrb[28].mxu1  ;;  %v1792_v8 = vadd.f32 %v1791_v5, %v1656_v55  ;;  %v3027_v9 = vpop.f32.mrb[29].mxu0 }
 0x214   : > { %v3033_v10 = vpop.f32.mrb[29].mxu1  ;;  %v1794_v11 = vpop.f32.mrb[30].mxu0  ;;  %v1838_v12 = vadd.f32 %v1837_v7, %v1656_v55 }
 0x215   : > { %v1840_v13 = vpop.f32.mrb[30].mxu1  ;;  %v3028_v14 = vpop.f32.mrb[31].mxu0  ;;  %v1849_v15 = vsel %vm1658_vm3, %v1792_v8, -inf  ;;  %v941_v10 = vld [vmem:[%s3414_s4 + $0xc] sm:$0xf] }
 0x216   : > { %v3034_v16 = vpop.f32.mrb[31].mxu1  ;;  %1850 = vmax.xlane.f32.xlu1 %v1849_v15  ;;  %v1852_v17 = vsel %vm1658_vm3, %v1838_v12, -inf  ;;  %v2226_v15 = vsel %vm1898_vm4, %v941_v10, 0 }
 0x21a   : > { %1853 = vmax.xlane.f32.xlu1 %v1852_v17 }
 0x29b   : > { %v1845_v18 = vpop.xlane.xlu0 %1844 }
 0x29c   : > { %v1855_v19 = vsub.f32 %v1700_v57, %v1845_v18  ;;  %v2038_v57 = vsel %vm1898_vm4, %v1894_v54, 0 }
 0x29e   : > { %v1859_v20 = vmul.f32 1.442695, %v1855_v19 }
 0x29f   : > { %v1848_v21 = vpop.xlane.xlu0 %1847 }
 0x2a0   : > { %3175 = vpow2.f32 %v1859_v20  ;;  %v1856_v22 = vsub.f32 %v1746_v62, %v1848_v21 }
 0x2a2   : > { %v1861_v23 = vmul.f32 1.442695, %v1856_v22 }
 0x2a3   : > { %v1851_v24 = vpop.xlane.xlu1 %1850 }
 0x2a4   : > { %3177 = vpow2.f32 %v1861_v23  ;;  %v1857_v25 = vsub.f32 %v1792_v8, %v1851_v24  ;;  %v2180_v8 = vsel %vm1898_vm4, %v940_v3, 0 }
 0x2a6   : > { %v1863_v26 = vmul.f32 1.442695, %v1857_v25 }
 0x2a7   : > { %v1854_v27 = vpop.xlane.xlu1 %1853 }
 0x2a8   : > { %3179 = vpow2.f32 %v1863_v26  ;;  %v1858_v28 = vsub.f32 %v1838_v12, %v1854_v27 }
 0x2aa   : > { %v3176_v29 = vpop.eup %3175  ;;  %v1865_v30 = vmul.f32 1.442695, %v1858_v28 }
 0x2ab   : > { %v1867_v31 = vsel %vm1658_vm3, %v3176_v29, 0.0 }
 0x2ac   : > { %3181 = vpow2.f32 %v1865_v30  ;;  %1868 = vadd.xlane.f32.xlu0 %v1867_v31 }
 0x2ae   : > { %v3178_v32 = vpop.eup %3177 }
 0x2af   : > { %v1870_v33 = vsel %vm1658_vm3, %v3178_v32, 0.0 }
 0x2b0   : > { %1871 = vadd.xlane.f32.xlu1 %v1870_v33 }
 0x2b2   : > { %v3180_v34 = vpop.eup %3179 }
 0x2b3   : > { %v1873_v35 = vsel %vm1658_vm3, %v3180_v34, 0.0 }
 0x2b4   : > { %1874 = vadd.xlane.f32.xlu0 %v1873_v35 }
 0x2b6   : > { %v3182_v36 = vpop.eup %3181 }
 0x2b7   : > { %v1876_v37 = vsel %vm1658_vm3, %v3182_v36, 0.0 }
 0x2b8   : > { %1877 = vadd.xlane.f32.xlu1 %v1876_v37 }
 0x339   : > { %v1869_v38 = vpop.xlane.xlu0 %1868 }
 0x33a   : > { %3183 = vrcp.f32 %v1869_v38 }
 0x33d   : > { %v1872_v39 = vpop.xlane.xlu1 %1871 }
 0x33e   : > { %3185 = vrcp.f32 %v1872_v39 }
 0x341   : > { %v1875_v44 = vpop.xlane.xlu0 %1874 }
 0x342   : > { %3187 = vrcp.f32 %v1875_v44 }
 0x344   : > { %v3184_v46 = vpop.eup %3183 }
 0x345   : > { %v1883_v49 = vmul.f32 %v3184_v46, %v3176_v29  ;;  %v1878_v50 = vpop.xlane.xlu1 %1877 }
 0x346   : > { %3189 = vrcp.f32 %v1878_v50 }
 0x347   : > { %v1887_v51 = vpack.c.bf16 %v1883_v49, %v1883_v49 }
 0x348   : > { %v3186_v52 = vpop.eup %3185 }
 0x349   : > { %v1884_v55 = vmul.f32 %v3186_v52, %v3178_v32  ;;  %3038 = vmatmul.mubr.msk.bf16.vlgmr.msra.gmra.mrb[32].mxu0 %vm1658_vm3, %v1887_v51 }
 0x34a   : > { %3048 = vmatpush3.bf16.msra.mxu0 %v1992_v53  ;;  %3049 = vmatprep.mubr.msk.bf16.mxu0 %vm3236_vm1, %v3235_v2 }
 0x34b   : > { %v1888_v42 = vpack.c.bf16 %v1884_v55, %v1884_v55  ;;  %3059 = vmatprep.subr.bf16.mxu0 %v3235_v2 }
 0x34c   : > { %v3188_v56 = vpop.eup %3187 }
 0x34d   : > { %v1885_v58 = vmul.f32 %v3188_v56, %v3180_v34  ;;  %3044 = vmatmul.mubr.msk.bf16.vlgmr.msra.gmra.mrb[32].mxu1 %vm1658_vm3, %v1888_v42 }
 0x34e   : > { %3054 = vmatpush3.bf16.msra.mxu1 %v2038_v57  ;;  %3055 = vmatprep.mubr.msk.bf16.mxu1 %vm3236_vm1, %v3235_v2 }
 0x34f   : > { %v1889_v59 = vpack.c.bf16 %v1885_v58, %v1885_v58  ;;  %3065 = vmatprep.subr.bf16.mxu1 %v3235_v2 }
 0x350   : > { %v3190_v61 = vpop.eup %3189 }
 0x351   : > { %v1886_v62 = vmul.f32 %v3190_v61, %v3182_v36  ;;  %3050 = vmatmul.mubr.msk.bf16.vlgmr.msra.gmra.mrb[36].mxu0 %vm1658_vm3, %v1889_v59  ;;  %v3170_v61 = vld [vmem:[%s3431_s6 + $0x8] sm:$0xff]  }
 0x352   : > { %3060 = vmatpush3.bf16.msra.mxu0 %v2088_v60  ;;  %3061 = vmatprep.mubr.msk.bf16.mxu0 %vm3236_vm1, %v3235_v2  ;;  %v3169_v60 = vld [vmem:[%s3431_s6] sm:$0xff]  }
 0x353   : > { %v1890_v63 = vpack.c.bf16 %v1886_v62, %v1886_v62  ;;  %3071 = vmatprep.subr.bf16.mxu0 %v3235_v2  ;;  %v3172_v62 = vld [vmem:[%s3445_s10 + $0x8] sm:$0xff]  }
 0x355   : > { %3056 = vmatmul.mubr.msk.bf16.vlgmr.msra.gmra.mrb[36].mxu1 %vm1658_vm3, %v1890_v63 }
 0x356   : > { %3067 = vmatprep.mubr.msk.bf16.mxu1 %vm3236_vm1, %v3235_v2  ;;  %3066 = vmatpush3.bf16.msra.mxu1 %v2134_v1 }
 0x357   : > { %3077 = vmatprep.subr.bf16.mxu1 %v3235_v2 }
 0x41c   : > { %v1936_v4 = vpop.f32.mrb[32].mxu0 }
 0x41d   : > { %v2080_v5 = vpack.c.bf16 %v1936_v4, %v1936_v4  ;;  %v3039_v7 = vpop.f32.mrb[33].mxu0  ;;  %v2825_v4 = vld [vmem:[%s3815_s25] ss:$0 sm:$0xff] }
 0x41e   : > { %v1939_v9 = vpop.f32.mrb[34].mxu0  ;;  %v2826_v7 = vld [vmem:[%s3817_s0] ss:$0 sm:$0xff] }
 0x41f   : > { %v3040_v11 = vpop.f32.mrb[35].mxu0  ;;  %3062 = vmatmul.mubr.msk.bf16.vlgmr.msra.gmra.mrb[40].mxu0 %vm1658_vm3, %v2080_v5 }
 0x420   : > { %v1982_v12 = vpop.f32.mrb[32].mxu1  ;;  %3072 = vmatpush3.bf16.msra.mxu0 %v2180_v8  ;;  %3073 = vmatprep.mubr.msk.bf16.mxu0 %vm3236_vm1, %v3235_v2  ;;  %v3173_v11 = vld [vmem:[%s3445_s10 + $0x10] sm:$0xff]  }
 0x421   : > { %v2081_v13 = vpack.c.bf16 %v1982_v12, %v1982_v12  ;;  %v3045_v14 = vpop.f32.mrb[33].mxu1  ;;  %3083 = vmatprep.subr.bf16.mxu0 %v3235_v2  ;;  %v3174_v12 = vld [vmem:[%s3445_s10 + $0x18] sm:$0xff]  }
 0x422   : > { %v1985_v16 = vpop.f32.mrb[34].mxu1 }
 0x423   : > { %v3046_v17 = vpop.f32.mrb[35].mxu1  ;;  %3068 = vmatmul.mubr.msk.bf16.vlgmr.msra.gmra.mrb[40].mxu1 %vm1658_vm3, %v2081_v13  ;;  %v2827_v13 = vld [vmem:[%s3819_s23] ss:$0 sm:$0xff] }
 0x424   : > { %v2028_v18 = vpop.f32.mrb[36].mxu0  ;;  %3078 = vmatpush3.bf16.msra.mxu1 %v2226_v15  ;;  %3079 = vmatprep.mubr.msk.bf16.mxu1 %vm3236_vm1, %v3235_v2 }
 0x425   : > { %v2082_v19 = vpack.c.bf16 %v2028_v18, %v2028_v18  ;;  %v3051_v20 = vpop.f32.mrb[37].mxu0  ;;  %3091 = vmatprep.subr.bf16.mxu1 %v3235_v2 }
 0x426   : > { %v2031_v21 = vpop.f32.mrb[38].mxu0 }
 0x427   : > { %v3052_v22 = vpop.f32.mrb[39].mxu0  ;;  %3074 = vmatmul.mubr.msk.bf16.vlgmr.msra.gmra.mrb[44].mxu0 %vm1658_vm3, %v2082_v19 }
 0x428   : > { %v2074_v23 = vpop.f32.mrb[36].mxu1  ;;  %3087 = vmatprep.mubr.msk.bf16.mxu0 %vm3236_vm1, %v3235_v2  ;;  %3084 = vmatpush3.bf16.msra.mxu0 %v3169_v60 }
 0x429   : > { %v2083_v24 = vpack.c.bf16 %v2074_v23, %v2074_v23  ;;  %v3057_v25 = vpop.f32.mrb[37].mxu1  ;;  %3085 = vmatprep.subr.bf16.mxu0 %v3235_v2 }
 0x42a   : > { %v2077_v26 = vpop.f32.mrb[38].mxu1 }
 0x42b   : > { %v3058_v27 = vpop.f32.mrb[39].mxu1  ;;  %3080 = vmatmul.mubr.msk.bf16.vlgmr.msra.gmra.mrb[44].mxu1 %vm1658_vm3, %v2083_v24 }
 0x42c   : > { %3099 = vmatprep.mubr.msk.bf16.mxu1 %vm3236_vm1, %v3235_v2  ;;  %3086 = vmatpush3.bf16.msra.mxu0 %v3170_v61 }
 0x4f2   : > { %v2124_v28 = vpop.f32.mrb[40].mxu0 }
 0x4f3   : > { %v3063_v29 = vpop.f32.mrb[41].mxu0  ;;  %v2268_v33 = vsel %vm980_vm2, %v2124_v28, 0.0 }
 0x4f4   : > { %v2127_v30 = vpop.f32.mrb[42].mxu0 }
 0x4f5   : > { %v3064_v31 = vpop.f32.mrb[43].mxu0 }
 0x4f6   : > { %v2170_v32 = vpop.f32.mrb[40].mxu1 }
 0x4f7   : > { %v2269_v34 = vsel %vm980_vm2, %v2170_v32, 0.0  ;;  %v3069_v35 = vpop.f32.mrb[41].mxu1 }
 0x4f8   : > { %v2270_v36 = vadd.f32 %v2269_v34, %v2268_v33  ;;  %v2173_v37 = vpop.f32.mrb[42].mxu1 }
 0x4f9   : > { %v3070_v38 = vpop.f32.mrb[43].mxu1  ;;  %v2837_v37 = vld [vmem:[%s858_s17] ss:$0 sm:$0xff] }
 0x4fa   : > { %v2216_v39 = vpop.f32.mrb[44].mxu0 }
 0x4fb   : > { %v2271_v40 = vsel %vm980_vm2, %v2216_v39, 0.0  ;;  %v3075_v41 = vpop.f32.mrb[45].mxu0  ;;  %v2838_v39 = vld [vmem:[%s861_s11] ss:$0 sm:$0xff] }
 0x4fc   : > { %v2272_v44 = vadd.f32 %v2271_v40, %v2270_v36  ;;  %v2219_v45 = vpop.f32.mrb[46].mxu0 }
 0x4fd   : > { %v3076_v46 = vpop.f32.mrb[47].mxu0 }
 0x4fe   : > { %v2262_v47 = vpop.f32.mrb[44].mxu1 }
 0x4ff   : > { %v2273_v49 = vsel %vm980_vm2, %v2262_v47, 0.0  ;;  %v3081_v50 = vpop.f32.mrb[45].mxu1 }
 0x500   : > { %v2274_v51 = vadd.f32 %v2273_v49, %v2272_v44  ;;  %v2265_v52 = vpop.f32.mrb[46].mxu1 }
 0x501   : > { %v3082_v53 = vpop.f32.mrb[47].mxu1 }
 0x502   : > { %v2281_v54 = vadd.f32 %v2824_v48, %v2274_v51 }
 0x504   : > { %v2284_v55 = vadd.f32 %v2281_v54, %v3473_v6  ;;  %v3171_v6 = vld [vmem:[%s3445_s10] sm:$0xff]  }
 0x505   : > { %3092 = vmatpush3.bf16.msra.mxu1 %v3171_v6 }
 0x506   : > { %v2285_v42 = vsel %vm980_vm2, %v2284_v55, 0.0  ;;  %3093 = vmatprep.subr.bf16.mxu1 %v3235_v2 }
 0x507   : > { %2286 = vadd.xlane.f32.xlu0 %v2285_v42 }
 0x509   : > { %3094 = vmatpush3.bf16.msra.mxu1 %v3172_v62 }
 0x50a   : > { %3095 = vmatprep.subr.bf16.mxu1 %v3235_v2 }
 0x50d   : > { %3096 = vmatpush3.bf16.msra.mxu1 %v3173_v11 }
 0x50e   : > { %3097 = vmatprep.subr.bf16.mxu1 %v3235_v2  ;;  %v2831_v2 = vld [vmem:[%s855_s26] ss:$0 sm:$0xff] }
 0x511   : > { %3098 = vmatpush3.bf16.msra.mxu1 %v3174_v12 }
 0x594   : > { %v2287_v56 = vpop.xlane.xlu0 %2286 }
 0x595   : > { %v2289_v43 = vmul.f32 0.03125, %v2287_v56 }
 0x597   : > { %v2290_v57 = vsub.f32 %v2284_v55, %v2289_v43 }
 0x599   : > { %v2291_v58 = vmul.f32 %v2290_v57, %v2290_v57 }
 0x59b   : > { %v2292_v59 = vsel %vm980_vm2, %v2291_v58, 0.0 }
 0x59c   : > { %2293 = vadd.xlane.f32.xlu1 %v2292_v59 }
 0x629   : > { %v2294_v63 = vpop.xlane.xlu1 %2293 }
 0x62a   : > { %v2295_v0 = vmul.f32 0.03125, %v2294_v63 }
 0x62c   : > { %v2296_v1 = vadd.f32 1e-05, %v2295_v0 }
 0x62e   : > { %3191 = vrsqrt.f32 %v2296_v1 }
 0x638   : > { %v3192_v3 = vpop.eup %3191 }
 0x639   : > { %v2298_v5 = vmul.f32 %v3192_v3, %v2290_v57 }
 0x63b   : > { %v2305_v8 = vmul.f32 %v2825_v4, %v2298_v5 }
 0x63d   : > { %v2312_v9 = vadd.f32 %v2826_v7, %v2305_v8 }
 0x63f   : > { %v2318_v10 = vpack.c.bf16 %v2312_v9, %v2312_v9 }
 0x641   : > { %3088 = vmatmul.mubr.msk.bf16.vlgmr.msra.gmra.mrb[48].mxu0 %vm980_vm2, %v2318_v10 }
 0x714   : > { %v2374_v14 = vpop.f32.mrb[48].mxu0 }
 0x715   : > { %v2375_v15 = vadd.f32 %v2827_v13, %v2374_v14  ;;  %v3089_v16 = vpop.f32.mrb[49].mxu0 }
 0x716   : > { %v2377_v17 = vpop.f32.mrb[50].mxu0 }
 0x717   : > { %v2380_v18 = vmax.f32 %v2375_v15, 0.0  ;;  %v3090_v19 = vpop.f32.mrb[51].mxu0 }
 0x719   : > { %v2390_v20 = vpack.c.bf16 %v2380_v18, %v2380_v18 }
 0x71b   : > { %3100 = vmatmul.mubr.msk.bf16.vlgmr.msra.gmra.mrb[48].mxu1 %vm2421_vm6, %v2390_v20 }
 0x7ee   : > { %v2459_v21 = vpop.f32.mrb[48].mxu1 }
 0x7ef   : > { %v2460_v22 = vadd.f32 %v2831_v2, %v2459_v21  ;;  %v3101_v23 = vpop.f32.mrb[49].mxu1 }
 0x7f0   : > { %v2462_v24 = vpop.f32.mrb[50].mxu1 }
 0x7f1   : > { %v3102_v25 = vpop.f32.mrb[51].mxu1  ;;  %v2467_v26 = vadd.f32 %v2460_v22, %v2312_v9 }
 0x7f3   : > { %v2468_v27 = vsel %vm980_vm2, %v2467_v26, 0.0 }
 0x7f4   : > { %2469 = vadd.xlane.f32.xlu0 %v2468_v27 }
 0x881   : > { %v2470_v28 = vpop.xlane.xlu0 %2469 }
 0x882   : > { %v2471_v29 = vmul.f32 0.03125, %v2470_v28 }
 0x884   : > { %v2472_v30 = vsub.f32 %v2467_v26, %v2471_v29 }
 0x886   : > { %v2473_v31 = vmul.f32 %v2472_v30, %v2472_v30 }
 0x888   : > { %v2474_v32 = vsel %vm980_vm2, %v2473_v31, 0.0 }
 0x889   : > { %2475 = vadd.xlane.f32.xlu1 %v2474_v32 }
 0x916   : > { %v2476_v33 = vpop.xlane.xlu1 %2475 }
 0x917   : > { %v2477_v34 = vmul.f32 0.03125, %v2476_v33 }
 0x919   : > { %v2478_v35 = vadd.f32 1e-05, %v2477_v34 }
 0x91b   : > { %3193 = vrsqrt.f32 %v2478_v35 }
 0x925   : > { %v3194_v36 = vpop.eup %3193 }
 0x926   : > { %v2480_v38 = vmul.f32 %v3194_v36, %v2472_v30 }
 0x928   : > { %v2487_v40 = vmul.f32 %v2837_v37, %v2480_v38 }
 0x92a   : > { %v2494_v41 = vadd.f32 %v2838_v39, %v2487_v40 }
 0x92c   : > { %2495 = vst.msk [vmem:[#allocation2] sm:$0xff] %vm980_vm2, %v2494_v41  ;;  %2496 = vst.msk [vmem:[%s3458_s13] sm:$0xff] %vm980_vm2, %v2494_v41 }
 0x92d PF: > { %s3822_s21 = sld [smem:[#allocation6_spill]]  ;;  %s3823_s27 = sld [smem:[#allocation4_spill]] }
 0x92e   : > { %s3824_s28 = sld [smem:[#allocation5_spill]]  ;;  %s3825_s29 = sld [smem:[#allocation7_spill]] }
 0x92f   : > { %s3826_s30 = sld [smem:[#allocation8_spill]] }
 0x933   : > { %s28_s0 = sadd.s32 1, %s3822_s21  }
 0x934   : > { %p25_p8 = scmp.ge.s32.totalorder %s28_s0, 6  }
 0x936   :  { %27 = sbr.rel (!%p25_p8) target bundleno = 18 (0x12), region = 177 }

// kernel: transformer_forward.4
= control target key start
LH: loop header
LB: loop body
LE: loop exit
PB: predicated region body
PF: predicated region fallthrough
CT: control target
= control target key end

     0   :  { %s5781_s6 = smov 1   ;;  %s5782_s10 = smov 2   ;;  %s6573_s0 = inlined_call_operand.smem [shape: u32[31], index: -1, kind: input, shape index: {}] }
   0x1   :  { %s5821_s5 = sld [smem:[%s6573_s0]]   ;;  %s5783_s14 = smov 3  }
   0x2   :  { %s5826_s9 = sld [smem:[%s6573_s0 + %s5781_s6]]   ;;  %s5784_s18 = smov 4  }
   0x3   :  { %s5831_s13 = sld [smem:[%s6573_s0 + %s5782_s10]]   ;;  %s5785_s22 = smov 5  }
   0x4   :  { %s5836_s17 = sld [smem:[%s6573_s0 + %s5783_s14]]   ;;  %s5786_s26 = smov 6  }
   0x5   :  { %s5841_s21 = sld [smem:[%s6573_s0 + %s5784_s18]]   ;;  %s5787_s30 = smov 7  }
   0x6   :  { %s5846_s25 = sld [smem:[%s6573_s0 + %s5785_s22]]   ;;  %s5788_s4 = smov 8  }
   0x7   :  { %6591 = sst [smem:[#allocation3_spill]] %s5821_s5  ;;  %s5789_s10 = smov 9  }
   0x8   :  { %6592 = sst [smem:[#allocation4_spill]] %s5826_s9  ;;  %s5790_s15 = smov 10  }
   0x9   :  { %6593 = sst [smem:[#allocation5_spill]] %s5831_s13  ;;  %s5791_s20 = smov 11  }
   0xa   :  { %6594 = sst [smem:[#allocation6_spill]] %s5836_s17  ;;  %s5793_s1 = smov 13  }
   0xb   :  { %6595 = sst [smem:[#allocation7_spill]] %s5841_s21  ;;  %s5794_s7 = smov 14  }
   0xc   :  { %6596 = sst [smem:[#allocation8_spill]] %s5846_s25  ;;  %s5796_s22 = smov 16  }
   0xd   :  { %s5851_s29 = sld [smem:[%s6573_s0 + %s5786_s26]]   ;;  %s5792_s26 = smov 12  }
   0xe   :  { %s5856_s3 = sld [smem:[%s6573_s0 + %s5787_s30]]   ;;  %s5797_s28 = smov 17  }
   0xf   :  { %s5861_s8 = sld [smem:[%s6573_s0 + %s5788_s4]]   ;;  %s5975_s16 = smov 0  }
  0x10   :  { %s5866_s14 = sld [smem:[%s6573_s0 + %s5789_s10]]   ;;  %s5977_s18 = smov 0  }
  0x11   :  { %s5871_s19 = sld [smem:[%s6573_s0 + %s5790_s15]]   ;;  %s5795_s15 = smov 15  }
  0x12   :  { %s5876_s24 = sld [smem:[%s6573_s0 + %s5791_s20]]   ;;  %s5981_s23 = smov 0  }
  0x13   :  { %6597 = sst [smem:[#allocation9_spill]] %s5851_s29 }
  0x14   :  { %6598 = sst [smem:[#allocation10_spill]] %s5856_s3 }
  0x15   :  { %6599 = sst [smem:[#allocation11_spill]] %s5861_s8 }
  0x16   :  { %6600 = sst [smem:[#allocation12_spill]] %s5866_s14 }
  0x17   :  { %6601 = sst [smem:[#allocation13_spill]] %s5871_s19 }
  0x18   :  { %6602 = sst [smem:[#allocation14_spill]] %s5876_s24 }
  0x19   :  { %s5881_s30 = sld [smem:[%s6573_s0 + %s5792_s26]]  }
  0x1a   :  { %s5886_s6 = sld [smem:[%s6573_s0 + %s5793_s1]]  }
  0x1b   :  { %s5891_s12 = sld [smem:[%s6573_s0 + %s5794_s7]]   ;;  %s5798_s7 = smov 18  }
  0x1c   :  { %s5896_s20 = sld [smem:[%s6573_s0 + %s5795_s15]]   ;;  %s5799_s15 = smov 19  }
  0x1d   :  { %s5901_s27 = sld [smem:[%s6573_s0 + %s5796_s22]]   ;;  %s5800_s22 = smov 20  }
  0x1e   :  { %s5906_s4 = sld [smem:[%s6573_s0 + %s5797_s28]]   ;;  %s5801_s28 = smov 21  }
  0x1f   :  { %6603 = sst [smem:[#allocation15_spill]] %s5881_s30 }
  0x20   :  { %6604 = sst [smem:[#allocation16_spill]] %s5886_s6 }
  0x21   :  { %6605 = sst [smem:[#allocation17_spill]] %s5891_s12 }
  0x22   :  { %6606 = sst [smem:[#allocation18_spill]] %s5896_s20 }
  0x23   :  { %6607 = sst [smem:[#allocation19_spill]] %s5901_s27 }
  0x24   :  { %6608 = sst [smem:[#allocation20_spill]] %s5906_s4 }
  0x25   :  { %s5911_s12 = sld [smem:[%s6573_s0 + %s5798_s7]]   ;;  %s5802_s7 = smov 22  }
  0x26   :  { %s5916_s20 = sld [smem:[%s6573_s0 + %s5799_s15]]   ;;  %s5803_s15 = smov 23  }
  0x27   :  { %s5921_s27 = sld [smem:[%s6573_s0 + %s5800_s22]]   ;;  %s5804_s22 = smov 24  }
  0x28   :  { %s5926_s4 = sld [smem:[%s6573_s0 + %s5801_s28]]   ;;  %s5805_s28 = smov 25  }
  0x2b   :  { %6609 = sst [smem:[#allocation21_spill]] %s5911_s12 }
  0x2c   :  { %6610 = sst [smem:[#allocation22_spill]] %s5916_s20 }
  0x2d   :  { %6611 = sst [smem:[#allocation23_spill]] %s5921_s27 }
  0x2e   :  { %6612 = sst [smem:[#allocation24_spill]] %s5926_s4 }
  0x2f   :  { %s5931_s12 = sld [smem:[%s6573_s0 + %s5802_s7]]   ;;  %s5806_s7 = smov 26  }
  0x30   :  { %s5936_s20 = sld [smem:[%s6573_s0 + %s5803_s15]]   ;;  %s5807_s15 = smov 27  }
  0x31   :  { %s5941_s27 = sld [smem:[%s6573_s0 + %s5804_s22]]   ;;  %s5808_s22 = smov 28  }
  0x32   :  { %s5946_s4 = sld [smem:[%s6573_s0 + %s5805_s28]]   ;;  %s5809_s28 = smov 29  }
  0x35   :  { %6613 = sst [smem:[#allocation25_spill]] %s5931_s12 }
  0x36   :  { %6614 = sst [smem:[#allocation26_spill]] %s5936_s20 }
  0x37   :  { %6615 = sst [smem:[#allocation27_spill]] %s5941_s27 }
  0x38   :  { %6616 = sst [smem:[#allocation28_spill]] %s5946_s4 }
  0x39   :  { %s5951_s12 = sld [smem:[%s6573_s0 + %s5806_s7]]   ;;  %s5810_s7 = smov 30  }
  0x3a   :  { %s5956_s20 = sld [smem:[%s6573_s0 + %s5807_s15]]   ;;  %s5973_s15 = smov 0  }
  0x3b   :  { %s5961_s27 = sld [smem:[%s6573_s0 + %s5808_s22]]   ;;  %s5979_s22 = smov 0  }
  0x3c   :  { %s5966_s4 = sld [smem:[%s6573_s0 + %s5809_s28]]  }
  0x3f   :  { %6617 = sst [smem:[#allocation29_spill]] %s5951_s12 }
  0x40   :  { %6618 = sst [smem:[#allocation30_spill]] %s5956_s20 }
  0x41   :  { %6619 = sst [smem:[#allocation31_spill]] %s5961_s27 }
  0x42   :  { %6620 = sst [smem:[#allocation32_spill]] %s5966_s4 }
  0x43   :  { %s5971_s12 = sld [smem:[%s6573_s0 + %s5810_s7]]  }
  0x49   :  { %6621 = sst [smem:[#allocation33_spill]] %s5971_s12 }
  0x4a LB: > { %6622 = sst [smem:[#allocation34_spill]] %s5763_s15  ;;  %s80_s0 = sadd.s32 1, %s5771_s18  ;;  %s5779_s23 = sphi %s5981_s23, %s71_s23   ;;  %s5775_s22 = sphi %s5979_s22, %s6710_s22   ;;  %s5771_s18 = sphi %s5977_s18, %s6709_s18   ;;  %s5767_s16 = sphi %s5975_s16, %s6708_s16   ;;  %s5763_s15 = sphi %s5973_s15, %s6707_s15  }
  0x4b   : > { %6623 = sst [smem:[#allocation35_spill]] %s5771_s18  ;;  %s83_s26 = sadd.s32 1, %s5775_s22 }
  0x4c   : > { %6624 = sst [smem:[#allocation36_spill]] %s5775_s22  ;;  %p81_p0 = scmp.ge.s32.totalorder %s80_s0, 2 }
  0x4d   : > { %6625 = sst [smem:[#allocation37_spill]] %s5779_s23  ;;  %p4912_p1 = scmp.ge.s32.totalorder %s5779_s23, 1 }
  0x4e   : > { %p1113_p2 = scmp.lt.s32.totalorder %s5779_s23, 5  ;;  %s6712_s0 = smov (%p81_p0, %s80_s0), 0 }
  0x4f   : > { %6626 = sst [smem:[#allocation38_spill]] %s6712_s0  ;;  %s6714_s26 = smov (!%p81_p0, %s83_s26), %s5775_s22 }
  0x50   : > { %p1114_p3 = pnand %p4912_p1, %p1113_p2  ;;  %p85_p4 = scmp.ge.s32.totalorder %s6714_s26, 2 }
  0x52   : > { %s6716_s26 = smov (%p85_p4, %s6714_s26), 0  ;;  %1117 = sbr.rel (%p1114_p3) target bundleno = 3961 (0xf79), region = 140 }
  0x53   : > { %6627 = sst [smem:[#allocation39_spill]] %s6716_s26 }
  0x59   : > { %p1303_p5 = scmp.lt.s32.totalorder %s5767_s16, 1  ;;  %s6632_s21 = sld [smem:[#allocation7_spill]] }
  0x5a   : > { %s6633_s25 = sld [smem:[#allocation8_spill]]  ;;  %s6634_s29 = sld [smem:[#allocation9_spill]] }
  0x5b   : > { %s6635_s3 = sld [smem:[#allocation10_spill]]  ;;  %s6636_s8 = sld [smem:[#allocation11_spill]] }
  0x5c   : > { %s6637_s14 = sld [smem:[#allocation12_spill]]  ;;  %p1317_p6 = scmp.lt.s32.totalorder %s5763_s15, 1 }
  0x5d   : > { %s6718_s16 = smov (!%p1303_p5, %s5767_s16), 1  ;;  %s6639_s19 = sld [smem:[#allocation13_spill]] }
  0x5e   : > { %6638 = sst [smem:[#allocation40_spill]] %s6718_s16  ;;  %s6012_s1 = sshll.u32 %s6718_s16, 3 }
  0x5f   : > { %s6009_s28 = scalar_select %p1317_p6, %s5763_s15, 1 }
  0x60   : > { %s6643_s10 = sld [smem:[#allocation17_spill]]  ;;  %s6644_s26 = sld [smem:[#allocation18_spill]] }
  0x61   : > { %s6645_s22 = sld [smem:[#allocation19_spill]]  ;;  %s5083_s18 = sshll.u32 %s6009_s28, 6 }
  0x62   : > { %s6646_s23 = sld [smem:[#allocation20_spill]]  ;;  %s6024_s15 = scalar_lea.vmem %s6632_s21, %s5083_s18 }
  0x63   : > { %6647 = sst [smem:[#allocation41_spill]] %s6024_s15  ;;  %s6648_s12 = sld [smem:[#allocation21_spill]] }
  0x64   : > { %s4917_s4 = sshll.u32 %s6009_s28, 2  ;;  %s6649_s27 = sld [smem:[#allocation22_spill]] }
  0x65   : > { %s6028_s20 = scalar_lea.vmem %s6633_s25, %s4917_s4  ;;  %s6651_s2 = sld [smem:[#allocation23_spill]] }
  0x66   : > { %6650 = sst [smem:[#allocation42_spill]] %s6028_s20  ;;  %s6031_s13 = scalar_lea.vmem %s6634_s29, %s5083_s18 }
  0x67   : > { %6652 = sst [smem:[#allocation43_spill]] %s6031_s13  ;;  %s6653_s5 = sld [smem:[#allocation24_spill]] }
  0x68   : > { %s6034_s7 = scalar_lea.vmem %s6635_s3, %s4917_s4  ;;  %s6655_s11 = sld [smem:[#allocation25_spill]] }
  0x69   : > { %6654 = sst [smem:[#allocation44_spill]] %s6034_s7  ;;  %s6037_s0 = scalar_lea.vmem %s6636_s8, %s5083_s18 }
  0x6a   : > { %6656 = sst [smem:[#allocation45_spill]] %s6037_s0  ;;  %s6657_s17 = sld [smem:[#allocation26_spill]] }
  0x6b   : > { %s6040_s21 = scalar_lea.vmem %s6637_s14, %s4917_s4  ;;  %s6659_s9 = sld [smem:[#allocation27_spill]] }
  0x6c   : > { %6658 = sst [smem:[#allocation46_spill]] %s6040_s21  ;;  %s5086_s16 = sshll.u32 %s6009_s28, 4 }
  0x6d   : > { %s6660_s25 = sld [smem:[#allocation28_spill]]  ;;  %s6044_s20 = scalar_lea.vmem %s6639_s19, %s5086_s16 }
  0x6e   : > { %6661 = sst [smem:[#allocation47_spill]] %s6044_s20  ;;  %s6662_s13 = sld [smem:[#allocation30_spill]] }
  0x6f   : > { %s6663_s7 = sld [smem:[#allocation29_spill]]  ;;  %s6664_s8 = sld [smem:[#allocation31_spill]] }
  0x70   : > { %s6053_s0 = scalar_lea.vmem %s6643_s10, %s5083_s18  ;;  %s6666_s14 = sld [smem:[#allocation32_spill]] }
  0x71   : > { %6665 = sst [smem:[#allocation48_spill]] %s6053_s0  ;;  %s6056_s21 = scalar_lea.vmem %s6644_s26, %s4917_s4 }
  0x72   : > { %6667 = sst [smem:[#allocation49_spill]] %s6056_s21  ;;  %s6059_s20 = scalar_lea.vmem %s6645_s22, %s5083_s18 }
  0x73   : > { %s6668_s19 = sld [smem:[#allocation33_spill]]  ;;  %6669 = sst [smem:[#allocation50_spill]] %s6059_s20 }
  0x74   : > { %s6062_s24 = scalar_lea.vmem %s6646_s23, %s4917_s4  ;;  %s6065_s29 = scalar_lea.vmem %s6648_s12, %s5083_s18 }
  0x75   : > { %6670 = sst [smem:[#allocation51_spill]] %s6062_s24  ;;  %s6068_s3 = scalar_lea.vmem %s6649_s27, %s4917_s4 }
  0x76   : > { %s6071_s30 = scalar_lea.vmem %s6651_s2, %s5086_s16  ;;  %s1392_s15 = scalar_lea.vmem %s6653_s5, %s6009_s28 }
  0x77   : > { %s1395_s6 = scalar_lea.vmem %s6655_s11, %s6009_s28  ;;  %s1398_s10 = scalar_lea.vmem %s6657_s17, %s6009_s28 }
  0x78   : > { %s6080_s0 = scalar_lea.vmem %s6659_s9, %s5086_s16  ;;  %s1406_s26 = scalar_lea.vmem %s6660_s25, %s6009_s28 }
  0x79   : > { %s5092_s21 = sshll.u32 %s6009_s28, 5  ;;  %s1414_s22 = scalar_lea.vmem %s6662_s13, %s6009_s28 }
  0x7a   : > { %s6088_s20 = scalar_lea.vmem %s6663_s7, %s5092_s21  ;;  %s1417_s23 = scalar_lea.vmem %s6664_s8, %s6009_s28 }
  0x7b   : > { %s1420_s24 = scalar_lea.vmem %s6666_s14, %s6009_s28  ;;  %s1424_s12 = scalar_lea.vmem %s6668_s19, %s6012_s1 }
  0x7c   : > { %s6671_s18 = sld [smem:[#allocation34_spill]] }
  0x82   : > { %p4942_p7 = scmp.ne.s32.totalorder %s6671_s18, 0 }
  0x83   : > { %s6672_s27 = sld [smem:[#allocation3_spill]] (!%p4942_p7)  ;;  %vm1431_vm0 = vcmask (!%p4942_p7), 261120  }
  0x84   : > { %1429 = sbr.rel (%p4942_p7) target bundleno = 140 (0x8c), region = 144 }
  0x89   : > { %s6673_s4 = scalar_lea.vmem (!%p4942_p7), %s6672_s27, %s6012_s1 }
  0x8a   : > { %v1430_v0 = vld [vmem:[%s6673_s4] sm:$0xff] (!%p4942_p7) }
  0x8b   : > { %1432 = vst.msk [vmem:[#allocation2] sm:$0xff] %vm1431_vm0, %v1430_v0 }
  0x8c PF: > { %s6674_s5 = sld [smem:[#allocation41_spill]]  ;;  %v5811_v2 = vmov 0.0   ;;  %vm5812_vm1 = vmmov 0   ;;  %vm1556_vm2 = vcmask 261120   ;;  %s6675_s9 = sld [smem:[#allocation43_spill]]  ;;  %vm2228_vm3 = vcmask 64512  }
  0x8d   : > { %5221 = vmatprep.subr.bf16.mxu0 %v5811_v2  ;;  %5229 = vmatprep.subr.bf16.mxu1 %v5811_v2  ;;  %s6676_s13 = sld [smem:[#allocation45_spill]]  ;;  %s6677_s17 = sld [smem:[#allocation44_spill]]  ;;  %vm2468_vm4 = vcmask 1043456   ;;  %vm4426_vm8 = vcmask 523264  }
  0x8e   : > { %5225 = vmatprep.mubr.msk.bf16.mxu0 %vm5812_vm1, %v5811_v2  ;;  %5233 = vmatprep.mubr.msk.bf16.mxu1 %vm5812_vm1, %v5811_v2  ;;  %s6678_s21 = sld [smem:[#allocation42_spill]]  ;;  %s6679_s25 = sld [smem:[#allocation46_spill]] }
  0x8f   : > { %s6680_s8 = sld [smem:[#allocation5_spill]]  ;;  %s6681_s14 = sld [smem:[#allocation40_spill]] }
  0x90   : > { %s6683_s16 = sld [smem:[#allocation47_spill]]  ;;  %s6684_s2 = sld [smem:[#allocation14_spill]] }
  0x91   : > { %s6686_s11 = sld [smem:[#allocation48_spill]]  ;;  %s6687_s18 = sld [smem:[#allocation15_spill]] }
  0x92   : > { %v5649_v1 = vld [vmem:[%s6674_s5] sm:$0xff]   ;;  %v5650_v3 = vld [vmem:[%s6674_s5 + $0x10] sm:$0xff]   ;;  %v5651_v4 = vld [vmem:[%s6674_s5 + $0x8] sm:$0xff]   ;;  %s6688_s27 = sld [smem:[#allocation16_spill]] }
  0x93   : > { %5222 = vmatpush3.bf16.msra.mxu0 %v5649_v1  ;;  %5230 = vmatpush3.bf16.msra.mxu1 %v5650_v3  ;;  %v5652_v5 = vld [vmem:[%s6674_s5 + $0x18] sm:$0xff]   ;;  %v6112_v6 = vld [vmem:[#allocation2] sm:$0xff]  ;;  %v5654_v9 = vld [vmem:[%s6674_s5 + $0x30] sm:$0xff]  }
  0x94   : > { %5223 = vmatprep.subr.bf16.mxu0 %v5811_v2  ;;  %5231 = vmatprep.subr.bf16.mxu1 %v5811_v2  ;;  %v6116_v7 = vpack.c.bf16 %v6112_v6, %v6112_v6  ;;  %v5653_v8 = vld [vmem:[%s6674_s5 + $0x20] sm:$0xff]   ;;  %v5655_v10 = vld [vmem:[%s6674_s5 + $0x28] sm:$0xff]   ;;  %v5656_v11 = vld [vmem:[%s6674_s5 + $0x38] sm:$0xff]  }
  0x95   : > { %v5657_v12 = vld [vmem:[%s6675_s9] sm:$0xff]   ;;  %v5658_v13 = vld [vmem:[%s6675_s9 + $0x10] sm:$0xff]   ;;  %v5659_v14 = vld [vmem:[%s6675_s9 + $0x8] sm:$0xff]   ;;  %s6682_s19 = scalar_lea.vmem %s6680_s8, %s6681_s14 }
  0x96   : > { %v5660_v15 = vld [vmem:[%s6675_s9 + $0x18] sm:$0xff]   ;;  %v5661_v16 = vld [vmem:[%s6675_s9 + $0x20] sm:$0xff]   ;;  %v5662_v17 = vld [vmem:[%s6675_s9 + $0x30] sm:$0xff]   ;;  %s6685_s7 = scalar_lea.vmem %s6684_s2, %s6009_s28 }
  0x97   : > { %5224 = vmatpush3.bf16.msra.mxu0 %v5651_v4  ;;  %5232 = vmatpush3.bf16.msra.mxu1 %v5652_v5  ;;  %v5663_v18 = vld [vmem:[%s6675_s9 + $0x28] sm:$0xff]   ;;  %v5664_v19 = vld [vmem:[%s6675_s9 + $0x38] sm:$0xff]   ;;  %v5665_v20 = vld [vmem:[%s6676_s13] sm:$0xff]   ;;  %s6689_s4 = scalar_lea.vmem %s6687_s18, %s6009_s28  ;;  %s6691_s9 = sld [smem:[#allocation50_spill]] }
  0x98   : > { %5237 = vmatprep.subr.bf16.mxu0 %v5811_v2  ;;  %5245 = vmatprep.subr.bf16.mxu1 %v5811_v2  ;;  %v5666_v21 = vld [vmem:[%s6676_s13 + $0x10] sm:$0xff]   ;;  %v5667_v22 = vld [vmem:[%s6676_s13 + $0x8] sm:$0xff]   ;;  %v5668_v23 = vld [vmem:[%s6676_s13 + $0x18] sm:$0xff]   ;;  %s6690_s5 = scalar_lea.vmem %s6688_s27, %s6009_s28 }
  0x99   : > { %v5669_v24 = vld [vmem:[%s6676_s13 + $0x20] sm:$0xff]   ;;  %v5670_v25 = vld [vmem:[%s6676_s13 + $0x30] sm:$0xff]   ;;  %v5671_v26 = vld [vmem:[%s6676_s13 + $0x28] sm:$0xff]  }
  0x9a   : > { %5226 = vmatmul.mubr.msk.bf16.vlgmr.msra.gmra.mrb[0].mxu0 %vm1556_vm2, %v6116_v7  ;;  %5234 = vmatmul.mubr.msk.bf16.vlgmr.msra.gmra.mrb[0].mxu1 %vm1556_vm2, %v6116_v7  ;;  %v5672_v27 = vld [vmem:[%s6676_s13 + $0x38] sm:$0xff]   ;;  %v4959_v44 = vld [vmem:[%s6677_s17] ss:$0 sm:$0xff]  ;;  %v4960_v45 = vld [vmem:[%s6677_s17 + $0x1] ss:$0 sm:$0xff]  ;;  %s6692_s13 = sld [smem:[#allocation4_spill]] }
  0x9b   : > { %5238 = vmatpush3.bf16.msra.mxu0 %v5653_v8  ;;  %5246 = vmatpush3.bf16.msra.mxu1 %v5654_v9  ;;  %v4943_v56 = vld [vmem:[%s6678_s21] ss:$0 sm:$0xff]  ;;  %v4944_v59 = vld [vmem:[%s6678_s21 + $0x1] ss:$0 sm:$0xff]  ;;  %v4961_v62 = vld [vmem:[%s6677_s17 + $0x2] ss:$0 sm:$0xff] }
  0x9c   : > { %5239 = vmatprep.subr.bf16.mxu0 %v5811_v2  ;;  %5247 = vmatprep.subr.bf16.mxu1 %v5811_v2  ;;  %v4962_v0 = vld [vmem:[%s6677_s17 + $0x3] ss:$0 sm:$0xff] }
  0x9d   : > { %5241 = vmatprep.mubr.msk.bf16.mxu0 %vm5812_vm1, %v5811_v2  ;;  %5249 = vmatprep.mubr.msk.bf16.mxu1 %vm5812_vm1, %v5811_v2 }
  0x9f   : > { %5240 = vmatpush3.bf16.msra.mxu0 %v5655_v10  ;;  %5248 = vmatpush3.bf16.msra.mxu1 %v5656_v11 }
  0xa0   : > { %5253 = vmatprep.subr.bf16.mxu0 %v5811_v2  ;;  %5261 = vmatprep.subr.bf16.mxu1 %v5811_v2  ;;  %s6693_s17 = scalar_lea.vmem %s6692_s13, %s6012_s1 }
  0xa2   : > { %5242 = vmatmul.mubr.msk.bf16.vlgmr.msra.gmra.mrb[4].mxu0 %vm1556_vm2, %v6116_v7  ;;  %5250 = vmatmul.mubr.msk.bf16.vlgmr.msra.gmra.mrb[4].mxu1 %vm1556_vm2, %v6116_v7 }
  0xa3   : > { %5254 = vmatpush3.bf16.msra.mxu0 %v5657_v12  ;;  %5262 = vmatpush3.bf16.msra.mxu1 %v5658_v13 }
  0xa4   : > { %5255 = vmatprep.subr.bf16.mxu0 %v5811_v2  ;;  %5263 = vmatprep.subr.bf16.mxu1 %v5811_v2 }
  0xa5   : > { %5257 = vmatprep.mubr.msk.bf16.mxu0 %vm5812_vm1, %v5811_v2  ;;  %5265 = vmatprep.mubr.msk.bf16.mxu1 %vm5812_vm1, %v5811_v2 }
  0xa7   : > { %5256 = vmatpush3.bf16.msra.mxu0 %v5659_v14  ;;  %5264 = vmatpush3.bf16.msra.mxu1 %v5660_v15 }
  0xa8   : > { %5269 = vmatprep.subr.bf16.mxu0 %v5811_v2  ;;  %5277 = vmatprep.subr.bf16.mxu1 %v5811_v2 }
  0xaa   : > { %5258 = vmatmul.mubr.msk.bf16.vlgmr.msra.gmra.mrb[8].mxu0 %vm1556_vm2, %v6116_v7  ;;  %5266 = vmatmul.mubr.msk.bf16.vlgmr.msra.gmra.mrb[8].mxu1 %vm1556_vm2, %v6116_v7 }
  0xab   : > { %5270 = vmatpush3.bf16.msra.mxu0 %v5661_v16  ;;  %5278 = vmatpush3.bf16.msra.mxu1 %v5662_v17  ;;  %v4945_v16 = vld [vmem:[%s6678_s21 + $0x2] ss:$0 sm:$0xff] }
  0xac   : > { %5271 = vmatprep.subr.bf16.mxu0 %v5811_v2  ;;  %5279 = vmatprep.subr.bf16.mxu1 %v5811_v2 }
  0xad   : > { %5273 = vmatprep.mubr.msk.bf16.mxu0 %vm5812_vm1, %v5811_v2  ;;  %5281 = vmatprep.mubr.msk.bf16.mxu1 %vm5812_vm1, %v5811_v2 }
  0xaf   : > { %5272 = vmatpush3.bf16.msra.mxu0 %v5663_v18  ;;  %5280 = vmatpush3.bf16.msra.mxu1 %v5664_v19  ;;  %v4946_v19 = vld [vmem:[%s6678_s21 + $0x3] ss:$0 sm:$0xff]  ;;  %s6695_s21 = sld [smem:[#allocation49_spill]] }
  0xb0   : > { %5285 = vmatprep.subr.bf16.mxu0 %v5811_v2  ;;  %5293 = vmatprep.subr.bf16.mxu1 %v5811_v2 }
  0xb2   : > { %5274 = vmatmul.mubr.msk.bf16.vlgmr.msra.gmra.mrb[12].mxu0 %vm1556_vm2, %v6116_v7  ;;  %5282 = vmatmul.mubr.msk.bf16.vlgmr.msra.gmra.mrb[12].mxu1 %vm1556_vm2, %v6116_v7 }
  0xb3   : > { %5286 = vmatpush3.bf16.msra.mxu0 %v5665_v20  ;;  %5289 = vmatprep.mubr.msk.bf16.mxu0 %vm5812_vm1, %v5811_v2 }
  0xb4   : > { %5287 = vmatprep.subr.bf16.mxu0 %v5811_v2  ;;  %5297 = vmatprep.mubr.msk.bf16.mxu1 %vm5812_vm1, %v5811_v2 }
  0xb5   : > { %5294 = vmatpush3.bf16.msra.mxu1 %v5666_v21 }
  0xb6   : > { %5295 = vmatprep.subr.bf16.mxu1 %v5811_v2 }
  0xb7   : > { %5288 = vmatpush3.bf16.msra.mxu0 %v5667_v22 }
  0xb8   : > { %5301 = vmatprep.subr.bf16.mxu0 %v5811_v2 }
  0xb9   : > { %5296 = vmatpush3.bf16.msra.mxu1 %v5668_v23 }
  0xba   : > { %5290 = vmatmul.mubr.msk.bf16.vlgmr.msra.gmra.mrb[16].mxu0 %vm1556_vm2, %v6116_v7  ;;  %5309 = vmatprep.subr.bf16.mxu1 %v5811_v2 }
  0xbb   : > { %5305 = vmatprep.mubr.msk.bf16.mxu0 %vm5812_vm1, %v5811_v2  ;;  %5302 = vmatpush3.bf16.msra.mxu0 %v5669_v24 }
  0xbc   : > { %5298 = vmatmul.mubr.msk.bf16.vlgmr.msra.gmra.mrb[16].mxu1 %vm1556_vm2, %v6116_v7  ;;  %5303 = vmatprep.subr.bf16.mxu0 %v5811_v2 }
  0xbd   : > { %5310 = vmatpush3.bf16.msra.mxu1 %v5670_v25  ;;  %5313 = vmatprep.mubr.msk.bf16.mxu1 %vm5812_vm1, %v5811_v2 }
  0xbe   : > { %5311 = vmatprep.subr.bf16.mxu1 %v5811_v2 }
  0xbf   : > { %5304 = vmatpush3.bf16.msra.mxu0 %v5671_v26  ;;  %v4975_v26 = vld [vmem:[%s6679_s25] ss:$0 sm:$0xff] }
  0xc0   : > { %5317 = vmatprep.subr.bf16.mxu0 %v5811_v2 }
  0xc1   : > { %5312 = vmatpush3.bf16.msra.mxu1 %v5672_v27 }
  0xc2   : > { %5323 = vmatprep.subr.bf16.mxu1 %v5811_v2  ;;  %5306 = vmatmul.mubr.msk.bf16.vlgmr.msra.gmra.mrb[20].mxu0 %vm1556_vm2, %v6116_v7 }
  0xc3   : > { %5319 = vmatprep.mubr.msk.bf16.mxu0 %vm5812_vm1, %v5811_v2 }
  0xc4   : > { %5314 = vmatmul.mubr.msk.bf16.vlgmr.msra.gmra.mrb[20].mxu1 %vm1556_vm2, %v6116_v7 }
  0xc5   : > { %5325 = vmatprep.mubr.msk.bf16.mxu1 %vm5812_vm1, %v5811_v2 }
 0x16d   : > { %v1594_v28 = vpop.f32.mrb[0].mxu0  ;;  %v1646_v30 = vpop.f32.mrb[0].mxu1 }
 0x16e   : > { %v5227_v29 = vpop.f32.mrb[1].mxu0  ;;  %v5235_v32 = vpop.f32.mrb[1].mxu1  ;;  %v1595_v63 = vadd.f32 %v4943_v56, %v1594_v28  ;;  %v1647_v1 = vadd.f32 %v4944_v59, %v1646_v30  ;;  %v4976_v28 = vld [vmem:[%s6679_s25 + $0x1] ss:$0 sm:$0xff] }
 0x16f   : > { %v1597_v31 = vpop.f32.mrb[2].mxu0  ;;  %v1649_v34 = vpop.f32.mrb[2].mxu1 }
 0x170   : > { %v5228_v33 = vpop.f32.mrb[3].mxu0  ;;  %v5236_v35 = vpop.f32.mrb[3].mxu1  ;;  %v2220_v11 = vpack.c.bf16 %v1595_v63, %v1595_v63  ;;  %v2221_v15 = vpack.c.bf16 %v1647_v1, %v1647_v1 }
 0x175   : > { %v1698_v36 = vpop.f32.mrb[4].mxu0  ;;  %v1750_v38 = vpop.f32.mrb[4].mxu1 }
 0x176   : > { %v5243_v37 = vpop.f32.mrb[5].mxu0  ;;  %v5251_v40 = vpop.f32.mrb[5].mxu1  ;;  %v1699_v22 = vadd.f32 %v4945_v16, %v1698_v36  ;;  %v1751_v23 = vadd.f32 %v4946_v19, %v1750_v38 }
 0x177   : > { %v1701_v39 = vpop.f32.mrb[6].mxu0  ;;  %v1753_v42 = vpop.f32.mrb[6].mxu1 }
 0x178   : > { %v5244_v41 = vpop.f32.mrb[7].mxu0  ;;  %v5252_v43 = vpop.f32.mrb[7].mxu1  ;;  %v2222_v24 = vpack.c.bf16 %v1699_v22, %v1699_v22  ;;  %v2223_v25 = vpack.c.bf16 %v1751_v23, %v1751_v23 }
 0x17d   : > { %v1826_v46 = vpop.f32.mrb[8].mxu0  ;;  %v1878_v48 = vpop.f32.mrb[8].mxu1 }
 0x17e   : > { %v1827_v47 = vadd.f32 %v4959_v44, %v1826_v46  ;;  %v5259_v49 = vpop.f32.mrb[9].mxu0  ;;  %v1879_v50 = vadd.f32 %v4960_v45, %v1878_v48  ;;  %v5267_v52 = vpop.f32.mrb[9].mxu1 }
 0x17f   : > { %v1829_v51 = vpop.f32.mrb[10].mxu0  ;;  %v1881_v55 = vpop.f32.mrb[10].mxu1 }
 0x180   : > { %v2224_v53 = vpack.c.bf16 %v1827_v47, %v1827_v47  ;;  %v5260_v54 = vpop.f32.mrb[11].mxu0  ;;  %v2225_v57 = vpack.c.bf16 %v1879_v50, %v1879_v50  ;;  %v5268_v58 = vpop.f32.mrb[11].mxu1  ;;  %v1435_v50 = vlaneseq  ;;  %v1441_v51 = vld [vmem:[%s6682_s19] sm:$0x1] }
 0x181   : > { %vm1442_vm5 = vcmp.gt.f32.partialorder %v1441_v51, 0.5 }
 0x182   : > { %v2233_v60 = vsel %vm2228_vm3, %v2224_v53, 0  ;;  %v2279_v61 = vsel %vm2228_vm3, %v2225_v57, 0  ;;  %v6249_v52 = vshrl.u32 %v1435_v50, 7  ;;  %v1438_v53 = vand.u32 127, %v1435_v50 }
 0x183   : > { %5318 = vmatpush3.bf16.xpose.msra.mxu0 %v2233_v60  ;;  %5324 = vmatpush3.bf16.xpose.msra.mxu1 %v2279_v61  ;;  %v1443_v55 = vsel %vm1442_vm5, -1e+09, %v5811_v2 }
 0x184   : > { %5329 = vmatprep.subr.bf16.mxu0 %v5811_v2  ;;  %5335 = vmatprep.subr.bf16.mxu1 %v5811_v2  ;;  %v1447_v54 = vsub.s32 0, %v6249_v52  ;;  %vm1439_vm6 = vcmp.gt.s32.totalorder %v1438_v53, %v6249_v52 }
 0x185   : > { %v1930_v3 = vpop.f32.mrb[12].mxu0  ;;  %v1982_v5 = vpop.f32.mrb[12].mxu1  ;;  %v1440_v57 = vsel %vm1439_vm6, -1e+09, %v5811_v2 }
 0x186   : > { %v1931_v4 = vadd.f32 %v4961_v62, %v1930_v3  ;;  %v5275_v7 = vpop.f32.mrb[13].mxu0  ;;  %v1983_v8 = vadd.f32 %v4962_v0, %v1982_v5  ;;  %v5283_v10 = vpop.f32.mrb[13].mxu1  ;;  %v1448_v56 = vrot.slane %v1443_v55, %v1447_v54 }
 0x187   : > { %v1933_v9 = vpop.f32.mrb[14].mxu0  ;;  %v1985_v14 = vpop.f32.mrb[14].mxu1 }
 0x188   : > { %v2226_v12 = vpack.c.bf16 %v1931_v4, %v1931_v4  ;;  %v5276_v13 = vpop.f32.mrb[15].mxu0  ;;  %v2227_v17 = vpack.c.bf16 %v1983_v8, %v1983_v8  ;;  %v5284_v18 = vpop.f32.mrb[15].mxu1  ;;  %v1450_v58 = vadd.f32 %v1448_v56, %v1440_v57 }
 0x18a   : > { %v2325_v20 = vsel %vm2228_vm3, %v2226_v12, 0  ;;  %5320 = vmatmul.mubr.msk.bf16.vlgmr.msra.gmra.mrb[24].mxu0 %vm2228_vm3, %v2220_v11  ;;  %v2371_v21 = vsel %vm2228_vm3, %v2227_v17, 0  ;;  %5326 = vmatmul.mubr.msk.bf16.vlgmr.msra.gmra.mrb[24].mxu1 %vm2228_vm3, %v2221_v15 }
 0x18b   : > { %5330 = vmatpush3.bf16.xpose.msra.mxu0 %v2325_v20  ;;  %5336 = vmatpush3.bf16.xpose.msra.mxu1 %v2371_v21 }
 0x18c   : > { %5331 = vmatprep.mubr.msk.bf16.mxu0 %vm5812_vm1, %v5811_v2  ;;  %5337 = vmatprep.mubr.msk.bf16.mxu1 %vm5812_vm1, %v5811_v2 }
 0x18d   : > { %5341 = vmatprep.subr.bf16.mxu0 %v5811_v2  ;;  %5347 = vmatprep.subr.bf16.mxu1 %v5811_v2  ;;  %v2058_v27 = vpop.f32.mrb[16].mxu0 }
 0x18e   : > { %v2059_v29 = vadd.f32 %v4975_v26, %v2058_v27  ;;  %v5291_v30 = vpop.f32.mrb[17].mxu0 }
 0x18f   : > { %v2061_v31 = vpop.f32.mrb[18].mxu0  ;;  %v2110_v32 = vpop.f32.mrb[16].mxu1 }
 0x190   : > { %v2461_v33 = vpack.c.bf16 %v2059_v29, %v2059_v29  ;;  %v5292_v34 = vpop.f32.mrb[19].mxu0  ;;  %v2111_v35 = vadd.f32 %v4976_v28, %v2110_v32  ;;  %v5299_v36 = vpop.f32.mrb[17].mxu1 }
 0x191   : > { %v2113_v37 = vpop.f32.mrb[18].mxu1 }
 0x192   : > { %5332 = vmatmul.mubr.msk.bf16.vlgmr.msra.gmra.mrb[28].mxu0 %vm2228_vm3, %v2222_v24  ;;  %5338 = vmatmul.mubr.msk.bf16.vlgmr.msra.gmra.mrb[28].mxu1 %vm2228_vm3, %v2223_v25  ;;  %v2470_v38 = vsel %vm2468_vm4, %v2461_v33, 0  ;;  %v2462_v39 = vpack.c.bf16 %v2111_v35, %v2111_v35  ;;  %v5300_v40 = vpop.f32.mrb[19].mxu1 }
 0x193   : > { %5343 = vmatprep.mubr.msk.bf16.mxu0 %vm5812_vm1, %v5811_v2  ;;  %5349 = vmatprep.mubr.msk.bf16.mxu1 %vm5812_vm1, %v5811_v2 }
 0x194   : > { %5342 = vmatpush3.bf16.msra.mxu0 %v2470_v38  ;;  %v2516_v41 = vsel %vm2468_vm4, %v2462_v39, 0 }
 0x195   : > { %5353 = vmatprep.subr.bf16.mxu0 %v5811_v2  ;;  %5348 = vmatpush3.bf16.msra.mxu1 %v2516_v41  ;;  %v6242_v42 = vpop.f32.mrb[20].mxu0 }
 0x196   : > { %5359 = vmatprep.subr.bf16.mxu1 %v5811_v2  ;;  %v5307_v44 = vpop.f32.mrb[21].mxu0 }
 0x197   : > { %v6244_v43 = vpop.f32.mrb[20].mxu1  ;;  %v2165_v46 = vpop.f32.mrb[22].mxu0 }
 0x198   : > { %v5315_v45 = vpop.f32.mrb[21].mxu1  ;;  %v5308_v48 = vpop.f32.mrb[23].mxu0 }
 0x199   : > { %v2217_v47 = vpop.f32.mrb[22].mxu1  ;;  %v4977_v45 = vld [vmem:[%s6679_s25 + $0x2] ss:$0 sm:$0xff]  ;;  %v4978_v48 = vld [vmem:[%s6679_s25 + $0x3] ss:$0 sm:$0xff]  ;;  %s6696_s25 = sld [smem:[#allocation6_spill]] }
 0x19a   : > { %v5316_v49 = vpop.f32.mrb[23].mxu1  ;;  %v2163_v46 = vadd.f32 %v4977_v45, %v6242_v42  ;;  %v2215_v51 = vadd.f32 %v4978_v48, %v6244_v43  ;;  %v1514_v43 = vld [vmem:[%s6683_s16] sm:$0xf] }
 0x19c   : > { %v2463_v50 = vpack.c.bf16 %v2163_v46, %v2163_v46 }
 0x19f   : > { %s6697_s8 = scalar_lea.vmem %s6696_s25, %s6681_s14 }
 0x25d   : > { %v2269_v59 = vpop.f32.mrb[24].mxu0  ;;  %v2315_v61 = vpop.f32.mrb[24].mxu1 }
 0x25e   : > { %v2270_v60 = vadd.f32 %v2269_v59, %v1450_v58  ;;  %v5321_v62 = vpop.f32.mrb[25].mxu0  ;;  %v5327_v63 = vpop.f32.mrb[25].mxu1  ;;  %v2316_v1 = vadd.f32 %v2315_v61, %v1450_v58  ;;  %v2464_v59 = vpack.c.bf16 %v2215_v51, %v2215_v51 }
 0x25f   : > { %v2272_v0 = vpop.f32.mrb[26].mxu0  ;;  %v2318_v3 = vpop.f32.mrb[26].mxu1 }
 0x260   : > { %v5322_v4 = vpop.f32.mrb[27].mxu0  ;;  %v2413_v5 = vsel %vm2228_vm3, %v2270_v60, -inf  ;;  %v5328_v7 = vpop.f32.mrb[27].mxu1  ;;  %v2416_v8 = vsel %vm2228_vm3, %v2316_v1, -inf  ;;  %v2608_v62 = vsel %vm2468_vm4, %v2464_v59, 0 }
 0x261   : > { %2414 = vmax.xlane.f32.xlu0 %v2413_v5  ;;  %v1515_v7 = vld [vmem:[%s6683_s16 + $0x4] sm:$0xf] }
 0x265   : > { %2417 = vmax.xlane.f32.xlu0 %v2416_v8  ;;  %v2361_v9 = vpop.f32.mrb[28].mxu0  ;;  %v2407_v10 = vpop.f32.mrb[28].mxu1  ;;  %v2704_v8 = vsel %vm2468_vm4, %v1515_v7, 0  ;;  %v5675_v7 = vld [vmem:[%s6686_s11 + $0x8] sm:$0xff]  }
 0x266   : > { %v2362_v11 = vadd.f32 %v2361_v9, %v1450_v58  ;;  %v5333_v12 = vpop.f32.mrb[29].mxu0  ;;  %v5339_v13 = vpop.f32.mrb[29].mxu1  ;;  %v2408_v15 = vadd.f32 %v2407_v10, %v1450_v58  ;;  %v2562_v58 = vsel %vm2468_vm4, %v2463_v50, 0  ;;  %v1516_v9 = vld [vmem:[%s6683_s16 + $0x8] sm:$0xf] }
 0x267   : > { %v2364_v14 = vpop.f32.mrb[30].mxu0  ;;  %v2410_v16 = vpop.f32.mrb[30].mxu1  ;;  %v2750_v13 = vsel %vm2468_vm4, %v1516_v9, 0 }
 0x268   : > { %v5334_v17 = vpop.f32.mrb[31].mxu0  ;;  %v2419_v18 = vsel %vm2228_vm3, %v2362_v11, -inf  ;;  %v5340_v19 = vpop.f32.mrb[31].mxu1  ;;  %v2422_v20 = vsel %vm2228_vm3, %v2408_v15, -inf }
 0x269   : > { %2420 = vmax.xlane.f32.xlu1 %v2419_v18 }
 0x26d   : > { %2423 = vmax.xlane.f32.xlu1 %v2422_v20 }
 0x2ee   : > { %v2415_v21 = vpop.xlane.xlu0 %2414 }
 0x2ef   : > { %v2425_v22 = vsub.f32 %v2270_v60, %v2415_v21 }
 0x2f1   : > { %v2429_v23 = vmul.f32 1.442695, %v2425_v22 }
 0x2f2   : > { %v2418_v24 = vpop.xlane.xlu0 %2417 }
 0x2f3   : > { %5703 = vpow2.f32 %v2429_v23  ;;  %v2426_v25 = vsub.f32 %v2316_v1, %v2418_v24  ;;  %v2658_v1 = vsel %vm2468_vm4, %v1514_v43, 0 }
 0x2f5   : > { %v2431_v26 = vmul.f32 1.442695, %v2426_v25 }
 0x2f6   : > { %v2421_v27 = vpop.xlane.xlu1 %2420 }
 0x2f7   : > { %5705 = vpow2.f32 %v2431_v26  ;;  %v2427_v28 = vsub.f32 %v2362_v11, %v2421_v27 }
 0x2f9   : > { %v2433_v29 = vmul.f32 1.442695, %v2427_v28 }
 0x2fa   : > { %v2424_v30 = vpop.xlane.xlu1 %2423 }
 0x2fb   : > { %5707 = vpow2.f32 %v2433_v29  ;;  %v2428_v31 = vsub.f32 %v2408_v15, %v2424_v30  ;;  %v1517_v15 = vld [vmem:[%s6683_s16 + $0xc] sm:$0xf] }
 0x2fc   : > { %v2796_v20 = vsel %vm2468_vm4, %v1517_v15, 0 }
 0x2fd   : > { %v5704_v32 = vpop.eup %5703  ;;  %v2435_v33 = vmul.f32 1.442695, %v2428_v31 }
 0x2fe   : > { %v2437_v34 = vsel %vm2228_vm3, %v5704_v32, 0.0 }
 0x2ff   : > { %5709 = vpow2.f32 %v2435_v33  ;;  %2438 = vadd.xlane.f32.xlu0 %v2437_v34 }
 0x301   : > { %v5706_v35 = vpop.eup %5705 }
 0x302   : > { %v2440_v36 = vsel %vm2228_vm3, %v5706_v35, 0.0 }
 0x303   : > { %2441 = vadd.xlane.f32.xlu1 %v2440_v36 }
 0x305   : > { %v5708_v37 = vpop.eup %5707 }
 0x306   : > { %v2443_v38 = vsel %vm2228_vm3, %v5708_v37, 0.0 }
 0x307   : > { %2444 = vadd.xlane.f32.xlu0 %v2443_v38 }
 0x309   : > { %v5710_v39 = vpop.eup %5709 }
 0x30a   : > { %v2446_v40 = vsel %vm2228_vm3, %v5710_v39, 0.0 }
 0x30b   : > { %2447 = vadd.xlane.f32.xlu1 %v2446_v40 }
 0x38c   : > { %v2439_v41 = vpop.xlane.xlu0 %2438 }
 0x38d   : > { %5711 = vrcp.f32 %v2439_v41 }
 0x390   : > { %v2442_v44 = vpop.xlane.xlu1 %2441 }
 0x391   : > { %5713 = vrcp.f32 %v2442_v44 }
 0x394   : > { %v2445_v47 = vpop.xlane.xlu0 %2444 }
 0x395   : > { %5715 = vrcp.f32 %v2445_v47 }
 0x397   : > { %v5712_v49 = vpop.eup %5711 }
 0x398   : > { %v2453_v53 = vmul.f32 %v5712_v49, %v5704_v32  ;;  %v2448_v55 = vpop.xlane.xlu1 %2447 }
 0x399   : > { %5717 = vrcp.f32 %v2448_v55  ;;  %v5003_v55 = vld [vmem:[%s6685_s7] ss:$0 sm:$0xff] }
 0x39a   : > { %v2457_v56 = vpack.c.bf16 %v2453_v53, %v2453_v53 }
 0x39b   : > { %v5714_v57 = vpop.eup %5713 }
 0x39c   : > { %v2454_v60 = vmul.f32 %v5714_v57, %v5706_v35  ;;  %5344 = vmatmul.mubr.msk.bf16.vlgmr.msra.gmra.mrb[32].mxu0 %vm2228_vm3, %v2457_v56 }
 0x39d   : > { %5354 = vmatpush3.bf16.msra.mxu0 %v2562_v58  ;;  %5355 = vmatprep.mubr.msk.bf16.mxu0 %vm5812_vm1, %v5811_v2 }
 0x39e   : > { %v2458_v42 = vpack.c.bf16 %v2454_v60, %v2454_v60  ;;  %5365 = vmatprep.subr.bf16.mxu0 %v5811_v2 }
 0x39f   : > { %v5716_v61 = vpop.eup %5715 }
 0x3a0   : > { %v2455_v63 = vmul.f32 %v5716_v61, %v5708_v37  ;;  %5350 = vmatmul.mubr.msk.bf16.vlgmr.msra.gmra.mrb[32].mxu1 %vm2228_vm3, %v2458_v42 }
 0x3a1   : > { %5360 = vmatpush3.bf16.msra.mxu1 %v2608_v62  ;;  %5361 = vmatprep.mubr.msk.bf16.mxu1 %vm5812_vm1, %v5811_v2 }
 0x3a2   : > { %v2459_v0 = vpack.c.bf16 %v2455_v63, %v2455_v63  ;;  %5371 = vmatprep.subr.bf16.mxu1 %v5811_v2 }
 0x3a3   : > { %v5718_v3 = vpop.eup %5717 }
 0x3a4   : > { %v2456_v4 = vmul.f32 %v5718_v3, %v5710_v39  ;;  %5356 = vmatmul.mubr.msk.bf16.vlgmr.msra.gmra.mrb[36].mxu0 %vm2228_vm3, %v2459_v0 }
 0x3a5   : > { %5366 = vmatpush3.bf16.msra.mxu0 %v2658_v1  ;;  %5367 = vmatprep.mubr.msk.bf16.mxu0 %vm5812_vm1, %v5811_v2 }
 0x3a6   : > { %v2460_v5 = vpack.c.bf16 %v2456_v4, %v2456_v4  ;;  %5377 = vmatprep.subr.bf16.mxu0 %v5811_v2  ;;  %v5673_v4 = vld [vmem:[%s6686_s11] sm:$0xff]  }
 0x3a8   : > { %5362 = vmatmul.mubr.msk.bf16.vlgmr.msra.gmra.mrb[36].mxu1 %vm2228_vm3, %v2460_v5  ;;  %v5674_v5 = vld [vmem:[%s6686_s11 + $0x10] sm:$0xff]  }
 0x3a9   : > { %5373 = vmatprep.mubr.msk.bf16.mxu1 %vm5812_vm1, %v5811_v2  ;;  %5372 = vmatpush3.bf16.msra.mxu1 %v2704_v8 }
 0x3aa   : > { %5383 = vmatprep.subr.bf16.mxu1 %v5811_v2 }
 0x46f   : > { %v2506_v10 = vpop.f32.mrb[32].mxu0 }
 0x470   : > { %v2650_v11 = vpack.c.bf16 %v2506_v10, %v2506_v10  ;;  %v5345_v12 = vpop.f32.mrb[33].mxu0 }
 0x471   : > { %v2509_v14 = vpop.f32.mrb[34].mxu0  ;;  %v5004_v12 = vld [vmem:[%s6689_s4] ss:$0 sm:$0xff] }
 0x472   : > { %v5346_v16 = vpop.f32.mrb[35].mxu0  ;;  %5368 = vmatmul.mubr.msk.bf16.vlgmr.msra.gmra.mrb[40].mxu0 %vm2228_vm3, %v2650_v11  ;;  %v5005_v14 = vld [vmem:[%s6690_s5] ss:$0 sm:$0xff] }
 0x473   : > { %v2552_v17 = vpop.f32.mrb[32].mxu1  ;;  %5378 = vmatpush3.bf16.msra.mxu0 %v2750_v13  ;;  %5379 = vmatprep.mubr.msk.bf16.mxu0 %vm5812_vm1, %v5811_v2 }
 0x474   : > { %v2651_v18 = vpack.c.bf16 %v2552_v17, %v2552_v17  ;;  %v5351_v19 = vpop.f32.mrb[33].mxu1  ;;  %5389 = vmatprep.subr.bf16.mxu0 %v5811_v2  ;;  %v5677_v17 = vld [vmem:[%s6686_s11 + $0x20] sm:$0xff]  }
 0x475   : > { %v2555_v21 = vpop.f32.mrb[34].mxu1 }
 0x476   : > { %v5352_v22 = vpop.f32.mrb[35].mxu1  ;;  %5374 = vmatmul.mubr.msk.bf16.vlgmr.msra.gmra.mrb[40].mxu1 %vm2228_vm3, %v2651_v18  ;;  %v5678_v18 = vld [vmem:[%s6686_s11 + $0x30] sm:$0xff]   ;;  %v5680_v21 = vld [vmem:[%s6686_s11 + $0x38] sm:$0xff]  }
 0x477   : > { %v2598_v23 = vpop.f32.mrb[36].mxu0  ;;  %5384 = vmatpush3.bf16.msra.mxu1 %v2796_v20  ;;  %5385 = vmatprep.mubr.msk.bf16.mxu1 %vm5812_vm1, %v5811_v2  ;;  %v5679_v20 = vld [vmem:[%s6686_s11 + $0x28] sm:$0xff]   ;;  %v5681_v22 = vld [vmem:[%s6691_s9] sm:$0xff]  }
 0x478   : > { %v2652_v24 = vpack.c.bf16 %v2598_v23, %v2598_v23  ;;  %v5357_v25 = vpop.f32.mrb[37].mxu0  ;;  %5397 = vmatprep.subr.bf16.mxu1 %v5811_v2  ;;  %v5682_v23 = vld [vmem:[%s6691_s9 + $0x10] sm:$0xff]  }
 0x479   : > { %v2601_v26 = vpop.f32.mrb[38].mxu0  ;;  %v5684_v25 = vld [vmem:[%s6691_s9 + $0x18] sm:$0xff]  }
 0x47a   : > { %v5358_v27 = vpop.f32.mrb[39].mxu0  ;;  %5380 = vmatmul.mubr.msk.bf16.vlgmr.msra.gmra.mrb[44].mxu0 %vm2228_vm3, %v2652_v24  ;;  %v5683_v24 = vld [vmem:[%s6691_s9 + $0x8] sm:$0xff]   ;;  %v1434_v26 = vld [vmem:[%s6693_s17] sm:$0xff] }
 0x47b   : > { %v2644_v28 = vpop.f32.mrb[36].mxu1  ;;  %5393 = vmatprep.mubr.msk.bf16.mxu0 %vm5812_vm1, %v5811_v2  ;;  %5390 = vmatpush3.bf16.msra.mxu0 %v5673_v4  ;;  %v2949_v27 = vpack.c.bf16 %v1434_v26, %v1434_v26 }
 0x47c   : > { %v2653_v29 = vpack.c.bf16 %v2644_v28, %v2644_v28  ;;  %v5363_v30 = vpop.f32.mrb[37].mxu1  ;;  %5391 = vmatprep.subr.bf16.mxu0 %v5811_v2  ;;  %v5685_v28 = vld [vmem:[%s6691_s9 + $0x20] sm:$0xff]  }
 0x47d   : > { %v2647_v31 = vpop.f32.mrb[38].mxu1  ;;  %v5687_v30 = vld [vmem:[%s6691_s9 + $0x28] sm:$0xff]  }
 0x47e   : > { %v5364_v32 = vpop.f32.mrb[39].mxu1  ;;  %5386 = vmatmul.mubr.msk.bf16.vlgmr.msra.gmra.mrb[44].mxu1 %vm2228_vm3, %v2653_v29  ;;  %v5686_v29 = vld [vmem:[%s6691_s9 + $0x30] sm:$0xff]   ;;  %v5688_v31 = vld [vmem:[%s6691_s9 + $0x38] sm:$0xff]  }
 0x47f   : > { %5401 = vmatprep.mubr.msk.bf16.mxu1 %vm5812_vm1, %v5811_v2  ;;  %5398 = vmatpush3.bf16.msra.mxu1 %v5674_v5  ;;  %v5689_v32 = vld [vmem:[%s6065_s29] sm:$0xff]  }
 0x480   : > { %5399 = vmatprep.subr.bf16.mxu1 %v5811_v2  ;;  %5392 = vmatpush3.bf16.msra.mxu0 %v5675_v7 }
 0x481   : > { %5405 = vmatprep.subr.bf16.mxu0 %v5811_v2 }
 0x545   : > { %v2694_v33 = vpop.f32.mrb[40].mxu0 }
 0x546   : > { %v5369_v34 = vpop.f32.mrb[41].mxu0  ;;  %v2838_v38 = vsel %vm1556_vm2, %v2694_v33, 0.0  ;;  %v5690_v33 = vld [vmem:[%s6065_s29 + $0x10] sm:$0xff]  }
 0x547   : > { %v2697_v35 = vpop.f32.mrb[42].mxu0  ;;  %v5691_v34 = vld [vmem:[%s6065_s29 + $0x8] sm:$0xff]  }
 0x548   : > { %v5370_v36 = vpop.f32.mrb[43].mxu0  ;;  %v5692_v35 = vld [vmem:[%s6065_s29 + $0x18] sm:$0xff]  }
 0x549   : > { %v2740_v37 = vpop.f32.mrb[40].mxu1  ;;  %v5693_v36 = vld [vmem:[%s6065_s29 + $0x20] sm:$0xff]  }
 0x54a   : > { %v2839_v39 = vsel %vm1556_vm2, %v2740_v37, 0.0  ;;  %v5375_v40 = vpop.f32.mrb[41].mxu1  ;;  %v5694_v37 = vld [vmem:[%s6065_s29 + $0x30] sm:$0xff]  }
 0x54b   : > { %v2840_v41 = vadd.f32 %v2839_v39, %v2838_v38  ;;  %v2743_v44 = vpop.f32.mrb[42].mxu1  ;;  %v5695_v38 = vld [vmem:[%s6065_s29 + $0x28] sm:$0xff]   ;;  %v5696_v39 = vld [vmem:[%s6065_s29 + $0x38] sm:$0xff]   ;;  %s6694_s29 = sld [smem:[#allocation51_spill]] }
 0x54c   : > { %v5376_v45 = vpop.f32.mrb[43].mxu1 }
 0x54d   : > { %v2786_v46 = vpop.f32.mrb[44].mxu0 }
 0x54e   : > { %v2841_v47 = vsel %vm1556_vm2, %v2786_v46, 0.0  ;;  %v5381_v48 = vpop.f32.mrb[45].mxu0 }
 0x54f   : > { %v2842_v49 = vadd.f32 %v2841_v47, %v2840_v41  ;;  %v2789_v50 = vpop.f32.mrb[46].mxu0 }
 0x550   : > { %v5382_v51 = vpop.f32.mrb[47].mxu0 }
 0x551   : > { %v2832_v53 = vpop.f32.mrb[44].mxu1 }
 0x552   : > { %v2843_v56 = vsel %vm1556_vm2, %v2832_v53, 0.0  ;;  %v5387_v57 = vpop.f32.mrb[45].mxu1 }
 0x553   : > { %v2844_v58 = vadd.f32 %v2843_v56, %v2842_v49  ;;  %v2835_v59 = vpop.f32.mrb[46].mxu1 }
 0x554   : > { %v5388_v60 = vpop.f32.mrb[47].mxu1 }
 0x555   : > { %v2851_v42 = vadd.f32 %v5003_v55, %v2844_v58  ;;  %v5022_v60 = vld [vmem:[%s6694_s29] ss:$0 sm:$0xff] }
 0x557   : > { %v2854_v61 = vadd.f32 %v2851_v42, %v6112_v6  ;;  %v5676_v6 = vld [vmem:[%s6686_s11 + $0x18] sm:$0xff]   ;;  %v5023_v42 = vld [vmem:[%s6694_s29 + $0x1] ss:$0 sm:$0xff] }
 0x558   : > { %5400 = vmatpush3.bf16.msra.mxu1 %v5676_v6 }
 0x559   : > { %v2855_v43 = vsel %vm1556_vm2, %v2854_v61, 0.0  ;;  %5413 = vmatprep.subr.bf16.mxu1 %v5811_v2 }
 0x55a   : > { %2856 = vadd.xlane.f32.xlu0 %v2855_v43 }
 0x5e7   : > { %v2857_v62 = vpop.xlane.xlu0 %2856 }
 0x5e8   : > { %v2859_v63 = vmul.f32 0.03125, %v2857_v62 }
 0x5ea   : > { %v2860_v0 = vsub.f32 %v2854_v61, %v2859_v63 }
 0x5ec   : > { %v2861_v1 = vmul.f32 %v2860_v0, %v2860_v0 }
 0x5ee   : > { %v2862_v3 = vsel %vm1556_vm2, %v2861_v1, 0.0 }
 0x5ef   : > { %2863 = vadd.xlane.f32.xlu1 %v2862_v3 }
 0x67c   : > { %v2864_v8 = vpop.xlane.xlu1 %2863 }
 0x67d   : > { %v2865_v9 = vmul.f32 0.03125, %v2864_v8 }
 0x67f   : > { %v2866_v10 = vadd.f32 1e-05, %v2865_v9  ;;  %v5006_v9 = vld [vmem:[%s6695_s21] ss:$0 sm:$0xff] }
 0x681   : > { %5719 = vrsqrt.f32 %v2866_v10  ;;  %v5007_v10 = vld [vmem:[%s6695_s21 + $0x1] ss:$0 sm:$0xff] }
 0x68b   : > { %v5720_v11 = vpop.eup %5719 }
 0x68c   : > { %v2868_v13 = vmul.f32 %v5720_v11, %v2860_v0 }
 0x68e   : > { %v2875_v15 = vmul.f32 %v5004_v12, %v2868_v13  ;;  %v5024_v13 = vld [vmem:[%s6694_s29 + $0x2] ss:$0 sm:$0xff] }
 0x690   : > { %v6333_v16 = vadd.f32 %v5005_v14, %v2875_v15  ;;  %v5025_v14 = vld [vmem:[%s6694_s29 + $0x3] ss:$0 sm:$0xff] }
 0x692   : > { %v2948_v19 = vpack.c.bf16 %v6333_v16, %v6333_v16 }
 0x694   : > { %5394 = vmatmul.mubr.msk.bf16.vlgmr.msra.gmra.mrb[48].mxu0 %vm1556_vm2, %v2948_v19  ;;  %5402 = vmatmul.mubr.msk.bf16.vlgmr.msra.gmra.mrb[48].mxu1 %vm1556_vm2, %v2948_v19 }
 0x695   : > { %5406 = vmatpush3.bf16.msra.mxu0 %v5677_v17  ;;  %5414 = vmatpush3.bf16.msra.mxu1 %v5678_v18 }
 0x696   : > { %5407 = vmatprep.subr.bf16.mxu0 %v5811_v2  ;;  %5415 = vmatprep.subr.bf16.mxu1 %v5811_v2 }
 0x697   : > { %5409 = vmatprep.mubr.msk.bf16.mxu0 %vm5812_vm1, %v5811_v2  ;;  %5417 = vmatprep.mubr.msk.bf16.mxu1 %vm5812_vm1, %v5811_v2 }
 0x699   : > { %5408 = vmatpush3.bf16.msra.mxu0 %v5679_v20  ;;  %5416 = vmatpush3.bf16.msra.mxu1 %v5680_v21 }
 0x69a   : > { %5421 = vmatprep.subr.bf16.mxu0 %v5811_v2  ;;  %5429 = vmatprep.subr.bf16.mxu1 %v5811_v2 }
 0x69c   : > { %5410 = vmatmul.mubr.msk.bf16.vlgmr.msra.gmra.mrb[52].mxu0 %vm1556_vm2, %v2948_v19  ;;  %5418 = vmatmul.mubr.msk.bf16.vlgmr.msra.gmra.mrb[52].mxu1 %vm1556_vm2, %v2948_v19 }
 0x69d   : > { %5422 = vmatpush3.bf16.msra.mxu0 %v5681_v22  ;;  %5430 = vmatpush3.bf16.msra.mxu1 %v5682_v23 }
 0x69e   : > { %5423 = vmatprep.subr.bf16.mxu0 %v5811_v2  ;;  %5431 = vmatprep.subr.bf16.mxu1 %v5811_v2 }
 0x69f   : > { %5425 = vmatprep.mubr.msk.bf16.mxu0 %vm5812_vm1, %v5811_v2  ;;  %5433 = vmatprep.mubr.msk.bf16.mxu1 %vm5812_vm1, %v5811_v2 }
 0x6a1   : > { %5424 = vmatpush3.bf16.msra.mxu0 %v5683_v24  ;;  %5432 = vmatpush3.bf16.msra.mxu1 %v5684_v25 }
 0x6a2   : > { %5437 = vmatprep.subr.bf16.mxu0 %v5811_v2  ;;  %5445 = vmatprep.subr.bf16.mxu1 %v5811_v2 }
 0x6a4   : > { %5426 = vmatmul.mubr.msk.bf16.vlgmr.msra.gmra.mrb[56].mxu0 %vm1556_vm2, %v2949_v27  ;;  %5434 = vmatmul.mubr.msk.bf16.vlgmr.msra.gmra.mrb[56].mxu1 %vm1556_vm2, %v2949_v27 }
 0x6a5   : > { %5438 = vmatpush3.bf16.msra.mxu0 %v5685_v28  ;;  %5446 = vmatpush3.bf16.msra.mxu1 %v5686_v29 }
 0x6a6   : > { %5439 = vmatprep.subr.bf16.mxu0 %v5811_v2  ;;  %5447 = vmatprep.subr.bf16.mxu1 %v5811_v2 }
 0x6a7   : > { %5441 = vmatprep.mubr.msk.bf16.mxu0 %vm5812_vm1, %v5811_v2  ;;  %5449 = vmatprep.mubr.msk.bf16.mxu1 %vm5812_vm1, %v5811_v2 }
 0x6a9   : > { %5440 = vmatpush3.bf16.msra.mxu0 %v5687_v30  ;;  %5448 = vmatpush3.bf16.msra.mxu1 %v5688_v31 }
 0x6aa   : > { %5453 = vmatprep.subr.bf16.mxu0 %v5811_v2  ;;  %5461 = vmatprep.subr.bf16.mxu1 %v5811_v2 }
 0x6ac   : > { %5442 = vmatmul.mubr.msk.bf16.vlgmr.msra.gmra.mrb[60].mxu0 %vm1556_vm2, %v2949_v27  ;;  %5450 = vmatmul.mubr.msk.bf16.vlgmr.msra.gmra.mrb[60].mxu1 %vm1556_vm2, %v2949_v27 }
 0x6ad   : > { %5454 = vmatpush3.bf16.msra.mxu0 %v5689_v32  ;;  %5457 = vmatprep.mubr.msk.bf16.mxu0 %vm5812_vm1, %v5811_v2  ;;  %v5008_v32 = vld [vmem:[%s6695_s21 + $0x2] ss:$0 sm:$0xff] }
 0x6ae   : > { %5455 = vmatprep.subr.bf16.mxu0 %v5811_v2  ;;  %5465 = vmatprep.mubr.msk.bf16.mxu1 %vm5812_vm1, %v5811_v2 }
 0x6af   : > { %5462 = vmatpush3.bf16.msra.mxu1 %v5690_v33  ;;  %v5009_v33 = vld [vmem:[%s6695_s21 + $0x3] ss:$0 sm:$0xff] }
 0x6b0   : > { %5463 = vmatprep.subr.bf16.mxu1 %v5811_v2 }
 0x6b1   : > { %5456 = vmatpush3.bf16.msra.mxu0 %v5691_v34 }
 0x6b2   : > { %5469 = vmatprep.subr.bf16.mxu0 %v5811_v2 }
 0x6b3   : > { %5464 = vmatpush3.bf16.msra.mxu1 %v5692_v35 }
 0x6b4   : > { %5458 = vmatmul.mubr.msk.bf16.vlgmr.msra.gmra.mrb[64].mxu0 %vm1556_vm2, %v2949_v27  ;;  %5477 = vmatprep.subr.bf16.mxu1 %v5811_v2 }
 0x6b5   : > { %5473 = vmatprep.mubr.msk.bf16.mxu0 %vm5812_vm1, %v5811_v2  ;;  %5470 = vmatpush3.bf16.msra.mxu0 %v5693_v36 }
 0x6b6   : > { %5466 = vmatmul.mubr.msk.bf16.vlgmr.msra.gmra.mrb[64].mxu1 %vm1556_vm2, %v2949_v27  ;;  %5471 = vmatprep.subr.bf16.mxu0 %v5811_v2 }
 0x6b7   : > { %5478 = vmatpush3.bf16.msra.mxu1 %v5694_v37  ;;  %5481 = vmatprep.mubr.msk.bf16.mxu1 %vm5812_vm1, %v5811_v2 }
 0x6b8   : > { %5479 = vmatprep.subr.bf16.mxu1 %v5811_v2 }
 0x6b9   : > { %5472 = vmatpush3.bf16.msra.mxu0 %v5695_v38 }
 0x6ba   : > { %5485 = vmatprep.subr.bf16.mxu0 %v5811_v2 }
 0x6bb   : > { %5480 = vmatpush3.bf16.msra.mxu1 %v5696_v39 }
 0x6bc   : > { %5491 = vmatprep.subr.bf16.mxu1 %v5811_v2  ;;  %5474 = vmatmul.mubr.msk.bf16.vlgmr.msra.gmra.mrb[68].mxu0 %vm1556_vm2, %v2949_v27 }
 0x6bd   : > { %5487 = vmatprep.mubr.msk.bf16.mxu0 %vm5812_vm1, %v5811_v2 }
 0x6be   : > { %5482 = vmatmul.mubr.msk.bf16.vlgmr.msra.gmra.mrb[68].mxu1 %vm1556_vm2, %v2949_v27 }
 0x6bf   : > { %5493 = vmatprep.mubr.msk.bf16.mxu1 %vm5812_vm1, %v5811_v2 }
 0x767   : > { %v3023_v40 = vpop.f32.mrb[48].mxu0  ;;  %v3075_v41 = vpop.f32.mrb[48].mxu1 }
 0x768   : > { %v5395_v44 = vpop.f32.mrb[49].mxu0  ;;  %v5403_v45 = vpop.f32.mrb[49].mxu1  ;;  %v3024_v15 = vadd.f32 %v5006_v9, %v3023_v40  ;;  %v3076_v17 = vadd.f32 %v5007_v10, %v3075_v41  ;;  %v5038_v40 = vld [vmem:[%s6068_s3] ss:$0 sm:$0xff] }
 0x769   : > { %v3026_v46 = vpop.f32.mrb[50].mxu0  ;;  %v3078_v47 = vpop.f32.mrb[50].mxu1  ;;  %v5039_v44 = vld [vmem:[%s6068_s3 + $0x1] ss:$0 sm:$0xff] }
 0x76a   : > { %v5396_v48 = vpop.f32.mrb[51].mxu0  ;;  %v5404_v49 = vpop.f32.mrb[51].mxu1  ;;  %v3652_v26 = vpack.c.bf16 %v3024_v15, %v3024_v15  ;;  %v3653_v27 = vpack.c.bf16 %v3076_v17, %v3076_v17 }
 0x76f   : > { %v3127_v50 = vpop.f32.mrb[52].mxu0  ;;  %v3179_v51 = vpop.f32.mrb[52].mxu1 }
 0x770   : > { %v5411_v53 = vpop.f32.mrb[53].mxu0  ;;  %v5419_v55 = vpop.f32.mrb[53].mxu1  ;;  %v3128_v36 = vadd.f32 %v5008_v32, %v3127_v50  ;;  %v3180_v37 = vadd.f32 %v5009_v33, %v3179_v51 }
 0x771   : > { %v3130_v56 = vpop.f32.mrb[54].mxu0  ;;  %v3182_v57 = vpop.f32.mrb[54].mxu1 }
 0x772   : > { %v5412_v58 = vpop.f32.mrb[55].mxu0  ;;  %v5420_v59 = vpop.f32.mrb[55].mxu1  ;;  %v3654_v38 = vpack.c.bf16 %v3128_v36, %v3128_v36  ;;  %v3655_v39 = vpack.c.bf16 %v3180_v37, %v3180_v37 }
 0x777   : > { %v3258_v61 = vpop.f32.mrb[56].mxu0  ;;  %v3310_v43 = vpop.f32.mrb[56].mxu1 }
 0x778   : > { %v3259_v62 = vadd.f32 %v5022_v60, %v3258_v61  ;;  %v3311_v63 = vadd.f32 %v5023_v42, %v3310_v43  ;;  %v5427_v0 = vpop.f32.mrb[57].mxu0  ;;  %v5435_v1 = vpop.f32.mrb[57].mxu1 }
 0x779   : > { %v3261_v3 = vpop.f32.mrb[58].mxu0  ;;  %v3313_v4 = vpop.f32.mrb[58].mxu1 }
 0x77a   : > { %v3656_v5 = vpack.c.bf16 %v3259_v62, %v3259_v62  ;;  %v3657_v7 = vpack.c.bf16 %v3311_v63, %v3311_v63  ;;  %v5428_v6 = vpop.f32.mrb[59].mxu0  ;;  %v5436_v8 = vpop.f32.mrb[59].mxu1  ;;  %v1451_v3 = vld [vmem:[%s6697_s8] sm:$0x1] }
 0x77b   : > { %vm1452_vm7 = vcmp.gt.f32.partialorder %v1451_v3, 0.5 }
 0x77c   : > { %v3670_v11 = vsel %vm2228_vm3, %v3656_v5, 0  ;;  %v3716_v12 = vsel %vm2228_vm3, %v3657_v7, 0  ;;  %v1453_v4 = vsel %vm1452_vm7, -1e+09, %v5811_v2 }
 0x77d   : > { %5486 = vmatpush3.bf16.xpose.msra.mxu0 %v3670_v11  ;;  %5492 = vmatpush3.bf16.xpose.msra.mxu1 %v3716_v12  ;;  %v3664_v5 = vrot.slane %v1453_v4, %v1447_v54 }
 0x77e   : > { %5497 = vmatprep.subr.bf16.mxu0 %v5811_v2  ;;  %5503 = vmatprep.subr.bf16.mxu1 %v5811_v2 }
 0x77f   : > { %v3362_v18 = vpop.f32.mrb[60].mxu0  ;;  %v3414_v19 = vpop.f32.mrb[60].mxu1 }
 0x780   : > { %v3363_v20 = vadd.f32 %v5024_v13, %v3362_v18  ;;  %v3415_v21 = vadd.f32 %v5025_v14, %v3414_v19  ;;  %v5443_v22 = vpop.f32.mrb[61].mxu0  ;;  %v5451_v23 = vpop.f32.mrb[61].mxu1 }
 0x781   : > { %v3365_v24 = vpop.f32.mrb[62].mxu0  ;;  %v3417_v25 = vpop.f32.mrb[62].mxu1 }
 0x782   : > { %v3658_v28 = vpack.c.bf16 %v3363_v20, %v3363_v20  ;;  %v3659_v29 = vpack.c.bf16 %v3415_v21, %v3415_v21  ;;  %v5444_v30 = vpop.f32.mrb[63].mxu0  ;;  %v5452_v31 = vpop.f32.mrb[63].mxu1 }
 0x784   : > { %v3762_v34 = vsel %vm2228_vm3, %v3658_v28, 0  ;;  %v3808_v35 = vsel %vm2228_vm3, %v3659_v29, 0  ;;  %5488 = vmatmul.mubr.msk.bf16.vlgmr.msra.gmra.mrb[72].mxu0 %vm2228_vm3, %v3652_v26  ;;  %5494 = vmatmul.mubr.msk.bf16.vlgmr.msra.gmra.mrb[72].mxu1 %vm2228_vm3, %v3653_v27 }
 0x785   : > { %5498 = vmatpush3.bf16.xpose.msra.mxu0 %v3762_v34  ;;  %5504 = vmatpush3.bf16.xpose.msra.mxu1 %v3808_v35 }
 0x786   : > { %5499 = vmatprep.mubr.msk.bf16.mxu0 %vm5812_vm1, %v5811_v2  ;;  %5505 = vmatprep.mubr.msk.bf16.mxu1 %vm5812_vm1, %v5811_v2 }
 0x787   : > { %5509 = vmatprep.subr.bf16.mxu0 %v5811_v2  ;;  %5515 = vmatprep.subr.bf16.mxu1 %v5811_v2  ;;  %v3490_v41 = vpop.f32.mrb[64].mxu0 }
 0x788   : > { %v3491_v45 = vadd.f32 %v5038_v40, %v3490_v41  ;;  %v5459_v46 = vpop.f32.mrb[65].mxu0 }
 0x789   : > { %v3493_v47 = vpop.f32.mrb[66].mxu0  ;;  %v3542_v48 = vpop.f32.mrb[64].mxu1 }
 0x78a   : > { %v3898_v49 = vpack.c.bf16 %v3491_v45, %v3491_v45  ;;  %v3543_v50 = vadd.f32 %v5039_v44, %v3542_v48  ;;  %v5460_v51 = vpop.f32.mrb[67].mxu0  ;;  %v5467_v53 = vpop.f32.mrb[65].mxu1 }
 0x78b   : > { %v3545_v55 = vpop.f32.mrb[66].mxu1 }
 0x78c   : > { %5500 = vmatmul.mubr.msk.bf16.vlgmr.msra.gmra.mrb[76].mxu0 %vm2228_vm3, %v3654_v38  ;;  %5506 = vmatmul.mubr.msk.bf16.vlgmr.msra.gmra.mrb[76].mxu1 %vm2228_vm3, %v3655_v39  ;;  %v3906_v56 = vsel %vm2468_vm4, %v3898_v49, 0  ;;  %v3899_v57 = vpack.c.bf16 %v3543_v50, %v3543_v50  ;;  %v5468_v58 = vpop.f32.mrb[67].mxu1  ;;  %v5041_v55 = vld [vmem:[%s6068_s3 + $0x3] ss:$0 sm:$0xff] }
 0x78d   : > { %5511 = vmatprep.mubr.msk.bf16.mxu0 %vm5812_vm1, %v5811_v2  ;;  %5517 = vmatprep.mubr.msk.bf16.mxu1 %vm5812_vm1, %v5811_v2 }
 0x78e   : > { %5510 = vmatpush3.bf16.msra.mxu0 %v3906_v56  ;;  %v3952_v59 = vsel %vm2468_vm4, %v3899_v57, 0  ;;  %v5040_v56 = vld [vmem:[%s6068_s3 + $0x2] ss:$0 sm:$0xff] }
 0x78f   : > { %5521 = vmatprep.subr.bf16.mxu0 %v5811_v2  ;;  %5516 = vmatpush3.bf16.msra.mxu1 %v3952_v59  ;;  %v6450_v60 = vpop.f32.mrb[68].mxu0 }
 0x790   : > { %5527 = vmatprep.subr.bf16.mxu1 %v5811_v2  ;;  %v5475_v61 = vpop.f32.mrb[69].mxu0  ;;  %v3595_v59 = vadd.f32 %v5040_v56, %v6450_v60 }
 0x791   : > { %v6452_v42 = vpop.f32.mrb[68].mxu1  ;;  %v3597_v62 = vpop.f32.mrb[70].mxu0 }
 0x792   : > { %v5483_v43 = vpop.f32.mrb[69].mxu1  ;;  %v5476_v0 = vpop.f32.mrb[71].mxu0  ;;  %v3647_v57 = vadd.f32 %v5041_v55, %v6452_v42 }
 0x793   : > { %v3649_v63 = vpop.f32.mrb[70].mxu1 }
 0x794   : > { %v5484_v1 = vpop.f32.mrb[71].mxu1  ;;  %v3901_v63 = vpack.c.bf16 %v3647_v57, %v3647_v57 }
 0x795   : > { %v3900_v1 = vpack.c.bf16 %v3595_v59, %v3595_v59 }
 0x797   : > { %v3998_v42 = vsel %vm2468_vm4, %v3900_v1, 0 }
 0x857   : > { %v3706_v7 = vpop.f32.mrb[72].mxu0  ;;  %v3752_v6 = vpop.f32.mrb[72].mxu1 }
 0x858   : > { %v3707_v8 = vadd.f32 %v3706_v7, %v3664_v5  ;;  %v3753_v9 = vadd.f32 %v3752_v6, %v3664_v5  ;;  %v5489_v10 = vpop.f32.mrb[73].mxu0  ;;  %v5495_v11 = vpop.f32.mrb[73].mxu1  ;;  %v4044_v7 = vsel %vm2468_vm4, %v3901_v63, 0  ;;  %v2944_v6 = vld [vmem:[%s6071_s30 + $0x4] sm:$0xf] }
 0x859   : > { %v3709_v12 = vpop.f32.mrb[74].mxu0  ;;  %v3755_v13 = vpop.f32.mrb[74].mxu1  ;;  %v2943_v10 = vld [vmem:[%s6071_s30] sm:$0xf] }
 0x85a   : > { %v5490_v14 = vpop.f32.mrb[75].mxu0  ;;  %v5496_v15 = vpop.f32.mrb[75].mxu1  ;;  %v3853_v17 = vsel %vm2228_vm3, %v3753_v9, -inf  ;;  %v3850_v18 = vsel %vm2228_vm3, %v3707_v8, -inf  ;;  %v4140_v13 = vsel %vm2468_vm4, %v2944_v6, 0 }
 0x85b   : > { %3854 = vmax.xlane.f32.xlu1 %v3853_v17  ;;  %3851 = vmax.xlane.f32.xlu0 %v3850_v18  ;;  %v4094_v15 = vsel %vm2468_vm4, %v2943_v10, 0  ;;  %v2946_v17 = vld [vmem:[%s6071_s30 + $0xc] sm:$0xf]  ;;  %v2945_v18 = vld [vmem:[%s6071_s30 + $0x8] sm:$0xf]  ;;  %v5697_v10 = vld [vmem:[%s6080_s0] sm:$0xff]  }
 0x85c   : > { %v5066_v63 = vld [vmem:[%s1392_s15] ss:$0 sm:$0xff] }
 0x85f   : > { %v3798_v19 = vpop.f32.mrb[76].mxu0  ;;  %v3844_v20 = vpop.f32.mrb[76].mxu1 }
 0x860   : > { %v3799_v52 = vadd.f32 %v3798_v19, %v3664_v5  ;;  %v3845_v54 = vadd.f32 %v3844_v20, %v3664_v5  ;;  %v5501_v21 = vpop.f32.mrb[77].mxu0  ;;  %v5507_v22 = vpop.f32.mrb[77].mxu1 }
 0x861   : > { %v3801_v23 = vpop.f32.mrb[78].mxu0  ;;  %v3847_v24 = vpop.f32.mrb[78].mxu1  ;;  %v4232_v21 = vsel %vm2468_vm4, %v2946_v17, 0 }
 0x862   : > { %v5502_v25 = vpop.f32.mrb[79].mxu0  ;;  %v5508_v26 = vpop.f32.mrb[79].mxu1  ;;  %v3859_v27 = vsel %vm2228_vm3, %v3845_v54, -inf  ;;  %v3856_v28 = vsel %vm2228_vm3, %v3799_v52, -inf }
 0x863   : > { %3860 = vmax.xlane.f32.xlu1 %v3859_v27  ;;  %3857 = vmax.xlane.f32.xlu0 %v3856_v28  ;;  %v4186_v25 = vsel %vm2468_vm4, %v2945_v18, 0  ;;  %v5067_v18 = vld [vmem:[%s1395_s6] ss:$0 sm:$0xff] }
 0x8e8   : > { %v3855_v29 = vpop.xlane.xlu1 %3854  ;;  %v3852_v30 = vpop.xlane.xlu0 %3851 }
 0x8e9   : > { %v3863_v31 = vsub.f32 %v3753_v9, %v3855_v29  ;;  %v3862_v32 = vsub.f32 %v3707_v8, %v3852_v30 }
 0x8eb   : > { %v3868_v33 = vmul.f32 1.442695, %v3863_v31  ;;  %v3866_v34 = vmul.f32 1.442695, %v3862_v32 }
 0x8ed   : > { %5721 = vpow2.f32 %v3868_v33 }
 0x8ee   : > { %5723 = vpow2.f32 %v3866_v34 }
 0x8f0   : > { %v3861_v35 = vpop.xlane.xlu1 %3860  ;;  %v3858_v36 = vpop.xlane.xlu0 %3857 }
 0x8f1   : > { %v3865_v37 = vsub.f32 %v3845_v54, %v3861_v35  ;;  %v3864_v38 = vsub.f32 %v3799_v52, %v3858_v36 }
 0x8f3   : > { %v3872_v39 = vmul.f32 1.442695, %v3865_v37  ;;  %v3870_v40 = vmul.f32 1.442695, %v3864_v38 }
 0x8f5   : > { %5725 = vpow2.f32 %v3872_v39 }
 0x8f6   : > { %5727 = vpow2.f32 %v3870_v40 }
 0x8f7   : > { %v5722_v41 = vpop.eup %5721 }
 0x8f8   : > { %v5724_v44 = vpop.eup %5723  ;;  %v3877_v45 = vsel %vm2228_vm3, %v5722_v41, 0.0 }
 0x8f9   : > { %3878 = vadd.xlane.f32.xlu1 %v3877_v45  ;;  %v3874_v46 = vsel %vm2228_vm3, %v5724_v44, 0.0 }
 0x8fa   : > { %3875 = vadd.xlane.f32.xlu0 %v3874_v46 }
 0x8ff   : > { %v5726_v47 = vpop.eup %5725 }
 0x900   : > { %v5728_v48 = vpop.eup %5727  ;;  %v3883_v49 = vsel %vm2228_vm3, %v5726_v47, 0.0 }
 0x901   : > { %3884 = vadd.xlane.f32.xlu1 %v3883_v49  ;;  %v3880_v50 = vsel %vm2228_vm3, %v5728_v48, 0.0 }
 0x902   : > { %3881 = vadd.xlane.f32.xlu0 %v3880_v50 }
 0x986   : > { %v3879_v51 = vpop.xlane.xlu1 %3878 }
 0x987   : > { %5729 = vrcp.f32 %v3879_v51  ;;  %v3876_v53 = vpop.xlane.xlu0 %3875 }
 0x988   : > { %5731 = vrcp.f32 %v3876_v53 }
 0x98e   : > { %v3885_v58 = vpop.xlane.xlu1 %3884 }
 0x98f   : > { %5733 = vrcp.f32 %v3885_v58  ;;  %v3882_v61 = vpop.xlane.xlu0 %3881 }
 0x990   : > { %5735 = vrcp.f32 %v3882_v61 }
 0x991   : > { %v5730_v43 = vpop.eup %5729 }
 0x992   : > { %v5732_v62 = vpop.eup %5731  ;;  %v3891_v0 = vmul.f32 %v5730_v43, %v5722_v41 }
 0x993   : > { %v3890_v3 = vmul.f32 %v5732_v62, %v5724_v44 }
 0x994   : > { %v3895_v4 = vpack.c.bf16 %v3891_v0, %v3891_v0 }
 0x995   : > { %v3894_v5 = vpack.c.bf16 %v3890_v3, %v3890_v3 }
 0x996   : > { %5518 = vmatmul.mubr.msk.bf16.vlgmr.msra.gmra.mrb[80].mxu1 %vm2228_vm3, %v3895_v4 }
 0x997   : > { %5512 = vmatmul.mubr.msk.bf16.vlgmr.msra.gmra.mrb[80].mxu0 %vm2228_vm3, %v3894_v5  ;;  %5528 = vmatpush3.bf16.msra.mxu1 %v4044_v7 }
 0x998   : > { %5522 = vmatpush3.bf16.msra.mxu0 %v3998_v42  ;;  %5523 = vmatprep.mubr.msk.bf16.mxu0 %vm5812_vm1, %v5811_v2 }
 0x999   : > { %v5734_v60 = vpop.eup %5733  ;;  %5529 = vmatprep.mubr.msk.bf16.mxu1 %vm5812_vm1, %v5811_v2  ;;  %5533 = vmatprep.subr.bf16.mxu0 %v5811_v2 }
 0x99a   : > { %v5736_v8 = vpop.eup %5735  ;;  %v3893_v9 = vmul.f32 %v5734_v60, %v5726_v47  ;;  %5539 = vmatprep.subr.bf16.mxu1 %v5811_v2 }
 0x99b   : > { %v3892_v11 = vmul.f32 %v5736_v8, %v5728_v48 }
 0x99c   : > { %v3897_v12 = vpack.c.bf16 %v3893_v9, %v3893_v9 }
 0x99d   : > { %v3896_v14 = vpack.c.bf16 %v3892_v11, %v3892_v11  ;;  %v5698_v11 = vld [vmem:[%s6080_s0 + $0x8] sm:$0xff]  }
 0x99e   : > { %5530 = vmatmul.mubr.msk.bf16.vlgmr.msra.gmra.mrb[84].mxu1 %vm2228_vm3, %v3897_v12  ;;  %v5700_v12 = vld [vmem:[%s6088_s20 + $0x8] sm:$0xff]  }
 0x99f   : > { %5524 = vmatmul.mubr.msk.bf16.vlgmr.msra.gmra.mrb[84].mxu0 %vm2228_vm3, %v3896_v14  ;;  %5540 = vmatpush3.bf16.msra.mxu1 %v4140_v13 }
 0x9a0   : > { %5534 = vmatpush3.bf16.msra.mxu0 %v4094_v15  ;;  %5535 = vmatprep.mubr.msk.bf16.mxu0 %vm5812_vm1, %v5811_v2 }
 0x9a1   : > { %5541 = vmatprep.mubr.msk.bf16.mxu1 %vm5812_vm1, %v5811_v2  ;;  %5545 = vmatprep.subr.bf16.mxu0 %v5811_v2 }
 0x9a2   : > { %5551 = vmatprep.subr.bf16.mxu1 %v5811_v2 }
 0xa69   : > { %v3988_v19 = vpop.f32.mrb[80].mxu1 }
 0xa6a   : > { %v3942_v20 = vpop.f32.mrb[80].mxu0  ;;  %v4087_v52 = vpack.c.bf16 %v3988_v19, %v3988_v19  ;;  %v5519_v54 = vpop.f32.mrb[81].mxu1 }
 0xa6b   : > { %v4086_v22 = vpack.c.bf16 %v3942_v20, %v3942_v20  ;;  %v5513_v23 = vpop.f32.mrb[81].mxu0  ;;  %v3991_v24 = vpop.f32.mrb[82].mxu1  ;;  %v5068_v20 = vld [vmem:[%s1398_s10] ss:$0 sm:$0xff] }
 0xa6c   : > { %v3945_v26 = vpop.f32.mrb[82].mxu0  ;;  %v5520_v27 = vpop.f32.mrb[83].mxu1  ;;  %5542 = vmatmul.mubr.msk.bf16.vlgmr.msra.gmra.mrb[88].mxu1 %vm2228_vm3, %v4087_v52  ;;  %v5702_v23 = vld [vmem:[%s6088_s20 + $0x18] sm:$0xff]   ;;  %v5069_v24 = vld [vmem:[%s1406_s26] ss:$0 sm:$0xff] }
 0xa6d   : > { %v5514_v28 = vpop.f32.mrb[83].mxu0  ;;  %5536 = vmatmul.mubr.msk.bf16.vlgmr.msra.gmra.mrb[88].mxu0 %vm2228_vm3, %v4086_v22  ;;  %5552 = vmatpush3.bf16.msra.mxu1 %v4232_v21  ;;  %v5701_v22 = vld [vmem:[%s6088_s20 + $0x10] sm:$0xff]  }
 0xa6e   : > { %5546 = vmatpush3.bf16.msra.mxu0 %v4186_v25  ;;  %5547 = vmatprep.mubr.msk.bf16.mxu0 %vm5812_vm1, %v5811_v2 }
 0xa6f   : > { %5553 = vmatprep.mubr.msk.bf16.mxu1 %vm5812_vm1, %v5811_v2  ;;  %5557 = vmatprep.subr.bf16.mxu0 %v5811_v2 }
 0xa70   : > { %5565 = vmatprep.subr.bf16.mxu1 %v5811_v2 }
 0xa71   : > { %v4080_v29 = vpop.f32.mrb[84].mxu1 }
 0xa72   : > { %v4034_v30 = vpop.f32.mrb[84].mxu0  ;;  %v4089_v31 = vpack.c.bf16 %v4080_v29, %v4080_v29  ;;  %v5531_v32 = vpop.f32.mrb[85].mxu1 }
 0xa73   : > { %v4088_v33 = vpack.c.bf16 %v4034_v30, %v4034_v30  ;;  %v5525_v34 = vpop.f32.mrb[85].mxu0  ;;  %v4083_v35 = vpop.f32.mrb[86].mxu1  ;;  %v5073_v32 = vld [vmem:[%s1414_s22] ss:$0 sm:$0xff] }
 0xa74   : > { %v4037_v36 = vpop.f32.mrb[86].mxu0  ;;  %v5532_v37 = vpop.f32.mrb[87].mxu1  ;;  %5554 = vmatmul.mubr.msk.bf16.vlgmr.msra.gmra.mrb[92].mxu1 %vm2228_vm3, %v4089_v31 }
 0xa75   : > { %v5526_v38 = vpop.f32.mrb[87].mxu0  ;;  %5548 = vmatmul.mubr.msk.bf16.vlgmr.msra.gmra.mrb[92].mxu0 %vm2228_vm3, %v4088_v33  ;;  %5573 = vmatprep.mubr.msk.bf16.mxu1 %vm5812_vm1, %v5811_v2 }
 0xa76   : > { %5561 = vmatprep.mubr.msk.bf16.mxu0 %vm5812_vm1, %v5811_v2  ;;  %5558 = vmatpush3.bf16.msra.mxu0 %v5697_v10 }
 0xa77   : > { %5559 = vmatprep.subr.bf16.mxu0 %v5811_v2 }
 0xa7a   : > { %5560 = vmatpush3.bf16.msra.mxu0 %v5698_v11 }
 0xb3f   : > { %v4176_v39 = vpop.f32.mrb[88].mxu1 }
 0xb40   : > { %v4130_v40 = vpop.f32.mrb[88].mxu0  ;;  %v4275_v41 = vsel %vm1556_vm2, %v4176_v39, 0.0  ;;  %v5543_v44 = vpop.f32.mrb[89].mxu1 }
 0xb41   : > { %v4274_v45 = vsel %vm1556_vm2, %v4130_v40, 0.0  ;;  %v5537_v46 = vpop.f32.mrb[89].mxu0  ;;  %v4179_v47 = vpop.f32.mrb[90].mxu1 }
 0xb42   : > { %v4276_v48 = vadd.f32 %v4275_v41, %v4274_v45  ;;  %v4133_v49 = vpop.f32.mrb[90].mxu0  ;;  %v5544_v50 = vpop.f32.mrb[91].mxu1 }
 0xb43   : > { %v5538_v51 = vpop.f32.mrb[91].mxu0  ;;  %v5079_v50 = vld [vmem:[%s1417_s23] ss:$0 sm:$0xff] }
 0xb47   : > { %v4268_v53 = vpop.f32.mrb[92].mxu1 }
 0xb48   : > { %v4222_v55 = vpop.f32.mrb[92].mxu0  ;;  %v5555_v56 = vpop.f32.mrb[93].mxu1  ;;  %v4279_v0 = vsel %vm1556_vm2, %v4268_v53, 0.0  ;;  %v5080_v53 = vld [vmem:[%s1420_s24] ss:$0 sm:$0xff] }
 0xb49   : > { %v4277_v57 = vsel %vm1556_vm2, %v4222_v55, 0.0  ;;  %v5549_v58 = vpop.f32.mrb[93].mxu0  ;;  %v4271_v59 = vpop.f32.mrb[94].mxu1 }
 0xb4a   : > { %v4278_v61 = vadd.f32 %v4277_v57, %v4276_v48  ;;  %v4225_v43 = vpop.f32.mrb[94].mxu0  ;;  %v5556_v62 = vpop.f32.mrb[95].mxu1 }
 0xb4b   : > { %v5550_v1 = vpop.f32.mrb[95].mxu0 }
 0xb4c   : > { %v4280_v3 = vadd.f32 %v4279_v0, %v4278_v61 }
 0xb4e   : > { %v4287_v4 = vadd.f32 %v5066_v63, %v4280_v3 }
 0xb50   : > { %v4290_v5 = vadd.f32 %v4287_v4, %v6333_v16  ;;  %v5699_v16 = vld [vmem:[%s6088_s20] sm:$0xff]  }
 0xb51   : > { %5566 = vmatpush3.bf16.msra.mxu1 %v5699_v16 }
 0xb52   : > { %v4291_v7 = vsel %vm1556_vm2, %v4290_v5, 0.0  ;;  %5567 = vmatprep.subr.bf16.mxu1 %v5811_v2 }
 0xb53   : > { %4292 = vadd.xlane.f32.xlu0 %v4291_v7 }
 0xb55   : > { %5568 = vmatpush3.bf16.msra.mxu1 %v5700_v12 }
 0xb56   : > { %5569 = vmatprep.subr.bf16.mxu1 %v5811_v2 }
 0xb59   : > { %5570 = vmatpush3.bf16.msra.mxu1 %v5701_v22 }
 0xb5a   : > { %5571 = vmatprep.subr.bf16.mxu1 %v5811_v2 }
 0xb5d   : > { %5572 = vmatpush3.bf16.msra.mxu1 %v5702_v23 }
 0xbe0   : > { %v4293_v42 = vpop.xlane.xlu0 %4292 }
 0xbe1   : > { %v4294_v60 = vmul.f32 0.03125, %v4293_v42 }
 0xbe3   : > { %v4295_v6 = vsub.f32 %v4290_v5, %v4294_v60 }
 0xbe5   : > { %v4296_v8 = vmul.f32 %v4295_v6, %v4295_v6 }
 0xbe7   : > { %v4297_v9 = vsel %vm1556_vm2, %v4296_v8, 0.0 }
 0xbe8   : > { %4298 = vadd.xlane.f32.xlu1 %v4297_v9 }
 0xc75   : > { %v4299_v13 = vpop.xlane.xlu1 %4298 }
 0xc76   : > { %v4300_v14 = vmul.f32 0.03125, %v4299_v13 }
 0xc78   : > { %v4301_v15 = vadd.f32 1e-05, %v4300_v14 }
 0xc7a   : > { %5737 = vrsqrt.f32 %v4301_v15 }
 0xc84   : > { %v5738_v17 = vpop.eup %5737 }
 0xc85   : > { %v4303_v19 = vmul.f32 %v5738_v17, %v4295_v6 }
 0xc87   : > { %v4310_v52 = vmul.f32 %v5067_v18, %v4303_v19 }
 0xc89   : > { %v4317_v54 = vadd.f32 %v5068_v20, %v4310_v52 }
 0xc8b   : > { %v4323_v21 = vpack.c.bf16 %v4317_v54, %v4317_v54 }
 0xc8d   : > { %5562 = vmatmul.mubr.msk.bf16.vlgmr.msra.gmra.mrb[96].mxu0 %vm1556_vm2, %v4323_v21 }
 0xd60   : > { %v4379_v25 = vpop.f32.mrb[96].mxu0 }
 0xd61   : > { %v4380_v26 = vadd.f32 %v5069_v24, %v4379_v25  ;;  %v5563_v27 = vpop.f32.mrb[97].mxu0 }
 0xd62   : > { %v4382_v28 = vpop.f32.mrb[98].mxu0 }
 0xd63   : > { %v4385_v29 = vmax.f32 %v4380_v26, 0.0  ;;  %v5564_v30 = vpop.f32.mrb[99].mxu0 }
 0xd65   : > { %v4395_v31 = vpack.c.bf16 %v4385_v29, %v4385_v29 }
 0xd67   : > { %5574 = vmatmul.mubr.msk.bf16.vlgmr.msra.gmra.mrb[96].mxu1 %vm4426_vm8, %v4395_v31 }
 0xe3a   : > { %v4464_v33 = vpop.f32.mrb[96].mxu1 }
 0xe3b   : > { %v4465_v34 = vadd.f32 %v5073_v32, %v4464_v33  ;;  %v5575_v35 = vpop.f32.mrb[97].mxu1 }
 0xe3c   : > { %v4467_v36 = vpop.f32.mrb[98].mxu1 }
 0xe3d   : > { %v5576_v2 = vpop.f32.mrb[99].mxu1  ;;  %v4472_v37 = vadd.f32 %v4465_v34, %v4317_v54 }
 0xe3f   : > { %v4473_v38 = vsel %vm1556_vm2, %v4472_v37, 0.0 }
 0xe40   : > { %4474 = vadd.xlane.f32.xlu0 %v4473_v38 }
 0xecd   : > { %v4475_v39 = vpop.xlane.xlu0 %4474 }
 0xece   : > { %v4476_v40 = vmul.f32 0.03125, %v4475_v39 }
 0xed0   : > { %v4477_v41 = vsub.f32 %v4472_v37, %v4476_v40 }
 0xed2   : > { %v4478_v44 = vmul.f32 %v4477_v41, %v4477_v41 }
 0xed4   : > { %v4479_v45 = vsel %vm1556_vm2, %v4478_v44, 0.0 }
 0xed5   : > { %4480 = vadd.xlane.f32.xlu1 %v4479_v45 }
 0xf62   : > { %v4481_v46 = vpop.xlane.xlu1 %4480 }
 0xf63   : > { %v4482_v47 = vmul.f32 0.03125, %v4481_v46 }
 0xf65   : > { %v4483_v48 = vadd.f32 1e-05, %v4482_v47 }
 0xf67   : > { %5739 = vrsqrt.f32 %v4483_v48 }
 0xf71   : > { %v5740_v49 = vpop.eup %5739 }
 0xf72   : > { %v4485_v51 = vmul.f32 %v5740_v49, %v4477_v41 }
 0xf74   : > { %v4492_v55 = vmul.f32 %v5079_v50, %v4485_v51 }
 0xf76   : > { %v4499_v56 = vadd.f32 %v5080_v53, %v4492_v55 }
 0xf78   : > { %4500 = vst.msk [vmem:[#allocation2] sm:$0xff] %vm1556_vm2, %v4499_v56  ;;  %4501 = vst.msk [vmem:[%s1424_s12] sm:$0xff] %vm1556_vm2, %v4499_v56 }
 0xf79 PF: > { %s6706_s26 = sld [smem:[#allocation37_spill]]  ;;  %s6707_s15 = sld [smem:[#allocation35_spill]] }
 0xf7a   : > { %s6708_s16 = sld [smem:[#allocation36_spill]]  ;;  %s6709_s18 = sld [smem:[#allocation38_spill]] }
 0xf7b   : > { %s6710_s22 = sld [smem:[#allocation39_spill]] }
 0xf7f   : > { %s71_s23 = sadd.s32 1, %s6706_s26  }
 0xf80   : > { %p68_p8 = scmp.ge.s32.totalorder %s71_s23, 6  }
 0xf82   :  { %70 = sbr.rel (!%p68_p8) target bundleno = 74 (0x4a), region = 291 }

</bundles_post_ra>
